<compile_context>
chip_gen: v5e
topology: v5e:2x2
jax: 0.10.0
libtpu: 0.0.40
codegen_flags: <defaults>
</compile_context>

<pallas_src>
import jax
import jax.numpy as jnp
from jax.experimental import pallas as pl
from jax.experimental.pallas import tpu as pltpu

# ---- config (small, deterministic) ------------------------------------------
C = 4            # config.C   (EEG channels)
T = 128          # config.T   (time samples / freq bins)
NUM_CLASS = 4    # config.num_class
N = 2            # batch
C2 = 2 * C
NC6 = 6 * NUM_CLASS
KW = 31          # conv2 kernel width
PADW = (KW - 1) // 2
KW_PAD = 32      # pad taps 31 -> 32 (last tap has zero weight)
TAPS_PER_CHUNK = 8
N_CHUNKS = KW_PAD // TAPS_PER_CHUNK   # 4
EPS = 1e-5


# ---- Pallas kernel -----------------------------------------------------------
def ssvepformer_kernel(x_ref, w1_ref, w2_ref, wcat_ref, wfc3_ref,
                       rowv_ref, bcol_ref, small_ref, o_ref):
    R = w1_ref.shape[0]            # N * 2C (merged batch rows)
    NB = R // C2                   # batch size
    CHUNK = TAPS_PER_CHUNK * R     # im2col rows / w2 lanes per chunk

    # --- hoisted, pre-broadcast parameter tiles (broadcast_in_dim is not CSE'd)
    ln1w = jnp.broadcast_to(rowv_ref[0:1, :], (R, T))
    ln1b = jnp.broadcast_to(rowv_ref[1:2, :], (R, T))
    ln2w = jnp.broadcast_to(rowv_ref[2:3, :], (R, T))
    ln2b = jnp.broadcast_to(rowv_ref[3:4, :], (R, T))
    ln3w = jnp.broadcast_to(rowv_ref[4:5, :], (R, T))
    ln3b = jnp.broadcast_to(rowv_ref[5:6, :], (R, T))
    bfc1 = jnp.broadcast_to(rowv_ref[6:7, :], (R, T))
    b1 = jnp.broadcast_to(bcol_ref[:, 0:1], (R, T))
    b2 = jnp.broadcast_to(bcol_ref[:, 1:2], (R, T))
    ln4w, ln4b = small_ref[0:1, :], small_ref[1:2, :]
    bfc2 = small_ref[2:3, :]
    bfc3 = small_ref[3:4, 0:NUM_CLASS]
    wfc1_t = wcat_ref[:, 0:T]                      # (T, T)       lane offset 0
    wfc2_cat = wcat_ref[:, T:T + C2 * NC6]         # (T, 2C*6nc)  lane offset 128

    lane = jax.lax.broadcasted_iota(jnp.int32, (R, T), 1)   # hoisted once

    def layer_norm(v, w, b):
        # one-pass moments: the two lane reductions are independent (dual XLU)
        mu = jnp.mean(v, axis=-1, keepdims=True)
        ms = jnp.mean(v * v, axis=-1, keepdims=True)
        var = jnp.maximum(ms - mu * mu, 0.0)
        return (v - mu) * jax.lax.rsqrt(var + EPS) * w + b

    def gelu(v):
        # tanh form -> EUP slot (VALU is the binding unit in this kernel)
        return jax.nn.gelu(v, approximate=True)

    def conv31(y):
        # "same" k=31 conv along T as 4 accumulated K=128 MXU matmuls over
        # 8-tap im2col chunks; the padded 32nd tap has zero weight so its
        # stack content is irrelevant.  Keeps the live im2col set small
        # (no 62-vreg concatenation -> no spills).
        acc = b2                                       # start from conv bias
        for ci in range(N_CHUNKS):
            parts = []
            for kk in range(TAPS_PER_CHUNK):
                k = ci * TAPS_PER_CHUNK + kk
                d = k - PADW                           # shifted[t] = y[t + d]
                if k >= KW or d == 0:                  # pad tap / center tap
                    parts.append(y)
                else:
                    r = pltpu.roll(y, shift=(-d) % T, axis=1)
                    if d > 0:
                        r = jnp.where(lane < T - d, r, 0.0)
                    else:
                        r = jnp.where(lane >= -d, r, 0.0)
                    parts.append(r)
            s = jnp.concatenate(parts, axis=0)         # (8*R, T) sublane-aligned
            acc = acc + jnp.dot(w2_ref[:, ci * CHUNK:(ci + 1) * CHUNK], s,
                                preferred_element_type=jnp.float32)
        return acc

    def conv_block(h):
        y = layer_norm(h, ln2w, ln2b)
        z = layer_norm(conv31(y), ln2w, ln2b)
        return gelu(z) + y           # dropout == identity (inference)

    def mlp_block(h):
        y2 = layer_norm(h, ln3w, ln3b)
        z = jnp.dot(y2, wfc1_t, preferred_element_type=jnp.float32) + bfc1
        return gelu(z) + y2          # dropout == identity (inference)

    # conv1: 1x1 conv == block-diagonal channel-mixing matmul over merged batch
    h = jnp.dot(w1_ref[...], x_ref[...], preferred_element_type=jnp.float32) + b1
    h = gelu(layer_norm(h, ln1w, ln1b))

    h = conv_block(h)
    h = mlp_block(h)
    h = conv_block(h)
    h = mlp_block(h)

    # flatten + fc2: one wide matmul, then in-kernel iota masks + 2 tiny
    # selector matmuls (no div/mod, no serial per-channel loop, no concat).
    J = C2 * NC6
    jj = jax.lax.broadcasted_iota(jnp.int32, (C2, J), 1)
    cc = jax.lax.broadcasted_iota(jnp.int32, (C2, J), 0) * NC6
    blk = jnp.where((jj >= cc) & (jj < cc + NC6), 1.0, 0.0)          # (C2, J)
    fc2_mask = jnp.concatenate([blk] * NB, axis=0)                   # (R, J)
    eye_nc = jnp.where(
        jax.lax.broadcasted_iota(jnp.int32, (NC6, NC6), 0) ==
        jax.lax.broadcasted_iota(jnp.int32, (NC6, NC6), 1), 1.0, 0.0)
    sel = jnp.concatenate([eye_nc] * C2, axis=0)                     # (J, 6nc)
    rr = jax.lax.broadcasted_iota(jnp.int32, (NB, R), 1)
    bb = jax.lax.broadcasted_iota(jnp.int32, (NB, R), 0) * C2
    bsel = jnp.where((rr >= bb) & (rr < bb + C2), 1.0, 0.0)          # (NB, R)

    P = jnp.dot(h, wfc2_cat, preferred_element_type=jnp.float32)         # (R, J)
    Q = jnp.dot(P * fc2_mask, sel, preferred_element_type=jnp.float32)   # (R, 6nc)
    z = jnp.dot(bsel, Q, preferred_element_type=jnp.float32) + bfc2      # (NB, 6nc)
    z = gelu(layer_norm(z, ln4w, ln4b))
    out = jnp.dot(z, wfc3_ref[...], preferred_element_type=jnp.float32) + bfc3
    o_ref[...] = out.astype(o_ref.dtype)                                 # (NB, nc)


# ---- weight packing (plain JAX; do ONCE, off the per-call path) --------------
def pack_weights(p, n):
    R = n * C2
    eyeN = jnp.eye(n, dtype=jnp.float32)

    # conv1 weight, block-diagonal over batch: (R, n*C)
    w1_bd = jnp.einsum("nm,oc->nomc", eyeN, p["w_conv1"]).reshape(R, n * C)

    # conv2 weight -> im2col, taps padded 31->32, block-diag over batch: (R, 32*R)
    w2k = jnp.transpose(p["w_conv2"], (2, 0, 1))                      # (KW, 2C, 2C)
    w2k = jnp.pad(w2k, ((0, KW_PAD - KW), (0, 0), (0, 0)))            # (32, 2C, 2C)
    w2_bd = jnp.einsum("nm,koi->knomi", eyeN, w2k).reshape(KW_PAD, R, R)
    w2_bd = jnp.transpose(w2_bd, (1, 0, 2)).reshape(R, KW_PAD * R)

    # fc1 (T,T) and fc2 (T, 2C*6nc) concatenated along lanes (128-aligned split)
    wfc1_t = p["w_fc1"].T
    wfc2_cat = jnp.transpose(p["w_fc2"].reshape(NC6, C2, T),
                             (2, 1, 0)).reshape(T, C2 * NC6)
    wcat = jnp.concatenate([wfc1_t, wfc2_cat], axis=1)                # (T, T+192)

    wfc3_t = p["w_fc3"].T                                             # (6nc, nc)

    # T-length row vectors stacked into one (8, T) vreg-tile
    rowvecs = jnp.stack([p["ln1_w"], p["ln1_b"], p["ln2_w"], p["ln2_b"],
                         p["ln3_w"], p["ln3_b"], p["b_fc1"],
                         jnp.zeros((T,), jnp.float32)], axis=0)

    # per-channel conv biases tiled over batch, packed as (R, 2) columns
    bias_cols = jnp.stack([jnp.tile(p["b_conv1"], n),
                           jnp.tile(p["b_conv2"], n)], axis=1)

    # 6nc-length vectors stacked into one (4, 6nc) block
    bfc3_pad = jnp.zeros((NC6,), jnp.float32).at[:NUM_CLASS].set(p["b_fc3"])
    smallvecs = jnp.stack([p["ln4_w"], p["ln4_b"], p["b_fc2"], bfc3_pad], axis=0)

    return (w1_bd, w2_bd, wcat, wfc3_t, rowvecs, bias_cols, smallvecs)


def ssvepformer_pallas(x, packed):
    n, c, t = x.shape
    assert (c, t) == (C, T)
    x_m = x.reshape(n * C, T).astype(jnp.float32)
    inputs = (x_m,) + tuple(packed)
    return pl.pallas_call(
        ssvepformer_kernel,
        out_shape=jax.ShapeDtypeStruct((n, NUM_CLASS), jnp.float32),
        in_specs=[pl.BlockSpec(memory_space=pltpu.MemorySpace.VMEM)
                  for _ in inputs],
        out_specs=pl.BlockSpec(memory_space=pltpu.MemorySpace.VMEM),
    )(*inputs)


# ---- pure-JAX reference (for correctness check) ------------------------------
def ssvepformer_reference(x, p, approx_gelu=False):
    def layer_norm(v, w, b):
        mu = v.mean(-1, keepdims=True)
        var = ((v - mu) ** 2).mean(-1, keepdims=True)
        return (v - mu) / jnp.sqrt(var + EPS) * w + b

    def gelu(v):
        return jax.nn.gelu(v, approximate=approx_gelu)

    n = x.shape[0]
    h = jnp.einsum("oc,nct->not", p["w_conv1"], x) + p["b_conv1"][None, :, None]
    h = layer_norm(h, p["ln1_w"], p["ln1_b"])
    h = gelu(h)

    def conv31(y):
        pad = jnp.pad(y, ((0, 0), (0, 0), (PADW, PADW)))
        out = jnp.zeros_like(y)
        for k in range(KW):
            out = out + jnp.einsum("oi,nit->not", p["w_conv2"][:, :, k],
                                   pad[:, :, k:k + T])
        return out + p["b_conv2"][None, :, None]

    def conv_block(h):
        y = layer_norm(h, p["ln2_w"], p["ln2_b"])
        z = conv31(y)
        z = layer_norm(z, p["ln2_w"], p["ln2_b"])
        z = gelu(z)
        return z + y

    def mlp_block(h):
        y2 = layer_norm(h, p["ln3_w"], p["ln3_b"])
        z = jnp.einsum("nct,ut->ncu", y2, p["w_fc1"]) + p["b_fc1"]
        z = gelu(z)
        return z + y2

    h = conv_block(h)
    h = mlp_block(h)
    h = conv_block(h)
    h = mlp_block(h)

    flat = h.reshape(n, -1)
    z = flat @ p["w_fc2"].T + p["b_fc2"]
    z = layer_norm(z, p["ln4_w"], p["ln4_b"])
    z = gelu(z)
    return z @ p["w_fc3"].T + p["b_fc3"]


# ---- deterministic parameters -------------------------------------------------
def init_params(key):
    ks = jax.random.split(key, 12)
    s = 0.05
    return {
        "w_conv1": s * jax.random.normal(ks[0], (C2, C), jnp.float32),
        "b_conv1": s * jax.random.normal(ks[1], (C2,), jnp.float32),
        "ln1_w": jnp.ones((T,), jnp.float32), "ln1_b": jnp.zeros((T,), jnp.float32),
        "ln2_w": jnp.ones((T,), jnp.float32), "ln2_b": jnp.zeros((T,), jnp.float32),
        "ln3_w": jnp.ones((T,), jnp.float32), "ln3_b": jnp.zeros((T,), jnp.float32),
        "w_conv2": s * jax.random.normal(ks[2], (C2, C2, KW), jnp.float32),
        "b_conv2": s * jax.random.normal(ks[3], (C2,), jnp.float32),
        "w_fc1": s * jax.random.normal(ks[4], (T, T), jnp.float32),
        "b_fc1": s * jax.random.normal(ks[5], (T,), jnp.float32),
        "w_fc2": s * jax.random.normal(ks[6], (NC6, C2 * T), jnp.float32),
        "b_fc2": s * jax.random.normal(ks[7], (NC6,), jnp.float32),
        "ln4_w": jnp.ones((NC6,), jnp.float32), "ln4_b": jnp.zeros((NC6,), jnp.float32),
        "w_fc3": s * jax.random.normal(ks[8], (NUM_CLASS, NC6), jnp.float32),
        "b_fc3": s * jax.random.normal(ks[9], (NUM_CLASS,), jnp.float32),
    }


if __name__ == "__main__":
    key = jax.random.PRNGKey(0)
    kx, kp = jax.random.split(key)
    x = jax.random.normal(kx, (N, C, T), jnp.float32)
    params = init_params(kp)

    packed = pack_weights(params, N)            # constants; packed once, reused
    fwd = jax.jit(ssvepformer_pallas)

    out = jax.block_until_ready(fwd(x, packed))
    assert out.shape == (N, NUM_CLASS), out.shape

    # implementation check (reference uses the same tanh-GELU): tight tolerance
    ref_tanh = jax.block_until_ready(ssvepformer_reference(x, params, True))
    err_impl = float(jnp.max(jnp.abs(out - ref_tanh)))
    assert err_impl < 2e-3, f"mismatch vs tanh-GELU reference: {err_impl}"

    # semantics check vs exact erf F.gelu (PyTorch): looser tolerance, the
    # difference is dominated by the tanh-GELU approximation adopted for perf.
    ref_erf = jax.block_until_ready(ssvepformer_reference(x, params, False))
    err_sem = float(jnp.max(jnp.abs(out - ref_erf)))
    assert err_sem < 2e-2, f"mismatch vs exact-GELU reference: {err_sem}"

    print("KERNEL_OK")
</pallas_src>

<mosaic_0001>
module attributes {stable_mosaic.version = 11 : i64} {
  func.func @ssvepformer_kernel(%arg0: memref<8x128xf32, #tpu.memory_space<vmem>>, %arg1: memref<16x8xf32, #tpu.memory_space<vmem>>, %arg2: memref<16x512xf32, #tpu.memory_space<vmem>>, %arg3: memref<128x320xf32, #tpu.memory_space<vmem>>, %arg4: memref<24x4xf32, #tpu.memory_space<vmem>>, %arg5: memref<8x128xf32, #tpu.memory_space<vmem>>, %arg6: memref<16x2xf32, #tpu.memory_space<vmem>>, %arg7: memref<4x24xf32, #tpu.memory_space<vmem>>, %arg8: memref<2x4xf32, #tpu.memory_space<vmem>>) attributes {dimension_semantics = [], scalar_prefetch = 0 : i64, scratch_operands = 0 : i64, tpu.core_type = #tpu.core_type<tc>} {
    %c0 = arith.constant 0 : index
    %c0_0 = arith.constant 0 : index
    %0 = vector.load %arg5[%c0, %c0_0] : memref<8x128xf32, #tpu.memory_space<vmem>>, vector<1x128xf32>
    %1 = vector.shape_cast %0 : vector<1x128xf32> to vector<1x128xf32>
    %2 = vector.broadcast %1 : vector<1x128xf32> to vector<16x128xf32>
    %c1 = arith.constant 1 : index
    %c0_1 = arith.constant 0 : index
    %3 = vector.load %arg5[%c1, %c0_1] : memref<8x128xf32, #tpu.memory_space<vmem>>, vector<1x128xf32>
    %4 = vector.shape_cast %3 : vector<1x128xf32> to vector<1x128xf32>
    %5 = vector.broadcast %4 : vector<1x128xf32> to vector<16x128xf32>
    %c2 = arith.constant 2 : index
    %c0_2 = arith.constant 0 : index
    %6 = vector.load %arg5[%c2, %c0_2] : memref<8x128xf32, #tpu.memory_space<vmem>>, vector<1x128xf32>
    %7 = vector.shape_cast %6 : vector<1x128xf32> to vector<1x128xf32>
    %8 = vector.broadcast %7 : vector<1x128xf32> to vector<16x128xf32>
    %c3 = arith.constant 3 : index
    %c0_3 = arith.constant 0 : index
    %9 = vector.load %arg5[%c3, %c0_3] : memref<8x128xf32, #tpu.memory_space<vmem>>, vector<1x128xf32>
    %10 = vector.shape_cast %9 : vector<1x128xf32> to vector<1x128xf32>
    %11 = vector.broadcast %10 : vector<1x128xf32> to vector<16x128xf32>
    %c4 = arith.constant 4 : index
    %c0_4 = arith.constant 0 : index
    %12 = vector.load %arg5[%c4, %c0_4] : memref<8x128xf32, #tpu.memory_space<vmem>>, vector<1x128xf32>
    %13 = vector.shape_cast %12 : vector<1x128xf32> to vector<1x128xf32>
    %14 = vector.broadcast %13 : vector<1x128xf32> to vector<16x128xf32>
    %c5 = arith.constant 5 : index
    %c0_5 = arith.constant 0 : index
    %15 = vector.load %arg5[%c5, %c0_5] : memref<8x128xf32, #tpu.memory_space<vmem>>, vector<1x128xf32>
    %16 = vector.shape_cast %15 : vector<1x128xf32> to vector<1x128xf32>
    %17 = vector.broadcast %16 : vector<1x128xf32> to vector<16x128xf32>
    %c6 = arith.constant 6 : index
    %c0_6 = arith.constant 0 : index
    %18 = vector.load %arg5[%c6, %c0_6] : memref<8x128xf32, #tpu.memory_space<vmem>>, vector<1x128xf32>
    %19 = vector.shape_cast %18 : vector<1x128xf32> to vector<1x128xf32>
    %20 = vector.broadcast %19 : vector<1x128xf32> to vector<16x128xf32>
    %c0_7 = arith.constant 0 : index
    %c0_8 = arith.constant 0 : index
    %21 = vector.load %arg6[%c0_7, %c0_8] : memref<16x2xf32, #tpu.memory_space<vmem>>, vector<16x1xf32>
    %22 = vector.shape_cast %21 : vector<16x1xf32> to vector<16x1xf32>
    %23 = vector.broadcast %22 : vector<16x1xf32> to vector<16x128xf32>
    %c0_9 = arith.constant 0 : index
    %c1_10 = arith.constant 1 : index
    %24 = vector.load %arg6[%c0_9, %c1_10] : memref<16x2xf32, #tpu.memory_space<vmem>>, vector<16x1xf32>
    %25 = vector.shape_cast %24 : vector<16x1xf32> to vector<16x1xf32>
    %26 = vector.broadcast %25 : vector<16x1xf32> to vector<16x128xf32>
    %c0_11 = arith.constant 0 : index
    %c0_12 = arith.constant 0 : index
    %27 = vector.load %arg7[%c0_11, %c0_12] : memref<4x24xf32, #tpu.memory_space<vmem>>, vector<1x24xf32>
    %c1_13 = arith.constant 1 : index
    %c0_14 = arith.constant 0 : index
    %28 = vector.load %arg7[%c1_13, %c0_14] : memref<4x24xf32, #tpu.memory_space<vmem>>, vector<1x24xf32>
    %c2_15 = arith.constant 2 : index
    %c0_16 = arith.constant 0 : index
    %29 = vector.load %arg7[%c2_15, %c0_16] : memref<4x24xf32, #tpu.memory_space<vmem>>, vector<1x24xf32>
    %c3_17 = arith.constant 3 : index
    %c0_18 = arith.constant 0 : index
    %30 = vector.load %arg7[%c3_17, %c0_18] : memref<4x24xf32, #tpu.memory_space<vmem>>, vector<1x4xf32>
    %c0_19 = arith.constant 0 : index
    %c0_20 = arith.constant 0 : index
    %31 = vector.load %arg3[%c0_19, %c0_20] : memref<128x320xf32, #tpu.memory_space<vmem>>, vector<128x128xf32>
    %c0_21 = arith.constant 0 : index
    %c128 = arith.constant 128 : index
    %32 = vector.load %arg3[%c0_21, %c128] : memref<128x320xf32, #tpu.memory_space<vmem>>, vector<128x192xf32>
    %33 = tpu.iota {dimensions = array<i32: 1>} : vector<16x128xi32>
    %c0_22 = arith.constant 0 : index
    %c0_23 = arith.constant 0 : index
    %34 = vector.load %arg1[%c0_22, %c0_23] : memref<16x8xf32, #tpu.memory_space<vmem>>, vector<16x8xf32>
    %c0_24 = arith.constant 0 : index
    %c0_25 = arith.constant 0 : index
    %35 = vector.load %arg0[%c0_24, %c0_25] : memref<8x128xf32, #tpu.memory_space<vmem>>, vector<8x128xf32>
    %cst = arith.constant dense<0.000000e+00> : vector<16x128xf32>
    %36 = tpu.matmul %34, %35, %cst {dimension_numbers = #tpu.dot_dimension_numbers<[1], [0], [0], [1], [0, 0, 1, 1], [], []>} : vector<16x8xf32>, vector<8x128xf32>, vector<16x128xf32> -> vector<16x128xf32>
    %37 = arith.addf %36, %23 : vector<16x128xf32>
    %cst_26 = arith.constant dense<0.000000e+00> : vector<16xf32>
    %38 = vector.multi_reduction <add>, %37, %cst_26 [1] : vector<16x128xf32> to vector<16xf32>
    %39 = vector.shape_cast %38 : vector<16xf32> to vector<16x1xf32>
    %cst_27 = arith.constant 1.280000e+02 : f32
    %40 = vector.broadcast %cst_27 : f32 to vector<16x1xf32>
    %41 = arith.divf %39, %40 : vector<16x1xf32>
    %42 = arith.mulf %37, %37 : vector<16x128xf32>
    %cst_28 = arith.constant dense<0.000000e+00> : vector<16xf32>
    %43 = vector.multi_reduction <add>, %42, %cst_28 [1] : vector<16x128xf32> to vector<16xf32>
    %44 = vector.shape_cast %43 : vector<16xf32> to vector<16x1xf32>
    %cst_29 = arith.constant 1.280000e+02 : f32
    %45 = vector.broadcast %cst_29 : f32 to vector<16x1xf32>
    %46 = arith.divf %44, %45 : vector<16x1xf32>
    %47 = arith.mulf %41, %41 : vector<16x1xf32>
    %48 = arith.subf %46, %47 : vector<16x1xf32>
    %cst_30 = arith.constant 0.000000e+00 : f32
    %49 = vector.broadcast %cst_30 : f32 to vector<16x1xf32>
    %50 = arith.maximumf %48, %49 : vector<16x1xf32>
    %51 = vector.broadcast %41 : vector<16x1xf32> to vector<16x128xf32>
    %52 = arith.subf %37, %51 : vector<16x128xf32>
    %cst_31 = arith.constant 9.99999974E-6 : f32
    %53 = vector.broadcast %cst_31 : f32 to vector<16x1xf32>
    %54 = arith.addf %50, %53 : vector<16x1xf32>
    %55 = math.rsqrt %54 : vector<16x1xf32>
    %56 = vector.broadcast %55 : vector<16x1xf32> to vector<16x128xf32>
    %57 = arith.mulf %52, %56 : vector<16x128xf32>
    %58 = arith.mulf %57, %2 : vector<16x128xf32>
    %59 = arith.addf %58, %5 : vector<16x128xf32>
    %60 = arith.mulf %59, %59 : vector<16x128xf32>
    %61 = arith.mulf %59, %60 : vector<16x128xf32>
    %cst_32 = arith.constant 4.471500e-02 : f32
    %62 = vector.broadcast %cst_32 : f32 to vector<16x128xf32>
    %63 = arith.mulf %62, %61 : vector<16x128xf32>
    %64 = arith.addf %59, %63 : vector<16x128xf32>
    %cst_33 = arith.constant 0.797884583 : f32
    %65 = vector.broadcast %cst_33 : f32 to vector<16x128xf32>
    %66 = arith.mulf %65, %64 : vector<16x128xf32>
    %67 = math.tanh %66 : vector<16x128xf32>
    %cst_34 = arith.constant 1.000000e+00 : f32
    %68 = vector.broadcast %cst_34 : f32 to vector<16x128xf32>
    %69 = arith.addf %68, %67 : vector<16x128xf32>
    %cst_35 = arith.constant 5.000000e-01 : f32
    %70 = vector.broadcast %cst_35 : f32 to vector<16x128xf32>
    %71 = arith.mulf %70, %69 : vector<16x128xf32>
    %72 = arith.mulf %59, %71 : vector<16x128xf32>
    %cst_36 = arith.constant dense<0.000000e+00> : vector<16xf32>
    %73 = vector.multi_reduction <add>, %72, %cst_36 [1] : vector<16x128xf32> to vector<16xf32>
    %74 = vector.shape_cast %73 : vector<16xf32> to vector<16x1xf32>
    %cst_37 = arith.constant 1.280000e+02 : f32
    %75 = vector.broadcast %cst_37 : f32 to vector<16x1xf32>
    %76 = arith.divf %74, %75 : vector<16x1xf32>
    %77 = arith.mulf %72, %72 : vector<16x128xf32>
    %cst_38 = arith.constant dense<0.000000e+00> : vector<16xf32>
    %78 = vector.multi_reduction <add>, %77, %cst_38 [1] : vector<16x128xf32> to vector<16xf32>
    %79 = vector.shape_cast %78 : vector<16xf32> to vector<16x1xf32>
    %cst_39 = arith.constant 1.280000e+02 : f32
    %80 = vector.broadcast %cst_39 : f32 to vector<16x1xf32>
    %81 = arith.divf %79, %80 : vector<16x1xf32>
    %82 = arith.mulf %76, %76 : vector<16x1xf32>
    %83 = arith.subf %81, %82 : vector<16x1xf32>
    %cst_40 = arith.constant 0.000000e+00 : f32
    %84 = vector.broadcast %cst_40 : f32 to vector<16x1xf32>
    %85 = arith.maximumf %83, %84 : vector<16x1xf32>
    %86 = vector.broadcast %76 : vector<16x1xf32> to vector<16x128xf32>
    %87 = arith.subf %72, %86 : vector<16x128xf32>
    %cst_41 = arith.constant 9.99999974E-6 : f32
    %88 = vector.broadcast %cst_41 : f32 to vector<16x1xf32>
    %89 = arith.addf %85, %88 : vector<16x1xf32>
    %90 = math.rsqrt %89 : vector<16x1xf32>
    %91 = vector.broadcast %90 : vector<16x1xf32> to vector<16x128xf32>
    %92 = arith.mulf %87, %91 : vector<16x128xf32>
    %93 = arith.mulf %92, %8 : vector<16x128xf32>
    %94 = arith.addf %93, %11 : vector<16x128xf32>
    %c15_i32 = arith.constant 15 : i32
    %95 = tpu.dynamic_rotate %94 by %c15_i32 dim 1 : vector<16x128xf32>, i32 -> vector<16x128xf32>
    %c15_i32_42 = arith.constant 15 : i32
    %96 = vector.broadcast %c15_i32_42 : i32 to vector<16x128xi32>
    %97 = arith.cmpi sge, %33, %96 : vector<16x128xi32>
    %cst_43 = arith.constant 0.000000e+00 : f32
    %98 = vector.broadcast %cst_43 : f32 to vector<16x128xf32>
    %99 = arith.select %97, %95, %98 : vector<16x128xi1>, vector<16x128xf32>
    %c14_i32 = arith.constant 14 : i32
    %100 = tpu.dynamic_rotate %94 by %c14_i32 dim 1 : vector<16x128xf32>, i32 -> vector<16x128xf32>
    %c14_i32_44 = arith.constant 14 : i32
    %101 = vector.broadcast %c14_i32_44 : i32 to vector<16x128xi32>
    %102 = arith.cmpi sge, %33, %101 : vector<16x128xi32>
    %cst_45 = arith.constant 0.000000e+00 : f32
    %103 = vector.broadcast %cst_45 : f32 to vector<16x128xf32>
    %104 = arith.select %102, %100, %103 : vector<16x128xi1>, vector<16x128xf32>
    %c13_i32 = arith.constant 13 : i32
    %105 = tpu.dynamic_rotate %94 by %c13_i32 dim 1 : vector<16x128xf32>, i32 -> vector<16x128xf32>
    %c13_i32_46 = arith.constant 13 : i32
    %106 = vector.broadcast %c13_i32_46 : i32 to vector<16x128xi32>
    %107 = arith.cmpi sge, %33, %106 : vector<16x128xi32>
    %cst_47 = arith.constant 0.000000e+00 : f32
    %108 = vector.broadcast %cst_47 : f32 to vector<16x128xf32>
    %109 = arith.select %107, %105, %108 : vector<16x128xi1>, vector<16x128xf32>
    %c12_i32 = arith.constant 12 : i32
    %110 = tpu.dynamic_rotate %94 by %c12_i32 dim 1 : vector<16x128xf32>, i32 -> vector<16x128xf32>
    %c12_i32_48 = arith.constant 12 : i32
    %111 = vector.broadcast %c12_i32_48 : i32 to vector<16x128xi32>
    %112 = arith.cmpi sge, %33, %111 : vector<16x128xi32>
    %cst_49 = arith.constant 0.000000e+00 : f32
    %113 = vector.broadcast %cst_49 : f32 to vector<16x128xf32>
    %114 = arith.select %112, %110, %113 : vector<16x128xi1>, vector<16x128xf32>
    %c11_i32 = arith.constant 11 : i32
    %115 = tpu.dynamic_rotate %94 by %c11_i32 dim 1 : vector<16x128xf32>, i32 -> vector<16x128xf32>
    %c11_i32_50 = arith.constant 11 : i32
    %116 = vector.broadcast %c11_i32_50 : i32 to vector<16x128xi32>
    %117 = arith.cmpi sge, %33, %116 : vector<16x128xi32>
    %cst_51 = arith.constant 0.000000e+00 : f32
    %118 = vector.broadcast %cst_51 : f32 to vector<16x128xf32>
    %119 = arith.select %117, %115, %118 : vector<16x128xi1>, vector<16x128xf32>
    %c10_i32 = arith.constant 10 : i32
    %120 = tpu.dynamic_rotate %94 by %c10_i32 dim 1 : vector<16x128xf32>, i32 -> vector<16x128xf32>
    %c10_i32_52 = arith.constant 10 : i32
    %121 = vector.broadcast %c10_i32_52 : i32 to vector<16x128xi32>
    %122 = arith.cmpi sge, %33, %121 : vector<16x128xi32>
    %cst_53 = arith.constant 0.000000e+00 : f32
    %123 = vector.broadcast %cst_53 : f32 to vector<16x128xf32>
    %124 = arith.select %122, %120, %123 : vector<16x128xi1>, vector<16x128xf32>
    %c9_i32 = arith.constant 9 : i32
    %125 = tpu.dynamic_rotate %94 by %c9_i32 dim 1 : vector<16x128xf32>, i32 -> vector<16x128xf32>
    %c9_i32_54 = arith.constant 9 : i32
    %126 = vector.broadcast %c9_i32_54 : i32 to vector<16x128xi32>
    %127 = arith.cmpi sge, %33, %126 : vector<16x128xi32>
    %cst_55 = arith.constant 0.000000e+00 : f32
    %128 = vector.broadcast %cst_55 : f32 to vector<16x128xf32>
    %129 = arith.select %127, %125, %128 : vector<16x128xi1>, vector<16x128xf32>
    %c8_i32 = arith.constant 8 : i32
    %130 = tpu.dynamic_rotate %94 by %c8_i32 dim 1 : vector<16x128xf32>, i32 -> vector<16x128xf32>
    %c8_i32_56 = arith.constant 8 : i32
    %131 = vector.broadcast %c8_i32_56 : i32 to vector<16x128xi32>
    %132 = arith.cmpi sge, %33, %131 : vector<16x128xi32>
    %cst_57 = arith.constant 0.000000e+00 : f32
    %133 = vector.broadcast %cst_57 : f32 to vector<16x128xf32>
    %134 = arith.select %132, %130, %133 : vector<16x128xi1>, vector<16x128xf32>
    %135 = tpu.concatenate %99, %104, %109, %114, %119, %124, %129, %134 in 0 : vector<16x128xf32>, vector<16x128xf32>, vector<16x128xf32>, vector<16x128xf32>, vector<16x128xf32>, vector<16x128xf32>, vector<16x128xf32>, vector<16x128xf32> -> vector<128x128xf32>
    %c0_58 = arith.constant 0 : index
    %c0_59 = arith.constant 0 : index
    %136 = vector.load %arg2[%c0_58, %c0_59] : memref<16x512xf32, #tpu.memory_space<vmem>>, vector<16x128xf32>
    %cst_60 = arith.constant dense<0.000000e+00> : vector<16x128xf32>
    %137 = tpu.matmul %136, %135, %cst_60 {dimension_numbers = #tpu.dot_dimension_numbers<[1], [0], [0], [1], [0, 0, 1, 1], [], []>} : vector<16x128xf32>, vector<128x128xf32>, vector<16x128xf32> -> vector<16x128xf32>
    %138 = arith.addf %26, %137 : vector<16x128xf32>
    %c7_i32 = arith.constant 7 : i32
    %139 = tpu.dynamic_rotate %94 by %c7_i32 dim 1 : vector<16x128xf32>, i32 -> vector<16x128xf32>
    %c7_i32_61 = arith.constant 7 : i32
    %140 = vector.broadcast %c7_i32_61 : i32 to vector<16x128xi32>
    %141 = arith.cmpi sge, %33, %140 : vector<16x128xi32>
    %cst_62 = arith.constant 0.000000e+00 : f32
    %142 = vector.broadcast %cst_62 : f32 to vector<16x128xf32>
    %143 = arith.select %141, %139, %142 : vector<16x128xi1>, vector<16x128xf32>
    %c6_i32 = arith.constant 6 : i32
    %144 = tpu.dynamic_rotate %94 by %c6_i32 dim 1 : vector<16x128xf32>, i32 -> vector<16x128xf32>
    %c6_i32_63 = arith.constant 6 : i32
    %145 = vector.broadcast %c6_i32_63 : i32 to vector<16x128xi32>
    %146 = arith.cmpi sge, %33, %145 : vector<16x128xi32>
    %cst_64 = arith.constant 0.000000e+00 : f32
    %147 = vector.broadcast %cst_64 : f32 to vector<16x128xf32>
    %148 = arith.select %146, %144, %147 : vector<16x128xi1>, vector<16x128xf32>
    %c5_i32 = arith.constant 5 : i32
    %149 = tpu.dynamic_rotate %94 by %c5_i32 dim 1 : vector<16x128xf32>, i32 -> vector<16x128xf32>
    %c5_i32_65 = arith.constant 5 : i32
    %150 = vector.broadcast %c5_i32_65 : i32 to vector<16x128xi32>
    %151 = arith.cmpi sge, %33, %150 : vector<16x128xi32>
    %cst_66 = arith.constant 0.000000e+00 : f32
    %152 = vector.broadcast %cst_66 : f32 to vector<16x128xf32>
    %153 = arith.select %151, %149, %152 : vector<16x128xi1>, vector<16x128xf32>
    %c4_i32 = arith.constant 4 : i32
    %154 = tpu.dynamic_rotate %94 by %c4_i32 dim 1 : vector<16x128xf32>, i32 -> vector<16x128xf32>
    %c4_i32_67 = arith.constant 4 : i32
    %155 = vector.broadcast %c4_i32_67 : i32 to vector<16x128xi32>
    %156 = arith.cmpi sge, %33, %155 : vector<16x128xi32>
    %cst_68 = arith.constant 0.000000e+00 : f32
    %157 = vector.broadcast %cst_68 : f32 to vector<16x128xf32>
    %158 = arith.select %156, %154, %157 : vector<16x128xi1>, vector<16x128xf32>
    %c3_i32 = arith.constant 3 : i32
    %159 = tpu.dynamic_rotate %94 by %c3_i32 dim 1 : vector<16x128xf32>, i32 -> vector<16x128xf32>
    %c3_i32_69 = arith.constant 3 : i32
    %160 = vector.broadcast %c3_i32_69 : i32 to vector<16x128xi32>
    %161 = arith.cmpi sge, %33, %160 : vector<16x128xi32>
    %cst_70 = arith.constant 0.000000e+00 : f32
    %162 = vector.broadcast %cst_70 : f32 to vector<16x128xf32>
    %163 = arith.select %161, %159, %162 : vector<16x128xi1>, vector<16x128xf32>
    %c2_i32 = arith.constant 2 : i32
    %164 = tpu.dynamic_rotate %94 by %c2_i32 dim 1 : vector<16x128xf32>, i32 -> vector<16x128xf32>
    %c2_i32_71 = arith.constant 2 : i32
    %165 = vector.broadcast %c2_i32_71 : i32 to vector<16x128xi32>
    %166 = arith.cmpi sge, %33, %165 : vector<16x128xi32>
    %cst_72 = arith.constant 0.000000e+00 : f32
    %167 = vector.broadcast %cst_72 : f32 to vector<16x128xf32>
    %168 = arith.select %166, %164, %167 : vector<16x128xi1>, vector<16x128xf32>
    %c1_i32 = arith.constant 1 : i32
    %169 = tpu.dynamic_rotate %94 by %c1_i32 dim 1 : vector<16x128xf32>, i32 -> vector<16x128xf32>
    %c1_i32_73 = arith.constant 1 : i32
    %170 = vector.broadcast %c1_i32_73 : i32 to vector<16x128xi32>
    %171 = arith.cmpi sge, %33, %170 : vector<16x128xi32>
    %cst_74 = arith.constant 0.000000e+00 : f32
    %172 = vector.broadcast %cst_74 : f32 to vector<16x128xf32>
    %173 = arith.select %171, %169, %172 : vector<16x128xi1>, vector<16x128xf32>
    %174 = tpu.concatenate %143, %148, %153, %158, %163, %168, %173, %94 in 0 : vector<16x128xf32>, vector<16x128xf32>, vector<16x128xf32>, vector<16x128xf32>, vector<16x128xf32>, vector<16x128xf32>, vector<16x128xf32>, vector<16x128xf32> -> vector<128x128xf32>
    %c0_75 = arith.constant 0 : index
    %c128_76 = arith.constant 128 : index
    %175 = vector.load %arg2[%c0_75, %c128_76] : memref<16x512xf32, #tpu.memory_space<vmem>>, vector<16x128xf32>
    %cst_77 = arith.constant dense<0.000000e+00> : vector<16x128xf32>
    %176 = tpu.matmul %175, %174, %cst_77 {dimension_numbers = #tpu.dot_dimension_numbers<[1], [0], [0], [1], [0, 0, 1, 1], [], []>} : vector<16x128xf32>, vector<128x128xf32>, vector<16x128xf32> -> vector<16x128xf32>
    %177 = arith.addf %138, %176 : vector<16x128xf32>
    %c127_i32 = arith.constant 127 : i32
    %178 = tpu.dynamic_rotate %94 by %c127_i32 dim 1 : vector<16x128xf32>, i32 -> vector<16x128xf32>
    %c127_i32_78 = arith.constant 127 : i32
    %179 = vector.broadcast %c127_i32_78 : i32 to vector<16x128xi32>
    %180 = arith.cmpi slt, %33, %179 : vector<16x128xi32>
    %cst_79 = arith.constant 0.000000e+00 : f32
    %181 = vector.broadcast %cst_79 : f32 to vector<16x128xf32>
    %182 = arith.select %180, %178, %181 : vector<16x128xi1>, vector<16x128xf32>
    %c126_i32 = arith.constant 126 : i32
    %183 = tpu.dynamic_rotate %94 by %c126_i32 dim 1 : vector<16x128xf32>, i32 -> vector<16x128xf32>
    %c126_i32_80 = arith.constant 126 : i32
    %184 = vector.broadcast %c126_i32_80 : i32 to vector<16x128xi32>
    %185 = arith.cmpi slt, %33, %184 : vector<16x128xi32>
    %cst_81 = arith.constant 0.000000e+00 : f32
    %186 = vector.broadcast %cst_81 : f32 to vector<16x128xf32>
    %187 = arith.select %185, %183, %186 : vector<16x128xi1>, vector<16x128xf32>
    %c125_i32 = arith.constant 125 : i32
    %188 = tpu.dynamic_rotate %94 by %c125_i32 dim 1 : vector<16x128xf32>, i32 -> vector<16x128xf32>
    %c125_i32_82 = arith.constant 125 : i32
    %189 = vector.broadcast %c125_i32_82 : i32 to vector<16x128xi32>
    %190 = arith.cmpi slt, %33, %189 : vector<16x128xi32>
    %cst_83 = arith.constant 0.000000e+00 : f32
    %191 = vector.broadcast %cst_83 : f32 to vector<16x128xf32>
    %192 = arith.select %190, %188, %191 : vector<16x128xi1>, vector<16x128xf32>
    %c124_i32 = arith.constant 124 : i32
    %193 = tpu.dynamic_rotate %94 by %c124_i32 dim 1 : vector<16x128xf32>, i32 -> vector<16x128xf32>
    %c124_i32_84 = arith.constant 124 : i32
    %194 = vector.broadcast %c124_i32_84 : i32 to vector<16x128xi32>
    %195 = arith.cmpi slt, %33, %194 : vector<16x128xi32>
    %cst_85 = arith.constant 0.000000e+00 : f32
    %196 = vector.broadcast %cst_85 : f32 to vector<16x128xf32>
    %197 = arith.select %195, %193, %196 : vector<16x128xi1>, vector<16x128xf32>
    %c123_i32 = arith.constant 123 : i32
    %198 = tpu.dynamic_rotate %94 by %c123_i32 dim 1 : vector<16x128xf32>, i32 -> vector<16x128xf32>
    %c123_i32_86 = arith.constant 123 : i32
    %199 = vector.broadcast %c123_i32_86 : i32 to vector<16x128xi32>
    %200 = arith.cmpi slt, %33, %199 : vector<16x128xi32>
    %cst_87 = arith.constant 0.000000e+00 : f32
    %201 = vector.broadcast %cst_87 : f32 to vector<16x128xf32>
    %202 = arith.select %200, %198, %201 : vector<16x128xi1>, vector<16x128xf32>
    %c122_i32 = arith.constant 122 : i32
    %203 = tpu.dynamic_rotate %94 by %c122_i32 dim 1 : vector<16x128xf32>, i32 -> vector<16x128xf32>
    %c122_i32_88 = arith.constant 122 : i32
    %204 = vector.broadcast %c122_i32_88 : i32 to vector<16x128xi32>
    %205 = arith.cmpi slt, %33, %204 : vector<16x128xi32>
    %cst_89 = arith.constant 0.000000e+00 : f32
    %206 = vector.broadcast %cst_89 : f32 to vector<16x128xf32>
    %207 = arith.select %205, %203, %206 : vector<16x128xi1>, vector<16x128xf32>
    %c121_i32 = arith.constant 121 : i32
    %208 = tpu.dynamic_rotate %94 by %c121_i32 dim 1 : vector<16x128xf32>, i32 -> vector<16x128xf32>
    %c121_i32_90 = arith.constant 121 : i32
    %209 = vector.broadcast %c121_i32_90 : i32 to vector<16x128xi32>
    %210 = arith.cmpi slt, %33, %209 : vector<16x128xi32>
    %cst_91 = arith.constant 0.000000e+00 : f32
    %211 = vector.broadcast %cst_91 : f32 to vector<16x128xf32>
    %212 = arith.select %210, %208, %211 : vector<16x128xi1>, vector<16x128xf32>
    %c120_i32 = arith.constant 120 : i32
    %213 = tpu.dynamic_rotate %94 by %c120_i32 dim 1 : vector<16x128xf32>, i32 -> vector<16x128xf32>
    %c120_i32_92 = arith.constant 120 : i32
    %214 = vector.broadcast %c120_i32_92 : i32 to vector<16x128xi32>
    %215 = arith.cmpi slt, %33, %214 : vector<16x128xi32>
    %cst_93 = arith.constant 0.000000e+00 : f32
    %216 = vector.broadcast %cst_93 : f32 to vector<16x128xf32>
    %217 = arith.select %215, %213, %216 : vector<16x128xi1>, vector<16x128xf32>
    %218 = tpu.concatenate %182, %187, %192, %197, %202, %207, %212, %217 in 0 : vector<16x128xf32>, vector<16x128xf32>, vector<16x128xf32>, vector<16x128xf32>, vector<16x128xf32>, vector<16x128xf32>, vector<16x128xf32>, vector<16x128xf32> -> vector<128x128xf32>
    %c0_94 = arith.constant 0 : index
    %c256 = arith.constant 256 : index
    %219 = vector.load %arg2[%c0_94, %c256] : memref<16x512xf32, #tpu.memory_space<vmem>>, vector<16x128xf32>
    %cst_95 = arith.constant dense<0.000000e+00> : vector<16x128xf32>
    %220 = tpu.matmul %219, %218, %cst_95 {dimension_numbers = #tpu.dot_dimension_numbers<[1], [0], [0], [1], [0, 0, 1, 1], [], []>} : vector<16x128xf32>, vector<128x128xf32>, vector<16x128xf32> -> vector<16x128xf32>
    %221 = arith.addf %177, %220 : vector<16x128xf32>
    %c119_i32 = arith.constant 119 : i32
    %222 = tpu.dynamic_rotate %94 by %c119_i32 dim 1 : vector<16x128xf32>, i32 -> vector<16x128xf32>
    %c119_i32_96 = arith.constant 119 : i32
    %223 = vector.broadcast %c119_i32_96 : i32 to vector<16x128xi32>
    %224 = arith.cmpi slt, %33, %223 : vector<16x128xi32>
    %cst_97 = arith.constant 0.000000e+00 : f32
    %225 = vector.broadcast %cst_97 : f32 to vector<16x128xf32>
    %226 = arith.select %224, %222, %225 : vector<16x128xi1>, vector<16x128xf32>
    %c118_i32 = arith.constant 118 : i32
    %227 = tpu.dynamic_rotate %94 by %c118_i32 dim 1 : vector<16x128xf32>, i32 -> vector<16x128xf32>
    %c118_i32_98 = arith.constant 118 : i32
    %228 = vector.broadcast %c118_i32_98 : i32 to vector<16x128xi32>
    %229 = arith.cmpi slt, %33, %228 : vector<16x128xi32>
    %cst_99 = arith.constant 0.000000e+00 : f32
    %230 = vector.broadcast %cst_99 : f32 to vector<16x128xf32>
    %231 = arith.select %229, %227, %230 : vector<16x128xi1>, vector<16x128xf32>
    %c117_i32 = arith.constant 117 : i32
    %232 = tpu.dynamic_rotate %94 by %c117_i32 dim 1 : vector<16x128xf32>, i32 -> vector<16x128xf32>
    %c117_i32_100 = arith.constant 117 : i32
    %233 = vector.broadcast %c117_i32_100 : i32 to vector<16x128xi32>
    %234 = arith.cmpi slt, %33, %233 : vector<16x128xi32>
    %cst_101 = arith.constant 0.000000e+00 : f32
    %235 = vector.broadcast %cst_101 : f32 to vector<16x128xf32>
    %236 = arith.select %234, %232, %235 : vector<16x128xi1>, vector<16x128xf32>
    %c116_i32 = arith.constant 116 : i32
    %237 = tpu.dynamic_rotate %94 by %c116_i32 dim 1 : vector<16x128xf32>, i32 -> vector<16x128xf32>
    %c116_i32_102 = arith.constant 116 : i32
    %238 = vector.broadcast %c116_i32_102 : i32 to vector<16x128xi32>
    %239 = arith.cmpi slt, %33, %238 : vector<16x128xi32>
    %cst_103 = arith.constant 0.000000e+00 : f32
    %240 = vector.broadcast %cst_103 : f32 to vector<16x128xf32>
    %241 = arith.select %239, %237, %240 : vector<16x128xi1>, vector<16x128xf32>
    %c115_i32 = arith.constant 115 : i32
    %242 = tpu.dynamic_rotate %94 by %c115_i32 dim 1 : vector<16x128xf32>, i32 -> vector<16x128xf32>
    %c115_i32_104 = arith.constant 115 : i32
    %243 = vector.broadcast %c115_i32_104 : i32 to vector<16x128xi32>
    %244 = arith.cmpi slt, %33, %243 : vector<16x128xi32>
    %cst_105 = arith.constant 0.000000e+00 : f32
    %245 = vector.broadcast %cst_105 : f32 to vector<16x128xf32>
    %246 = arith.select %244, %242, %245 : vector<16x128xi1>, vector<16x128xf32>
    %c114_i32 = arith.constant 114 : i32
    %247 = tpu.dynamic_rotate %94 by %c114_i32 dim 1 : vector<16x128xf32>, i32 -> vector<16x128xf32>
    %c114_i32_106 = arith.constant 114 : i32
    %248 = vector.broadcast %c114_i32_106 : i32 to vector<16x128xi32>
    %249 = arith.cmpi slt, %33, %248 : vector<16x128xi32>
    %cst_107 = arith.constant 0.000000e+00 : f32
    %250 = vector.broadcast %cst_107 : f32 to vector<16x128xf32>
    %251 = arith.select %249, %247, %250 : vector<16x128xi1>, vector<16x128xf32>
    %c113_i32 = arith.constant 113 : i32
    %252 = tpu.dynamic_rotate %94 by %c113_i32 dim 1 : vector<16x128xf32>, i32 -> vector<16x128xf32>
    %c113_i32_108 = arith.constant 113 : i32
    %253 = vector.broadcast %c113_i32_108 : i32 to vector<16x128xi32>
    %254 = arith.cmpi slt, %33, %253 : vector<16x128xi32>
    %cst_109 = arith.constant 0.000000e+00 : f32
    %255 = vector.broadcast %cst_109 : f32 to vector<16x128xf32>
    %256 = arith.select %254, %252, %255 : vector<16x128xi1>, vector<16x128xf32>
    %257 = tpu.concatenate %226, %231, %236, %241, %246, %251, %256, %94 in 0 : vector<16x128xf32>, vector<16x128xf32>, vector<16x128xf32>, vector<16x128xf32>, vector<16x128xf32>, vector<16x128xf32>, vector<16x128xf32>, vector<16x128xf32> -> vector<128x128xf32>
    %c0_110 = arith.constant 0 : index
    %c384 = arith.constant 384 : index
    %258 = vector.load %arg2[%c0_110, %c384] : memref<16x512xf32, #tpu.memory_space<vmem>>, vector<16x128xf32>
    %cst_111 = arith.constant dense<0.000000e+00> : vector<16x128xf32>
    %259 = tpu.matmul %258, %257, %cst_111 {dimension_numbers = #tpu.dot_dimension_numbers<[1], [0], [0], [1], [0, 0, 1, 1], [], []>} : vector<16x128xf32>, vector<128x128xf32>, vector<16x128xf32> -> vector<16x128xf32>
    %260 = arith.addf %221, %259 : vector<16x128xf32>
    %cst_112 = arith.constant dense<0.000000e+00> : vector<16xf32>
    %261 = vector.multi_reduction <add>, %260, %cst_112 [1] : vector<16x128xf32> to vector<16xf32>
    %262 = vector.shape_cast %261 : vector<16xf32> to vector<16x1xf32>
    %cst_113 = arith.constant 1.280000e+02 : f32
    %263 = vector.broadcast %cst_113 : f32 to vector<16x1xf32>
    %264 = arith.divf %262, %263 : vector<16x1xf32>
    %265 = arith.mulf %260, %260 : vector<16x128xf32>
    %cst_114 = arith.constant dense<0.000000e+00> : vector<16xf32>
    %266 = vector.multi_reduction <add>, %265, %cst_114 [1] : vector<16x128xf32> to vector<16xf32>
    %267 = vector.shape_cast %266 : vector<16xf32> to vector<16x1xf32>
    %cst_115 = arith.constant 1.280000e+02 : f32
    %268 = vector.broadcast %cst_115 : f32 to vector<16x1xf32>
    %269 = arith.divf %267, %268 : vector<16x1xf32>
    %270 = arith.mulf %264, %264 : vector<16x1xf32>
    %271 = arith.subf %269, %270 : vector<16x1xf32>
    %cst_116 = arith.constant 0.000000e+00 : f32
    %272 = vector.broadcast %cst_116 : f32 to vector<16x1xf32>
    %273 = arith.maximumf %271, %272 : vector<16x1xf32>
    %274 = vector.broadcast %264 : vector<16x1xf32> to vector<16x128xf32>
    %275 = arith.subf %260, %274 : vector<16x128xf32>
    %cst_117 = arith.constant 9.99999974E-6 : f32
    %276 = vector.broadcast %cst_117 : f32 to vector<16x1xf32>
    %277 = arith.addf %273, %276 : vector<16x1xf32>
    %278 = math.rsqrt %277 : vector<16x1xf32>
    %279 = vector.broadcast %278 : vector<16x1xf32> to vector<16x128xf32>
    %280 = arith.mulf %275, %279 : vector<16x128xf32>
    %281 = arith.mulf %280, %8 : vector<16x128xf32>
    %282 = arith.addf %281, %11 : vector<16x128xf32>
    %283 = arith.mulf %282, %282 : vector<16x128xf32>
    %284 = arith.mulf %282, %283 : vector<16x128xf32>
    %cst_118 = arith.constant 4.471500e-02 : f32
    %285 = vector.broadcast %cst_118 : f32 to vector<16x128xf32>
    %286 = arith.mulf %285, %284 : vector<16x128xf32>
    %287 = arith.addf %282, %286 : vector<16x128xf32>
    %cst_119 = arith.constant 0.797884583 : f32
    %288 = vector.broadcast %cst_119 : f32 to vector<16x128xf32>
    %289 = arith.mulf %288, %287 : vector<16x128xf32>
    %290 = math.tanh %289 : vector<16x128xf32>
    %cst_120 = arith.constant 1.000000e+00 : f32
    %291 = vector.broadcast %cst_120 : f32 to vector<16x128xf32>
    %292 = arith.addf %291, %290 : vector<16x128xf32>
    %cst_121 = arith.constant 5.000000e-01 : f32
    %293 = vector.broadcast %cst_121 : f32 to vector<16x128xf32>
    %294 = arith.mulf %293, %292 : vector<16x128xf32>
    %295 = arith.mulf %282, %294 : vector<16x128xf32>
    %296 = arith.addf %295, %94 : vector<16x128xf32>
    %cst_122 = arith.constant dense<0.000000e+00> : vector<16xf32>
    %297 = vector.multi_reduction <add>, %296, %cst_122 [1] : vector<16x128xf32> to vector<16xf32>
    %298 = vector.shape_cast %297 : vector<16xf32> to vector<16x1xf32>
    %cst_123 = arith.constant 1.280000e+02 : f32
    %299 = vector.broadcast %cst_123 : f32 to vector<16x1xf32>
    %300 = arith.divf %298, %299 : vector<16x1xf32>
    %301 = arith.mulf %296, %296 : vector<16x128xf32>
    %cst_124 = arith.constant dense<0.000000e+00> : vector<16xf32>
    %302 = vector.multi_reduction <add>, %301, %cst_124 [1] : vector<16x128xf32> to vector<16xf32>
    %303 = vector.shape_cast %302 : vector<16xf32> to vector<16x1xf32>
    %cst_125 = arith.constant 1.280000e+02 : f32
    %304 = vector.broadcast %cst_125 : f32 to vector<16x1xf32>
    %305 = arith.divf %303, %304 : vector<16x1xf32>
    %306 = arith.mulf %300, %300 : vector<16x1xf32>
    %307 = arith.subf %305, %306 : vector<16x1xf32>
    %cst_126 = arith.constant 0.000000e+00 : f32
    %308 = vector.broadcast %cst_126 : f32 to vector<16x1xf32>
    %309 = arith.maximumf %307, %308 : vector<16x1xf32>
    %310 = vector.broadcast %300 : vector<16x1xf32> to vector<16x128xf32>
    %311 = arith.subf %296, %310 : vector<16x128xf32>
    %cst_127 = arith.constant 9.99999974E-6 : f32
    %312 = vector.broadcast %cst_127 : f32 to vector<16x1xf32>
    %313 = arith.addf %309, %312 : vector<16x1xf32>
    %314 = math.rsqrt %313 : vector<16x1xf32>
    %315 = vector.broadcast %314 : vector<16x1xf32> to vector<16x128xf32>
    %316 = arith.mulf %311, %315 : vector<16x128xf32>
    %317 = arith.mulf %316, %14 : vector<16x128xf32>
    %318 = arith.addf %317, %17 : vector<16x128xf32>
    %cst_128 = arith.constant dense<0.000000e+00> : vector<16x128xf32>
    %319 = tpu.matmul %318, %31, %cst_128 {dimension_numbers = #tpu.dot_dimension_numbers<[1], [0], [0], [1], [0, 0, 1, 1], [], []>} : vector<16x128xf32>, vector<128x128xf32>, vector<16x128xf32> -> vector<16x128xf32>
    %320 = arith.addf %319, %20 : vector<16x128xf32>
    %321 = arith.mulf %320, %320 : vector<16x128xf32>
    %322 = arith.mulf %320, %321 : vector<16x128xf32>
    %cst_129 = arith.constant 4.471500e-02 : f32
    %323 = vector.broadcast %cst_129 : f32 to vector<16x128xf32>
    %324 = arith.mulf %323, %322 : vector<16x128xf32>
    %325 = arith.addf %320, %324 : vector<16x128xf32>
    %cst_130 = arith.constant 0.797884583 : f32
    %326 = vector.broadcast %cst_130 : f32 to vector<16x128xf32>
    %327 = arith.mulf %326, %325 : vector<16x128xf32>
    %328 = math.tanh %327 : vector<16x128xf32>
    %cst_131 = arith.constant 1.000000e+00 : f32
    %329 = vector.broadcast %cst_131 : f32 to vector<16x128xf32>
    %330 = arith.addf %329, %328 : vector<16x128xf32>
    %cst_132 = arith.constant 5.000000e-01 : f32
    %331 = vector.broadcast %cst_132 : f32 to vector<16x128xf32>
    %332 = arith.mulf %331, %330 : vector<16x128xf32>
    %333 = arith.mulf %320, %332 : vector<16x128xf32>
    %334 = arith.addf %333, %318 : vector<16x128xf32>
    %cst_133 = arith.constant dense<0.000000e+00> : vector<16xf32>
    %335 = vector.multi_reduction <add>, %334, %cst_133 [1] : vector<16x128xf32> to vector<16xf32>
    %336 = vector.shape_cast %335 : vector<16xf32> to vector<16x1xf32>
    %cst_134 = arith.constant 1.280000e+02 : f32
    %337 = vector.broadcast %cst_134 : f32 to vector<16x1xf32>
    %338 = arith.divf %336, %337 : vector<16x1xf32>
    %339 = arith.mulf %334, %334 : vector<16x128xf32>
    %cst_135 = arith.constant dense<0.000000e+00> : vector<16xf32>
    %340 = vector.multi_reduction <add>, %339, %cst_135 [1] : vector<16x128xf32> to vector<16xf32>
    %341 = vector.shape_cast %340 : vector<16xf32> to vector<16x1xf32>
    %cst_136 = arith.constant 1.280000e+02 : f32
    %342 = vector.broadcast %cst_136 : f32 to vector<16x1xf32>
    %343 = arith.divf %341, %342 : vector<16x1xf32>
    %344 = arith.mulf %338, %338 : vector<16x1xf32>
    %345 = arith.subf %343, %344 : vector<16x1xf32>
    %cst_137 = arith.constant 0.000000e+00 : f32
    %346 = vector.broadcast %cst_137 : f32 to vector<16x1xf32>
    %347 = arith.maximumf %345, %346 : vector<16x1xf32>
    %348 = vector.broadcast %338 : vector<16x1xf32> to vector<16x128xf32>
    %349 = arith.subf %334, %348 : vector<16x128xf32>
    %cst_138 = arith.constant 9.99999974E-6 : f32
    %350 = vector.broadcast %cst_138 : f32 to vector<16x1xf32>
    %351 = arith.addf %347, %350 : vector<16x1xf32>
    %352 = math.rsqrt %351 : vector<16x1xf32>
    %353 = vector.broadcast %352 : vector<16x1xf32> to vector<16x128xf32>
    %354 = arith.mulf %349, %353 : vector<16x128xf32>
    %355 = arith.mulf %354, %8 : vector<16x128xf32>
    %356 = arith.addf %355, %11 : vector<16x128xf32>
    %c15_i32_139 = arith.constant 15 : i32
    %357 = tpu.dynamic_rotate %356 by %c15_i32_139 dim 1 : vector<16x128xf32>, i32 -> vector<16x128xf32>
    %c15_i32_140 = arith.constant 15 : i32
    %358 = vector.broadcast %c15_i32_140 : i32 to vector<16x128xi32>
    %359 = arith.cmpi sge, %33, %358 : vector<16x128xi32>
    %cst_141 = arith.constant 0.000000e+00 : f32
    %360 = vector.broadcast %cst_141 : f32 to vector<16x128xf32>
    %361 = arith.select %359, %357, %360 : vector<16x128xi1>, vector<16x128xf32>
    %c14_i32_142 = arith.constant 14 : i32
    %362 = tpu.dynamic_rotate %356 by %c14_i32_142 dim 1 : vector<16x128xf32>, i32 -> vector<16x128xf32>
    %c14_i32_143 = arith.constant 14 : i32
    %363 = vector.broadcast %c14_i32_143 : i32 to vector<16x128xi32>
    %364 = arith.cmpi sge, %33, %363 : vector<16x128xi32>
    %cst_144 = arith.constant 0.000000e+00 : f32
    %365 = vector.broadcast %cst_144 : f32 to vector<16x128xf32>
    %366 = arith.select %364, %362, %365 : vector<16x128xi1>, vector<16x128xf32>
    %c13_i32_145 = arith.constant 13 : i32
    %367 = tpu.dynamic_rotate %356 by %c13_i32_145 dim 1 : vector<16x128xf32>, i32 -> vector<16x128xf32>
    %c13_i32_146 = arith.constant 13 : i32
    %368 = vector.broadcast %c13_i32_146 : i32 to vector<16x128xi32>
    %369 = arith.cmpi sge, %33, %368 : vector<16x128xi32>
    %cst_147 = arith.constant 0.000000e+00 : f32
    %370 = vector.broadcast %cst_147 : f32 to vector<16x128xf32>
    %371 = arith.select %369, %367, %370 : vector<16x128xi1>, vector<16x128xf32>
    %c12_i32_148 = arith.constant 12 : i32
    %372 = tpu.dynamic_rotate %356 by %c12_i32_148 dim 1 : vector<16x128xf32>, i32 -> vector<16x128xf32>
    %c12_i32_149 = arith.constant 12 : i32
    %373 = vector.broadcast %c12_i32_149 : i32 to vector<16x128xi32>
    %374 = arith.cmpi sge, %33, %373 : vector<16x128xi32>
    %cst_150 = arith.constant 0.000000e+00 : f32
    %375 = vector.broadcast %cst_150 : f32 to vector<16x128xf32>
    %376 = arith.select %374, %372, %375 : vector<16x128xi1>, vector<16x128xf32>
    %c11_i32_151 = arith.constant 11 : i32
    %377 = tpu.dynamic_rotate %356 by %c11_i32_151 dim 1 : vector<16x128xf32>, i32 -> vector<16x128xf32>
    %c11_i32_152 = arith.constant 11 : i32
    %378 = vector.broadcast %c11_i32_152 : i32 to vector<16x128xi32>
    %379 = arith.cmpi sge, %33, %378 : vector<16x128xi32>
    %cst_153 = arith.constant 0.000000e+00 : f32
    %380 = vector.broadcast %cst_153 : f32 to vector<16x128xf32>
    %381 = arith.select %379, %377, %380 : vector<16x128xi1>, vector<16x128xf32>
    %c10_i32_154 = arith.constant 10 : i32
    %382 = tpu.dynamic_rotate %356 by %c10_i32_154 dim 1 : vector<16x128xf32>, i32 -> vector<16x128xf32>
    %c10_i32_155 = arith.constant 10 : i32
    %383 = vector.broadcast %c10_i32_155 : i32 to vector<16x128xi32>
    %384 = arith.cmpi sge, %33, %383 : vector<16x128xi32>
    %cst_156 = arith.constant 0.000000e+00 : f32
    %385 = vector.broadcast %cst_156 : f32 to vector<16x128xf32>
    %386 = arith.select %384, %382, %385 : vector<16x128xi1>, vector<16x128xf32>
    %c9_i32_157 = arith.constant 9 : i32
    %387 = tpu.dynamic_rotate %356 by %c9_i32_157 dim 1 : vector<16x128xf32>, i32 -> vector<16x128xf32>
    %c9_i32_158 = arith.constant 9 : i32
    %388 = vector.broadcast %c9_i32_158 : i32 to vector<16x128xi32>
    %389 = arith.cmpi sge, %33, %388 : vector<16x128xi32>
    %cst_159 = arith.constant 0.000000e+00 : f32
    %390 = vector.broadcast %cst_159 : f32 to vector<16x128xf32>
    %391 = arith.select %389, %387, %390 : vector<16x128xi1>, vector<16x128xf32>
    %c8_i32_160 = arith.constant 8 : i32
    %392 = tpu.dynamic_rotate %356 by %c8_i32_160 dim 1 : vector<16x128xf32>, i32 -> vector<16x128xf32>
    %c8_i32_161 = arith.constant 8 : i32
    %393 = vector.broadcast %c8_i32_161 : i32 to vector<16x128xi32>
    %394 = arith.cmpi sge, %33, %393 : vector<16x128xi32>
    %cst_162 = arith.constant 0.000000e+00 : f32
    %395 = vector.broadcast %cst_162 : f32 to vector<16x128xf32>
    %396 = arith.select %394, %392, %395 : vector<16x128xi1>, vector<16x128xf32>
    %397 = tpu.concatenate %361, %366, %371, %376, %381, %386, %391, %396 in 0 : vector<16x128xf32>, vector<16x128xf32>, vector<16x128xf32>, vector<16x128xf32>, vector<16x128xf32>, vector<16x128xf32>, vector<16x128xf32>, vector<16x128xf32> -> vector<128x128xf32>
    %c0_163 = arith.constant 0 : index
    %c0_164 = arith.constant 0 : index
    %398 = vector.load %arg2[%c0_163, %c0_164] : memref<16x512xf32, #tpu.memory_space<vmem>>, vector<16x128xf32>
    %cst_165 = arith.constant dense<0.000000e+00> : vector<16x128xf32>
    %399 = tpu.matmul %398, %397, %cst_165 {dimension_numbers = #tpu.dot_dimension_numbers<[1], [0], [0], [1], [0, 0, 1, 1], [], []>} : vector<16x128xf32>, vector<128x128xf32>, vector<16x128xf32> -> vector<16x128xf32>
    %400 = arith.addf %26, %399 : vector<16x128xf32>
    %c7_i32_166 = arith.constant 7 : i32
    %401 = tpu.dynamic_rotate %356 by %c7_i32_166 dim 1 : vector<16x128xf32>, i32 -> vector<16x128xf32>
    %c7_i32_167 = arith.constant 7 : i32
    %402 = vector.broadcast %c7_i32_167 : i32 to vector<16x128xi32>
    %403 = arith.cmpi sge, %33, %402 : vector<16x128xi32>
    %cst_168 = arith.constant 0.000000e+00 : f32
    %404 = vector.broadcast %cst_168 : f32 to vector<16x128xf32>
    %405 = arith.select %403, %401, %404 : vector<16x128xi1>, vector<16x128xf32>
    %c6_i32_169 = arith.constant 6 : i32
    %406 = tpu.dynamic_rotate %356 by %c6_i32_169 dim 1 : vector<16x128xf32>, i32 -> vector<16x128xf32>
    %c6_i32_170 = arith.constant 6 : i32
    %407 = vector.broadcast %c6_i32_170 : i32 to vector<16x128xi32>
    %408 = arith.cmpi sge, %33, %407 : vector<16x128xi32>
    %cst_171 = arith.constant 0.000000e+00 : f32
    %409 = vector.broadcast %cst_171 : f32 to vector<16x128xf32>
    %410 = arith.select %408, %406, %409 : vector<16x128xi1>, vector<16x128xf32>
    %c5_i32_172 = arith.constant 5 : i32
    %411 = tpu.dynamic_rotate %356 by %c5_i32_172 dim 1 : vector<16x128xf32>, i32 -> vector<16x128xf32>
    %c5_i32_173 = arith.constant 5 : i32
    %412 = vector.broadcast %c5_i32_173 : i32 to vector<16x128xi32>
    %413 = arith.cmpi sge, %33, %412 : vector<16x128xi32>
    %cst_174 = arith.constant 0.000000e+00 : f32
    %414 = vector.broadcast %cst_174 : f32 to vector<16x128xf32>
    %415 = arith.select %413, %411, %414 : vector<16x128xi1>, vector<16x128xf32>
    %c4_i32_175 = arith.constant 4 : i32
    %416 = tpu.dynamic_rotate %356 by %c4_i32_175 dim 1 : vector<16x128xf32>, i32 -> vector<16x128xf32>
    %c4_i32_176 = arith.constant 4 : i32
    %417 = vector.broadcast %c4_i32_176 : i32 to vector<16x128xi32>
    %418 = arith.cmpi sge, %33, %417 : vector<16x128xi32>
    %cst_177 = arith.constant 0.000000e+00 : f32
    %419 = vector.broadcast %cst_177 : f32 to vector<16x128xf32>
    %420 = arith.select %418, %416, %419 : vector<16x128xi1>, vector<16x128xf32>
    %c3_i32_178 = arith.constant 3 : i32
    %421 = tpu.dynamic_rotate %356 by %c3_i32_178 dim 1 : vector<16x128xf32>, i32 -> vector<16x128xf32>
    %c3_i32_179 = arith.constant 3 : i32
    %422 = vector.broadcast %c3_i32_179 : i32 to vector<16x128xi32>
    %423 = arith.cmpi sge, %33, %422 : vector<16x128xi32>
    %cst_180 = arith.constant 0.000000e+00 : f32
    %424 = vector.broadcast %cst_180 : f32 to vector<16x128xf32>
    %425 = arith.select %423, %421, %424 : vector<16x128xi1>, vector<16x128xf32>
    %c2_i32_181 = arith.constant 2 : i32
    %426 = tpu.dynamic_rotate %356 by %c2_i32_181 dim 1 : vector<16x128xf32>, i32 -> vector<16x128xf32>
    %c2_i32_182 = arith.constant 2 : i32
    %427 = vector.broadcast %c2_i32_182 : i32 to vector<16x128xi32>
    %428 = arith.cmpi sge, %33, %427 : vector<16x128xi32>
    %cst_183 = arith.constant 0.000000e+00 : f32
    %429 = vector.broadcast %cst_183 : f32 to vector<16x128xf32>
    %430 = arith.select %428, %426, %429 : vector<16x128xi1>, vector<16x128xf32>
    %c1_i32_184 = arith.constant 1 : i32
    %431 = tpu.dynamic_rotate %356 by %c1_i32_184 dim 1 : vector<16x128xf32>, i32 -> vector<16x128xf32>
    %c1_i32_185 = arith.constant 1 : i32
    %432 = vector.broadcast %c1_i32_185 : i32 to vector<16x128xi32>
    %433 = arith.cmpi sge, %33, %432 : vector<16x128xi32>
    %cst_186 = arith.constant 0.000000e+00 : f32
    %434 = vector.broadcast %cst_186 : f32 to vector<16x128xf32>
    %435 = arith.select %433, %431, %434 : vector<16x128xi1>, vector<16x128xf32>
    %436 = tpu.concatenate %405, %410, %415, %420, %425, %430, %435, %356 in 0 : vector<16x128xf32>, vector<16x128xf32>, vector<16x128xf32>, vector<16x128xf32>, vector<16x128xf32>, vector<16x128xf32>, vector<16x128xf32>, vector<16x128xf32> -> vector<128x128xf32>
    %c0_187 = arith.constant 0 : index
    %c128_188 = arith.constant 128 : index
    %437 = vector.load %arg2[%c0_187, %c128_188] : memref<16x512xf32, #tpu.memory_space<vmem>>, vector<16x128xf32>
    %cst_189 = arith.constant dense<0.000000e+00> : vector<16x128xf32>
    %438 = tpu.matmul %437, %436, %cst_189 {dimension_numbers = #tpu.dot_dimension_numbers<[1], [0], [0], [1], [0, 0, 1, 1], [], []>} : vector<16x128xf32>, vector<128x128xf32>, vector<16x128xf32> -> vector<16x128xf32>
    %439 = arith.addf %400, %438 : vector<16x128xf32>
    %c127_i32_190 = arith.constant 127 : i32
    %440 = tpu.dynamic_rotate %356 by %c127_i32_190 dim 1 : vector<16x128xf32>, i32 -> vector<16x128xf32>
    %c127_i32_191 = arith.constant 127 : i32
    %441 = vector.broadcast %c127_i32_191 : i32 to vector<16x128xi32>
    %442 = arith.cmpi slt, %33, %441 : vector<16x128xi32>
    %cst_192 = arith.constant 0.000000e+00 : f32
    %443 = vector.broadcast %cst_192 : f32 to vector<16x128xf32>
    %444 = arith.select %442, %440, %443 : vector<16x128xi1>, vector<16x128xf32>
    %c126_i32_193 = arith.constant 126 : i32
    %445 = tpu.dynamic_rotate %356 by %c126_i32_193 dim 1 : vector<16x128xf32>, i32 -> vector<16x128xf32>
    %c126_i32_194 = arith.constant 126 : i32
    %446 = vector.broadcast %c126_i32_194 : i32 to vector<16x128xi32>
    %447 = arith.cmpi slt, %33, %446 : vector<16x128xi32>
    %cst_195 = arith.constant 0.000000e+00 : f32
    %448 = vector.broadcast %cst_195 : f32 to vector<16x128xf32>
    %449 = arith.select %447, %445, %448 : vector<16x128xi1>, vector<16x128xf32>
    %c125_i32_196 = arith.constant 125 : i32
    %450 = tpu.dynamic_rotate %356 by %c125_i32_196 dim 1 : vector<16x128xf32>, i32 -> vector<16x128xf32>
    %c125_i32_197 = arith.constant 125 : i32
    %451 = vector.broadcast %c125_i32_197 : i32 to vector<16x128xi32>
    %452 = arith.cmpi slt, %33, %451 : vector<16x128xi32>
    %cst_198 = arith.constant 0.000000e+00 : f32
    %453 = vector.broadcast %cst_198 : f32 to vector<16x128xf32>
    %454 = arith.select %452, %450, %453 : vector<16x128xi1>, vector<16x128xf32>
    %c124_i32_199 = arith.constant 124 : i32
    %455 = tpu.dynamic_rotate %356 by %c124_i32_199 dim 1 : vector<16x128xf32>, i32 -> vector<16x128xf32>
    %c124_i32_200 = arith.constant 124 : i32
    %456 = vector.broadcast %c124_i32_200 : i32 to vector<16x128xi32>
    %457 = arith.cmpi slt, %33, %456 : vector<16x128xi32>
    %cst_201 = arith.constant 0.000000e+00 : f32
    %458 = vector.broadcast %cst_201 : f32 to vector<16x128xf32>
    %459 = arith.select %457, %455, %458 : vector<16x128xi1>, vector<16x128xf32>
    %c123_i32_202 = arith.constant 123 : i32
    %460 = tpu.dynamic_rotate %356 by %c123_i32_202 dim 1 : vector<16x128xf32>, i32 -> vector<16x128xf32>
    %c123_i32_203 = arith.constant 123 : i32
    %461 = vector.broadcast %c123_i32_203 : i32 to vector<16x128xi32>
    %462 = arith.cmpi slt, %33, %461 : vector<16x128xi32>
    %cst_204 = arith.constant 0.000000e+00 : f32
    %463 = vector.broadcast %cst_204 : f32 to vector<16x128xf32>
    %464 = arith.select %462, %460, %463 : vector<16x128xi1>, vector<16x128xf32>
    %c122_i32_205 = arith.constant 122 : i32
    %465 = tpu.dynamic_rotate %356 by %c122_i32_205 dim 1 : vector<16x128xf32>, i32 -> vector<16x128xf32>
    %c122_i32_206 = arith.constant 122 : i32
    %466 = vector.broadcast %c122_i32_206 : i32 to vector<16x128xi32>
    %467 = arith.cmpi slt, %33, %466 : vector<16x128xi32>
    %cst_207 = arith.constant 0.000000e+00 : f32
    %468 = vector.broadcast %cst_207 : f32 to vector<16x128xf32>
    %469 = arith.select %467, %465, %468 : vector<16x128xi1>, vector<16x128xf32>
    %c121_i32_208 = arith.constant 121 : i32
    %470 = tpu.dynamic_rotate %356 by %c121_i32_208 dim 1 : vector<16x128xf32>, i32 -> vector<16x128xf32>
    %c121_i32_209 = arith.constant 121 : i32
    %471 = vector.broadcast %c121_i32_209 : i32 to vector<16x128xi32>
    %472 = arith.cmpi slt, %33, %471 : vector<16x128xi32>
    %cst_210 = arith.constant 0.000000e+00 : f32
    %473 = vector.broadcast %cst_210 : f32 to vector<16x128xf32>
    %474 = arith.select %472, %470, %473 : vector<16x128xi1>, vector<16x128xf32>
    %c120_i32_211 = arith.constant 120 : i32
    %475 = tpu.dynamic_rotate %356 by %c120_i32_211 dim 1 : vector<16x128xf32>, i32 -> vector<16x128xf32>
    %c120_i32_212 = arith.constant 120 : i32
    %476 = vector.broadcast %c120_i32_212 : i32 to vector<16x128xi32>
    %477 = arith.cmpi slt, %33, %476 : vector<16x128xi32>
    %cst_213 = arith.constant 0.000000e+00 : f32
    %478 = vector.broadcast %cst_213 : f32 to vector<16x128xf32>
    %479 = arith.select %477, %475, %478 : vector<16x128xi1>, vector<16x128xf32>
    %480 = tpu.concatenate %444, %449, %454, %459, %464, %469, %474, %479 in 0 : vector<16x128xf32>, vector<16x128xf32>, vector<16x128xf32>, vector<16x128xf32>, vector<16x128xf32>, vector<16x128xf32>, vector<16x128xf32>, vector<16x128xf32> -> vector<128x128xf32>
    %c0_214 = arith.constant 0 : index
    %c256_215 = arith.constant 256 : index
    %481 = vector.load %arg2[%c0_214, %c256_215] : memref<16x512xf32, #tpu.memory_space<vmem>>, vector<16x128xf32>
    %cst_216 = arith.constant dense<0.000000e+00> : vector<16x128xf32>
    %482 = tpu.matmul %481, %480, %cst_216 {dimension_numbers = #tpu.dot_dimension_numbers<[1], [0], [0], [1], [0, 0, 1, 1], [], []>} : vector<16x128xf32>, vector<128x128xf32>, vector<16x128xf32> -> vector<16x128xf32>
    %483 = arith.addf %439, %482 : vector<16x128xf32>
    %c119_i32_217 = arith.constant 119 : i32
    %484 = tpu.dynamic_rotate %356 by %c119_i32_217 dim 1 : vector<16x128xf32>, i32 -> vector<16x128xf32>
    %c119_i32_218 = arith.constant 119 : i32
    %485 = vector.broadcast %c119_i32_218 : i32 to vector<16x128xi32>
    %486 = arith.cmpi slt, %33, %485 : vector<16x128xi32>
    %cst_219 = arith.constant 0.000000e+00 : f32
    %487 = vector.broadcast %cst_219 : f32 to vector<16x128xf32>
    %488 = arith.select %486, %484, %487 : vector<16x128xi1>, vector<16x128xf32>
    %c118_i32_220 = arith.constant 118 : i32
    %489 = tpu.dynamic_rotate %356 by %c118_i32_220 dim 1 : vector<16x128xf32>, i32 -> vector<16x128xf32>
    %c118_i32_221 = arith.constant 118 : i32
    %490 = vector.broadcast %c118_i32_221 : i32 to vector<16x128xi32>
    %491 = arith.cmpi slt, %33, %490 : vector<16x128xi32>
    %cst_222 = arith.constant 0.000000e+00 : f32
    %492 = vector.broadcast %cst_222 : f32 to vector<16x128xf32>
    %493 = arith.select %491, %489, %492 : vector<16x128xi1>, vector<16x128xf32>
    %c117_i32_223 = arith.constant 117 : i32
    %494 = tpu.dynamic_rotate %356 by %c117_i32_223 dim 1 : vector<16x128xf32>, i32 -> vector<16x128xf32>
    %c117_i32_224 = arith.constant 117 : i32
    %495 = vector.broadcast %c117_i32_224 : i32 to vector<16x128xi32>
    %496 = arith.cmpi slt, %33, %495 : vector<16x128xi32>
    %cst_225 = arith.constant 0.000000e+00 : f32
    %497 = vector.broadcast %cst_225 : f32 to vector<16x128xf32>
    %498 = arith.select %496, %494, %497 : vector<16x128xi1>, vector<16x128xf32>
    %c116_i32_226 = arith.constant 116 : i32
    %499 = tpu.dynamic_rotate %356 by %c116_i32_226 dim 1 : vector<16x128xf32>, i32 -> vector<16x128xf32>
    %c116_i32_227 = arith.constant 116 : i32
    %500 = vector.broadcast %c116_i32_227 : i32 to vector<16x128xi32>
    %501 = arith.cmpi slt, %33, %500 : vector<16x128xi32>
    %cst_228 = arith.constant 0.000000e+00 : f32
    %502 = vector.broadcast %cst_228 : f32 to vector<16x128xf32>
    %503 = arith.select %501, %499, %502 : vector<16x128xi1>, vector<16x128xf32>
    %c115_i32_229 = arith.constant 115 : i32
    %504 = tpu.dynamic_rotate %356 by %c115_i32_229 dim 1 : vector<16x128xf32>, i32 -> vector<16x128xf32>
    %c115_i32_230 = arith.constant 115 : i32
    %505 = vector.broadcast %c115_i32_230 : i32 to vector<16x128xi32>
    %506 = arith.cmpi slt, %33, %505 : vector<16x128xi32>
    %cst_231 = arith.constant 0.000000e+00 : f32
    %507 = vector.broadcast %cst_231 : f32 to vector<16x128xf32>
    %508 = arith.select %506, %504, %507 : vector<16x128xi1>, vector<16x128xf32>
    %c114_i32_232 = arith.constant 114 : i32
    %509 = tpu.dynamic_rotate %356 by %c114_i32_232 dim 1 : vector<16x128xf32>, i32 -> vector<16x128xf32>
    %c114_i32_233 = arith.constant 114 : i32
    %510 = vector.broadcast %c114_i32_233 : i32 to vector<16x128xi32>
    %511 = arith.cmpi slt, %33, %510 : vector<16x128xi32>
    %cst_234 = arith.constant 0.000000e+00 : f32
    %512 = vector.broadcast %cst_234 : f32 to vector<16x128xf32>
    %513 = arith.select %511, %509, %512 : vector<16x128xi1>, vector<16x128xf32>
    %c113_i32_235 = arith.constant 113 : i32
    %514 = tpu.dynamic_rotate %356 by %c113_i32_235 dim 1 : vector<16x128xf32>, i32 -> vector<16x128xf32>
    %c113_i32_236 = arith.constant 113 : i32
    %515 = vector.broadcast %c113_i32_236 : i32 to vector<16x128xi32>
    %516 = arith.cmpi slt, %33, %515 : vector<16x128xi32>
    %cst_237 = arith.constant 0.000000e+00 : f32
    %517 = vector.broadcast %cst_237 : f32 to vector<16x128xf32>
    %518 = arith.select %516, %514, %517 : vector<16x128xi1>, vector<16x128xf32>
    %519 = tpu.concatenate %488, %493, %498, %503, %508, %513, %518, %356 in 0 : vector<16x128xf32>, vector<16x128xf32>, vector<16x128xf32>, vector<16x128xf32>, vector<16x128xf32>, vector<16x128xf32>, vector<16x128xf32>, vector<16x128xf32> -> vector<128x128xf32>
    %c0_238 = arith.constant 0 : index
    %c384_239 = arith.constant 384 : index
    %520 = vector.load %arg2[%c0_238, %c384_239] : memref<16x512xf32, #tpu.memory_space<vmem>>, vector<16x128xf32>
    %cst_240 = arith.constant dense<0.000000e+00> : vector<16x128xf32>
    %521 = tpu.matmul %520, %519, %cst_240 {dimension_numbers = #tpu.dot_dimension_numbers<[1], [0], [0], [1], [0, 0, 1, 1], [], []>} : vector<16x128xf32>, vector<128x128xf32>, vector<16x128xf32> -> vector<16x128xf32>
    %522 = arith.addf %483, %521 : vector<16x128xf32>
    %cst_241 = arith.constant dense<0.000000e+00> : vector<16xf32>
    %523 = vector.multi_reduction <add>, %522, %cst_241 [1] : vector<16x128xf32> to vector<16xf32>
    %524 = vector.shape_cast %523 : vector<16xf32> to vector<16x1xf32>
    %cst_242 = arith.constant 1.280000e+02 : f32
    %525 = vector.broadcast %cst_242 : f32 to vector<16x1xf32>
    %526 = arith.divf %524, %525 : vector<16x1xf32>
    %527 = arith.mulf %522, %522 : vector<16x128xf32>
    %cst_243 = arith.constant dense<0.000000e+00> : vector<16xf32>
    %528 = vector.multi_reduction <add>, %527, %cst_243 [1] : vector<16x128xf32> to vector<16xf32>
    %529 = vector.shape_cast %528 : vector<16xf32> to vector<16x1xf32>
    %cst_244 = arith.constant 1.280000e+02 : f32
    %530 = vector.broadcast %cst_244 : f32 to vector<16x1xf32>
    %531 = arith.divf %529, %530 : vector<16x1xf32>
    %532 = arith.mulf %526, %526 : vector<16x1xf32>
    %533 = arith.subf %531, %532 : vector<16x1xf32>
    %cst_245 = arith.constant 0.000000e+00 : f32
    %534 = vector.broadcast %cst_245 : f32 to vector<16x1xf32>
    %535 = arith.maximumf %533, %534 : vector<16x1xf32>
    %536 = vector.broadcast %526 : vector<16x1xf32> to vector<16x128xf32>
    %537 = arith.subf %522, %536 : vector<16x128xf32>
    %cst_246 = arith.constant 9.99999974E-6 : f32
    %538 = vector.broadcast %cst_246 : f32 to vector<16x1xf32>
    %539 = arith.addf %535, %538 : vector<16x1xf32>
    %540 = math.rsqrt %539 : vector<16x1xf32>
    %541 = vector.broadcast %540 : vector<16x1xf32> to vector<16x128xf32>
    %542 = arith.mulf %537, %541 : vector<16x128xf32>
    %543 = arith.mulf %542, %8 : vector<16x128xf32>
    %544 = arith.addf %543, %11 : vector<16x128xf32>
    %545 = arith.mulf %544, %544 : vector<16x128xf32>
    %546 = arith.mulf %544, %545 : vector<16x128xf32>
    %cst_247 = arith.constant 4.471500e-02 : f32
    %547 = vector.broadcast %cst_247 : f32 to vector<16x128xf32>
    %548 = arith.mulf %547, %546 : vector<16x128xf32>
    %549 = arith.addf %544, %548 : vector<16x128xf32>
    %cst_248 = arith.constant 0.797884583 : f32
    %550 = vector.broadcast %cst_248 : f32 to vector<16x128xf32>
    %551 = arith.mulf %550, %549 : vector<16x128xf32>
    %552 = math.tanh %551 : vector<16x128xf32>
    %cst_249 = arith.constant 1.000000e+00 : f32
    %553 = vector.broadcast %cst_249 : f32 to vector<16x128xf32>
    %554 = arith.addf %553, %552 : vector<16x128xf32>
    %cst_250 = arith.constant 5.000000e-01 : f32
    %555 = vector.broadcast %cst_250 : f32 to vector<16x128xf32>
    %556 = arith.mulf %555, %554 : vector<16x128xf32>
    %557 = arith.mulf %544, %556 : vector<16x128xf32>
    %558 = arith.addf %557, %356 : vector<16x128xf32>
    %cst_251 = arith.constant dense<0.000000e+00> : vector<16xf32>
    %559 = vector.multi_reduction <add>, %558, %cst_251 [1] : vector<16x128xf32> to vector<16xf32>
    %560 = vector.shape_cast %559 : vector<16xf32> to vector<16x1xf32>
    %cst_252 = arith.constant 1.280000e+02 : f32
    %561 = vector.broadcast %cst_252 : f32 to vector<16x1xf32>
    %562 = arith.divf %560, %561 : vector<16x1xf32>
    %563 = arith.mulf %558, %558 : vector<16x128xf32>
    %cst_253 = arith.constant dense<0.000000e+00> : vector<16xf32>
    %564 = vector.multi_reduction <add>, %563, %cst_253 [1] : vector<16x128xf32> to vector<16xf32>
    %565 = vector.shape_cast %564 : vector<16xf32> to vector<16x1xf32>
    %cst_254 = arith.constant 1.280000e+02 : f32
    %566 = vector.broadcast %cst_254 : f32 to vector<16x1xf32>
    %567 = arith.divf %565, %566 : vector<16x1xf32>
    %568 = arith.mulf %562, %562 : vector<16x1xf32>
    %569 = arith.subf %567, %568 : vector<16x1xf32>
    %cst_255 = arith.constant 0.000000e+00 : f32
    %570 = vector.broadcast %cst_255 : f32 to vector<16x1xf32>
    %571 = arith.maximumf %569, %570 : vector<16x1xf32>
    %572 = vector.broadcast %562 : vector<16x1xf32> to vector<16x128xf32>
    %573 = arith.subf %558, %572 : vector<16x128xf32>
    %cst_256 = arith.constant 9.99999974E-6 : f32
    %574 = vector.broadcast %cst_256 : f32 to vector<16x1xf32>
    %575 = arith.addf %571, %574 : vector<16x1xf32>
    %576 = math.rsqrt %575 : vector<16x1xf32>
    %577 = vector.broadcast %576 : vector<16x1xf32> to vector<16x128xf32>
    %578 = arith.mulf %573, %577 : vector<16x128xf32>
    %579 = arith.mulf %578, %14 : vector<16x128xf32>
    %580 = arith.addf %579, %17 : vector<16x128xf32>
    %cst_257 = arith.constant dense<0.000000e+00> : vector<16x128xf32>
    %581 = tpu.matmul %580, %31, %cst_257 {dimension_numbers = #tpu.dot_dimension_numbers<[1], [0], [0], [1], [0, 0, 1, 1], [], []>} : vector<16x128xf32>, vector<128x128xf32>, vector<16x128xf32> -> vector<16x128xf32>
    %582 = arith.addf %581, %20 : vector<16x128xf32>
    %583 = arith.mulf %582, %582 : vector<16x128xf32>
    %584 = arith.mulf %582, %583 : vector<16x128xf32>
    %cst_258 = arith.constant 4.471500e-02 : f32
    %585 = vector.broadcast %cst_258 : f32 to vector<16x128xf32>
    %586 = arith.mulf %585, %584 : vector<16x128xf32>
    %587 = arith.addf %582, %586 : vector<16x128xf32>
    %cst_259 = arith.constant 0.797884583 : f32
    %588 = vector.broadcast %cst_259 : f32 to vector<16x128xf32>
    %589 = arith.mulf %588, %587 : vector<16x128xf32>
    %590 = math.tanh %589 : vector<16x128xf32>
    %cst_260 = arith.constant 1.000000e+00 : f32
    %591 = vector.broadcast %cst_260 : f32 to vector<16x128xf32>
    %592 = arith.addf %591, %590 : vector<16x128xf32>
    %cst_261 = arith.constant 5.000000e-01 : f32
    %593 = vector.broadcast %cst_261 : f32 to vector<16x128xf32>
    %594 = arith.mulf %593, %592 : vector<16x128xf32>
    %595 = arith.mulf %582, %594 : vector<16x128xf32>
    %596 = arith.addf %595, %580 : vector<16x128xf32>
    %597 = tpu.iota {dimensions = array<i32: 1>} : vector<8x192xi32>
    %598 = tpu.iota {dimensions = array<i32: 0>} : vector<8x192xi32>
    %c24_i32 = arith.constant 24 : i32
    %599 = vector.broadcast %c24_i32 : i32 to vector<8x192xi32>
    %600 = arith.muli %598, %599 : vector<8x192xi32>
    %601 = arith.cmpi sge, %597, %600 : vector<8x192xi32>
    %c24_i32_262 = arith.constant 24 : i32
    %602 = vector.broadcast %c24_i32_262 : i32 to vector<8x192xi32>
    %603 = arith.addi %600, %602 : vector<8x192xi32>
    %604 = arith.cmpi slt, %597, %603 : vector<8x192xi32>
    %605 = arith.andi %601, %604 : vector<8x192xi1>
    %cst_263 = arith.constant 1.000000e+00 : f32
    %cst_264 = arith.constant 0.000000e+00 : f32
    %606 = vector.broadcast %cst_263 : f32 to vector<8x192xf32>
    %607 = vector.broadcast %cst_264 : f32 to vector<8x192xf32>
    %608 = arith.select %605, %606, %607 : vector<8x192xi1>, vector<8x192xf32>
    %609 = tpu.concatenate %608, %608 in 0 : vector<8x192xf32>, vector<8x192xf32> -> vector<16x192xf32>
    %610 = tpu.iota {dimensions = array<i32: 0>} : vector<24x24xi32>
    %611 = tpu.iota {dimensions = array<i32: 1>} : vector<24x24xi32>
    %612 = arith.cmpi eq, %610, %611 : vector<24x24xi32>
    %cst_265 = arith.constant 1.000000e+00 : f32
    %cst_266 = arith.constant 0.000000e+00 : f32
    %613 = vector.broadcast %cst_265 : f32 to vector<24x24xf32>
    %614 = vector.broadcast %cst_266 : f32 to vector<24x24xf32>
    %615 = arith.select %612, %613, %614 : vector<24x24xi1>, vector<24x24xf32>
    %616 = tpu.concatenate %615, %615, %615, %615, %615, %615, %615, %615 in 0 : vector<24x24xf32>, vector<24x24xf32>, vector<24x24xf32>, vector<24x24xf32>, vector<24x24xf32>, vector<24x24xf32>, vector<24x24xf32>, vector<24x24xf32> -> vector<192x24xf32>
    %617 = tpu.iota {dimensions = array<i32: 1>} : vector<2x16xi32>
    %618 = tpu.iota {dimensions = array<i32: 0>} : vector<2x16xi32>
    %c8_i32_267 = arith.constant 8 : i32
    %619 = vector.broadcast %c8_i32_267 : i32 to vector<2x16xi32>
    %620 = arith.muli %618, %619 : vector<2x16xi32>
    %621 = arith.cmpi sge, %617, %620 : vector<2x16xi32>
    %c8_i32_268 = arith.constant 8 : i32
    %622 = vector.broadcast %c8_i32_268 : i32 to vector<2x16xi32>
    %623 = arith.addi %620, %622 : vector<2x16xi32>
    %624 = arith.cmpi slt, %617, %623 : vector<2x16xi32>
    %625 = arith.andi %621, %624 : vector<2x16xi1>
    %cst_269 = arith.constant 1.000000e+00 : f32
    %cst_270 = arith.constant 0.000000e+00 : f32
    %626 = vector.broadcast %cst_269 : f32 to vector<2x16xf32>
    %627 = vector.broadcast %cst_270 : f32 to vector<2x16xf32>
    %628 = arith.select %625, %626, %627 : vector<2x16xi1>, vector<2x16xf32>
    %cst_271 = arith.constant dense<0.000000e+00> : vector<16x192xf32>
    %629 = tpu.matmul %596, %32, %cst_271 {dimension_numbers = #tpu.dot_dimension_numbers<[1], [0], [0], [1], [0, 0, 1, 1], [], []>} : vector<16x128xf32>, vector<128x192xf32>, vector<16x192xf32> -> vector<16x192xf32>
    %630 = arith.mulf %629, %609 : vector<16x192xf32>
    %cst_272 = arith.constant dense<0.000000e+00> : vector<16x24xf32>
    %631 = tpu.matmul %630, %616, %cst_272 {dimension_numbers = #tpu.dot_dimension_numbers<[1], [0], [0], [1], [0, 0, 1, 1], [], []>} : vector<16x192xf32>, vector<192x24xf32>, vector<16x24xf32> -> vector<16x24xf32>
    %cst_273 = arith.constant dense<0.000000e+00> : vector<2x24xf32>
    %632 = tpu.matmul %628, %631, %cst_273 {dimension_numbers = #tpu.dot_dimension_numbers<[1], [0], [0], [1], [0, 0, 1, 1], [], []>} : vector<2x16xf32>, vector<16x24xf32>, vector<2x24xf32> -> vector<2x24xf32>
    %633 = vector.broadcast %29 : vector<1x24xf32> to vector<2x24xf32>
    %634 = arith.addf %632, %633 : vector<2x24xf32>
    %cst_274 = arith.constant dense<0.000000e+00> : vector<2xf32>
    %635 = vector.multi_reduction <add>, %634, %cst_274 [1] : vector<2x24xf32> to vector<2xf32>
    %636 = vector.shape_cast %635 : vector<2xf32> to vector<2x1xf32>
    %cst_275 = arith.constant 2.400000e+01 : f32
    %637 = vector.broadcast %cst_275 : f32 to vector<2x1xf32>
    %638 = arith.divf %636, %637 : vector<2x1xf32>
    %639 = arith.mulf %634, %634 : vector<2x24xf32>
    %cst_276 = arith.constant dense<0.000000e+00> : vector<2xf32>
    %640 = vector.multi_reduction <add>, %639, %cst_276 [1] : vector<2x24xf32> to vector<2xf32>
    %641 = vector.shape_cast %640 : vector<2xf32> to vector<2x1xf32>
    %cst_277 = arith.constant 2.400000e+01 : f32
    %642 = vector.broadcast %cst_277 : f32 to vector<2x1xf32>
    %643 = arith.divf %641, %642 : vector<2x1xf32>
    %644 = arith.mulf %638, %638 : vector<2x1xf32>
    %645 = arith.subf %643, %644 : vector<2x1xf32>
    %cst_278 = arith.constant 0.000000e+00 : f32
    %646 = vector.broadcast %cst_278 : f32 to vector<2x1xf32>
    %647 = arith.maximumf %645, %646 : vector<2x1xf32>
    %648 = vector.broadcast %638 : vector<2x1xf32> to vector<2x24xf32>
    %649 = arith.subf %634, %648 : vector<2x24xf32>
    %cst_279 = arith.constant 9.99999974E-6 : f32
    %650 = vector.broadcast %cst_279 : f32 to vector<2x1xf32>
    %651 = arith.addf %647, %650 : vector<2x1xf32>
    %652 = math.rsqrt %651 : vector<2x1xf32>
    %653 = vector.broadcast %652 : vector<2x1xf32> to vector<2x24xf32>
    %654 = arith.mulf %649, %653 : vector<2x24xf32>
    %655 = vector.broadcast %27 : vector<1x24xf32> to vector<2x24xf32>
    %656 = arith.mulf %654, %655 : vector<2x24xf32>
    %657 = vector.broadcast %28 : vector<1x24xf32> to vector<2x24xf32>
    %658 = arith.addf %656, %657 : vector<2x24xf32>
    %659 = arith.mulf %658, %658 : vector<2x24xf32>
    %660 = arith.mulf %658, %659 : vector<2x24xf32>
    %cst_280 = arith.constant 4.471500e-02 : f32
    %661 = vector.broadcast %cst_280 : f32 to vector<2x24xf32>
    %662 = arith.mulf %661, %660 : vector<2x24xf32>
    %663 = arith.addf %658, %662 : vector<2x24xf32>
    %cst_281 = arith.constant 0.797884583 : f32
    %664 = vector.broadcast %cst_281 : f32 to vector<2x24xf32>
    %665 = arith.mulf %664, %663 : vector<2x24xf32>
    %666 = math.tanh %665 : vector<2x24xf32>
    %cst_282 = arith.constant 1.000000e+00 : f32
    %667 = vector.broadcast %cst_282 : f32 to vector<2x24xf32>
    %668 = arith.addf %667, %666 : vector<2x24xf32>
    %cst_283 = arith.constant 5.000000e-01 : f32
    %669 = vector.broadcast %cst_283 : f32 to vector<2x24xf32>
    %670 = arith.mulf %669, %668 : vector<2x24xf32>
    %671 = arith.mulf %658, %670 : vector<2x24xf32>
    %c0_284 = arith.constant 0 : index
    %c0_285 = arith.constant 0 : index
    %672 = vector.load %arg4[%c0_284, %c0_285] : memref<24x4xf32, #tpu.memory_space<vmem>>, vector<24x4xf32>
    %cst_286 = arith.constant dense<0.000000e+00> : vector<2x4xf32>
    %673 = tpu.matmul %671, %672, %cst_286 {dimension_numbers = #tpu.dot_dimension_numbers<[1], [0], [0], [1], [0, 0, 1, 1], [], []>} : vector<2x24xf32>, vector<24x4xf32>, vector<2x4xf32> -> vector<2x4xf32>
    %674 = vector.broadcast %30 : vector<1x4xf32> to vector<2x4xf32>
    %675 = arith.addf %673, %674 : vector<2x4xf32>
    %c0_287 = arith.constant 0 : index
    %c0_288 = arith.constant 0 : index
    %676 = vector.load %arg8[%c0_287, %c0_288] : memref<2x4xf32, #tpu.memory_space<vmem>>, vector<2x4xf32>
    tpu.vector_store %arg8[%c0_287, %c0_288], %675 {strides = array<i32>} : memref<2x4xf32, #tpu.memory_space<vmem>>, vector<2x4xf32>,
    return
  }
}

</mosaic_0001>

<bundles_post_ra>
// kernel: ssvepformer_pallas.1
= control target key start
LH: loop header
LB: loop body
LE: loop exit
PB: predicated region body
PF: predicated region fallthrough
CT: control target
= control target key end

     0   :  { %vm121_vm0 = vcmask 64512   ;;  %v1782_v3 = vmov 0   ;;  %s3034_s0 = inlined_call_operand.vmem [shape: f32[8,128], index: 0, kind: input, shape index: {}]   ;;  %s3035_s1 = inlined_call_operand.vmem [shape: f32[16,8], index: 1, kind: input, shape index: {}]   ;;  %s3036_s2 = inlined_call_operand.vmem [shape: f32[16,512], index: 2, kind: input, shape index: {}]   ;;  %s3037_s3 = inlined_call_operand.vmem [shape: f32[128,320], index: 3, kind: input, shape index: {}]   ;;  %s3038_s4 = inlined_call_operand.vmem [shape: f32[24,4], index: 4, kind: input, shape index: {}]   ;;  %s3039_s5 = inlined_call_operand.vmem [shape: f32[8,128], index: 5, kind: input, shape index: {}]   ;;  %s3040_s6 = inlined_call_operand.vmem [shape: f32[16,2], index: 6, kind: input, shape index: {}]   ;;  %s3041_s7 = inlined_call_operand.vmem [shape: f32[4,24], index: 7, kind: input, shape index: {}]   ;;  %s3042_s8 = inlined_call_operand.hbm [shape: f32[2,4], index: 8, kind: output, shape index: {}]  }
   0x1   :  { %v120_v0 = vld [vmem:[%s3034_s0] sm:$0xff]  ;;  %v1873_v2 = vld [vmem:[%s3040_s6 + $0x8] sm:$0xff]  ;;  %1684 = vset.pattern.permute.xlu0 %v1782_v3 }
   0x2   :  { %v118_v1 = vld [vmem:[%s3035_s1] sm:$0xff]  ;;  %143 = vmatpush.msra.mxu0 %v120_v0  ;;  %53 = vperm.xlu0 %1684, %v1873_v2  }
   0x3   :  { %1497 = vmatmul.msk.f32.vlgmr.msra.gmra.mxu0 %vm121_vm0, %v118_v1 }
   0x4   :  { %13 = vsyncpa [#allocation3], 0  ;;  %v119_v4 = vld [vmem:[%s3035_s1 + $0x8] sm:$0xff]  ;;  %v1882_v5 = vld [vmem:[%s3040_s6] sm:$0xff]  ;;  %v1783_v14 = vmov 128.0   ;;  %s1784_s20 = smov 1  }
   0x5   :  { %1698 = vrcp.f32 %v1783_v14  ;;  %v1687_v46 = vld [vmem:[%s3039_s5] ss:$0 sm:$0xff]  ;;  %v1688_v50 = vld [vmem:[%s3039_s5 + $0x1] ss:$0 sm:$0xff]  ;;  %s1785_s21 = smov 8   ;;  %s1786_s22 = smov 120  }
   0x6   :  { %s1787_s23 = smov 9   ;;  %s1788_s24 = smov 121  }
   0x7   :  { %s1789_s25 = smov 2   ;;  %s1790_s26 = smov 10  }
   0x8   :  { %s1791_s27 = smov 122   ;;  %s1792_s28 = smov 3  }
   0x9   :  { %s3051_s29 = smov 123   ;;  %s1794_s30 = smov 11  }
   0xa   :  { %48 = vperm.xlu0 %1684, %v1882_v5   ;;  %s1795_s9 = smov 113   ;;  %s1796_s10 = smov 4  }
   0xb   :  { %1498 = vmatmul.msk.f32.gmra.mxu0 %vm121_vm0, %v119_v4  ;;  %v1699_v15 = vpop.eup %1698  ;;  %s3053_s11 = smov 124   ;;  %s1798_s12 = smov 12  }
   0xc   :  { %v156_v16 = vmul.f32 128.0, %v1699_v15  ;;  %vm160_vm1 = vweird.f32 %v1699_v15  ;;  %s1799_s0 = smov 114   ;;  %s3045_s13 = smov 5  }
   0xd   :  { %s3049_s1 = smov 125   ;;  %s1802_s6 = smov 13  }
   0xe   :  { %v157_v17 = vsub.f32 1.0, %v156_v16  ;;  %s3043_s14 = smov 115   ;;  %s1804_s15 = smov 6  }
   0xf   :  { %s3047_s16 = smov 126   ;;  %s3078_s17 = smov 14  }
  0x10   :  { %v158_v18 = vmul.f32 %v1699_v15, %v157_v17  ;;  %s3055_s18 = smov 116   ;;  %s3057_s19 = smov 7  }
  0x12   :  { %v159_v19 = vadd.f32 %v1699_v15, %v158_v18 }
  0x14   :  { %v1885_v20 = vsel %vm160_vm1, %v1699_v15, %v159_v19 }
  0x74   :  { %v54_v6 = vpop.permute.xlu0 %53 }
  0x7c   :  { %v49_v7 = vpop.permute.xlu0 %48 }
  0x80   :  { %v145_v8 = vpop.f32.mrf.mxu0 }
  0x81   :  { %v146_v9 = vadd.f32 %v145_v8, %v49_v7 }
  0x83   :  { %151 = vadd.xlane.f32.xlu1 %v146_v9  ;;  %v164_v10 = vmul.f32 %v146_v9, %v146_v9 }
  0x85   :  { %166 = vadd.xlane.f32.xlu2 %v164_v10 }
  0x88   :  { %v148_v11 = vpop.f32.mrf.mxu0 }
  0x89   :  { %v149_v12 = vadd.f32 %v148_v11, %v54_v6 }
  0x8b   :  { %153 = vadd.xlane.f32.xlu1 %v149_v12  ;;  %v165_v13 = vmul.f32 %v149_v12, %v149_v12 }
  0x8d   :  { %168 = vadd.xlane.f32.xlu2 %v165_v13 }
  0xf6   :  { %v152_v21 = vpop.xlane.xlu1 %151 }
  0xf7   :  { %v162_v22 = vmul.f32 %v1885_v20, %v152_v21 }
  0xf8   :  { %v167_v23 = vpop.xlane.xlu2 %166 }
  0xf9   :  { %v172_v24 = vmul.f32 %v162_v22, %v162_v22  ;;  %v170_v25 = vmul.f32 %v167_v23, %v1885_v20  ;;  %v178_v44 = vsub.f32 %v146_v9, %v162_v22 }
  0xfb   :  { %v174_v26 = vsub.f32 %v170_v25, %v172_v24 }
  0xfd   :  { %v176_v27 = vmax.f32 %v174_v26, 0.0 }
  0xfe   :  { %v154_v28 = vpop.xlane.xlu1 %153 }
  0xff   :  { %v180_v29 = vadd.f32 1e-05, %v176_v27  ;;  %v163_v30 = vmul.f32 %v1885_v20, %v154_v28 }
 0x100   :  { %v169_v31 = vpop.xlane.xlu2 %168 }
 0x101   :  { %1700 = vrsqrt.f32 %v180_v29  ;;  %v173_v32 = vmul.f32 %v163_v30, %v163_v30  ;;  %v171_v33 = vmul.f32 %v169_v31, %v1885_v20  ;;  %vm188_vm3 = vweird.f32 %v180_v29 }
 0x102   :  { %v179_v57 = vsub.f32 %v149_v12, %v163_v30 }
 0x103   :  { %v175_v34 = vsub.f32 %v171_v33, %v173_v32 }
 0x105   :  { %v177_v35 = vmax.f32 %v175_v34, 0.0 }
 0x107   :  { %v1701_v36 = vpop.eup %1700  ;;  %v181_v38 = vadd.f32 1e-05, %v177_v35 }
 0x108   :  { %v183_v37 = vmul.f32 %v1701_v36, %v180_v29  ;;  %vm189_vm2 = vweird.f32 %v1701_v36 }
 0x109   :  { %1702 = vrsqrt.f32 %v181_v38  ;;  %vm190_vm4 = vmor %vm188_vm3, %vm189_vm2  ;;  %vm198_vm6 = vweird.f32 %v181_v38 }
 0x10a   :  { %v184_v39 = vmul.f32 %v1701_v36, %v183_v37 }
 0x10c   :  { %v185_v40 = vmul.f32 0.5, %v184_v39 }
 0x10e   :  { %v186_v41 = vsub.f32 1.5, %v185_v40 }
 0x10f   :  { %v1703_v42 = vpop.eup %1702 }
 0x110   :  { %v187_v43 = vmul.f32 %v1701_v36, %v186_v41  ;;  %v193_v45 = vmul.f32 %v1703_v42, %v181_v38  ;;  %vm199_vm5 = vweird.f32 %v1703_v42 }
 0x111   :  { %vm200_vm7 = vmor %vm198_vm6, %vm199_vm5 }
 0x112   :  { %v191_v47 = vsel %vm190_vm4, %v1701_v36, %v187_v43  ;;  %v194_v49 = vmul.f32 %v1703_v42, %v193_v45 }
 0x113   :  { %v202_v48 = vmul.f32 %v191_v47, %v178_v44  ;;  %v1904_v47 = vld [vmem:[%s3039_s5 + $0x2] ss:$0 sm:$0xff] }
 0x114   :  { %v195_v51 = vmul.f32 0.5, %v194_v49 }
 0x115   :  { %v204_v52 = vmul.f32 %v1687_v46, %v202_v48 }
 0x116   :  { %v196_v53 = vsub.f32 1.5, %v195_v51 }
 0x117   :  { %v206_v54 = vadd.f32 %v1688_v50, %v204_v52 }
 0x118   :  { %v197_v55 = vmul.f32 %v1703_v42, %v196_v53 }
 0x119   :  { %v208_v56 = vmul.f32 %v206_v54, %v206_v54 }
 0x11a   :  { %v201_v58 = vsel %vm200_vm7, %v1703_v42, %v197_v55 }
 0x11b   :  { %v210_v59 = vmul.f32 %v208_v56, %v206_v54  ;;  %v203_v60 = vmul.f32 %v201_v58, %v179_v57 }
 0x11d   :  { %v212_v61 = vmul.f32 0.044715, %v210_v59  ;;  %v205_v62 = vmul.f32 %v1687_v46, %v203_v60 }
 0x11f   :  { %v214_v63 = vadd.f32 %v212_v61, %v206_v54  ;;  %v207_v0 = vadd.f32 %v1688_v50, %v205_v62  ;;  %v1909_v50 = vld [vmem:[%s3039_s5 + $0x3] ss:$0 sm:$0xff] }
 0x121   :  { %v216_v1 = vmul.f32 0.7978846, %v214_v63  ;;  %v209_v3 = vmul.f32 %v207_v0, %v207_v0 }
 0x123   :  { %1704 = vtanh.f32 %v216_v1  ;;  %v211_v4 = vmul.f32 %v209_v3, %v207_v0 }
 0x125   :  { %v213_v6 = vmul.f32 0.044715, %v211_v4 }
 0x127   :  { %v215_v7 = vadd.f32 %v213_v6, %v207_v0 }
 0x129   :  { %v1705_v8 = vpop.eup %1704  ;;  %v217_v10 = vmul.f32 0.7978846, %v215_v7 }
 0x12a   :  { %v220_v9 = vadd.f32 1.0, %v1705_v8 }
 0x12b   :  { %1706 = vtanh.f32 %v217_v10 }
 0x12c   :  { %v222_v11 = vmul.f32 0.5, %v220_v9 }
 0x12e   :  { %v224_v12 = vmul.f32 %v222_v11, %v206_v54 }
 0x130   :  { %226 = vadd.xlane.f32.xlu1 %v224_v12  ;;  %v232_v16 = vmul.f32 %v224_v12, %v224_v12 }
 0x131   :  { %v1707_v13 = vpop.eup %1706 }
 0x132   :  { %v221_v14 = vadd.f32 1.0, %v1707_v13 }
 0x134   :  { %v223_v15 = vmul.f32 0.5, %v221_v14 }
 0x136   :  { %v225_v17 = vmul.f32 %v223_v15, %v207_v0 }
 0x138   :  { %234 = vadd.xlane.f32.xlu1 %v232_v16  ;;  %228 = vadd.xlane.f32.xlu0 %v225_v17  ;;  %v233_v18 = vmul.f32 %v225_v17, %v225_v17  ;;  %v3091_v16 = vlaneseq }
 0x13a   :  { %236 = vadd.xlane.f32.xlu2 %v233_v18 }
 0x1a3   :  { %v227_v19 = vpop.xlane.xlu1 %226 }
 0x1a4   :  { %v230_v21 = vmul.f32 %v227_v19, %v1885_v20 }
 0x1a6   :  { %v240_v23 = vmul.f32 %v230_v21, %v230_v21  ;;  %v246_v46 = vsub.f32 %v224_v12, %v230_v21  ;;  %v2074_v21 = vand.u32 127, %v3091_v16 }
 0x1a8   :  { %vm488_vm14 = vcmp.lt.s32.totalorder %v2074_v21, 120  ;;  %vm405_vm15 = vcmp.ge.s32.totalorder %v2074_v21, 1  ;;  %vm481_vm0 = vcmp.lt.s32.totalorder %v2074_v21, 121  ;;  %vm329_vm1 = vcmp.ge.s32.totalorder %v2074_v21, 8 }
 0x1a9   :  { %vm398_vm2 = vcmp.ge.s32.totalorder %v2074_v21, 2  ;;  %vm322_vm3 = vcmp.ge.s32.totalorder %v2074_v21, 9  ;;  %vm391_vm4 = vcmp.ge.s32.totalorder %v2074_v21, 3  ;;  %vm315_vm5 = vcmp.ge.s32.totalorder %v2074_v21, 10 }
 0x1aa   :  { %vm3061_vm6 = vcmp.lt.s32.totalorder %v2074_v21, 122  ;;  %vm3090_vm7 = vcmp.lt.s32.totalorder %v2074_v21, 113 }
 0x1ab   :  { %v235_v22 = vpop.xlane.xlu1 %234  ;;  %v229_v24 = vpop.xlane.xlu0 %228 }
 0x1ac   :  { %v238_v25 = vmul.f32 %v235_v22, %v1885_v20  ;;  %v231_v26 = vmul.f32 %v229_v24, %v1885_v20 }
 0x1ad   :  { %v237_v28 = vpop.xlane.xlu2 %236 }
 0x1ae   :  { %v242_v27 = vsub.f32 %v238_v25, %v240_v23  ;;  %v241_v29 = vmul.f32 %v231_v26, %v231_v26  ;;  %v239_v30 = vmul.f32 %v237_v28, %v1885_v20  ;;  %v247_v53 = vsub.f32 %v225_v17, %v231_v26 }
 0x1b0   :  { %v244_v31 = vmax.f32 %v242_v27, 0.0  ;;  %v243_v32 = vsub.f32 %v239_v30, %v241_v29 }
 0x1b2   :  { %v248_v33 = vadd.f32 1e-05, %v244_v31  ;;  %v245_v34 = vmax.f32 %v243_v32, 0.0 }
 0x1b4   :  { %1708 = vrsqrt.f32 %v248_v33  ;;  %v249_v35 = vadd.f32 1e-05, %v245_v34  ;;  %vm256_vm9 = vweird.f32 %v248_v33 }
 0x1b6   :  { %1710 = vrsqrt.f32 %v249_v35  ;;  %vm266_vm12 = vweird.f32 %v249_v35 }
 0x1ba   :  { %v1709_v36 = vpop.eup %1708 }
 0x1bb   :  { %v251_v37 = vmul.f32 %v1709_v36, %v248_v33  ;;  %vm257_vm8 = vweird.f32 %v1709_v36 }
 0x1bc   :  { %v1711_v38 = vpop.eup %1710  ;;  %vm258_vm10 = vmor %vm256_vm9, %vm257_vm8  ;;  %vm308_vm8 = vcmp.ge.s32.totalorder %v2074_v21, 11  ;;  %vm301_vm9 = vcmp.ge.s32.totalorder %v2074_v21, 12 }
 0x1bd   :  { %v252_v39 = vmul.f32 %v1709_v36, %v251_v37  ;;  %v261_v40 = vmul.f32 %v1711_v38, %v249_v35  ;;  %vm267_vm11 = vweird.f32 %v1711_v38 }
 0x1be   :  { %vm268_vm13 = vmor %vm266_vm12, %vm267_vm11  ;;  %vm3060_vm11 = vcmp.lt.s32.totalorder %v2074_v21, 124  ;;  %vm3064_vm12 = vcmp.ge.s32.totalorder %v2074_v21, 4 }
 0x1bf   :  { %v253_v41 = vmul.f32 0.5, %v252_v39  ;;  %v262_v42 = vmul.f32 %v1711_v38, %v261_v40 }
 0x1c1   :  { %v254_v43 = vsub.f32 1.5, %v253_v41  ;;  %v263_v44 = vmul.f32 0.5, %v262_v42 }
 0x1c3   :  { %v255_v45 = vmul.f32 %v1709_v36, %v254_v43  ;;  %v264_v48 = vsub.f32 1.5, %v263_v44 }
 0x1c5   :  { %v259_v49 = vsel %vm258_vm10, %v1709_v36, %v255_v45  ;;  %v265_v52 = vmul.f32 %v1711_v38, %v264_v48  ;;  %vm3059_vm10 = vcmp.lt.s32.totalorder %v2074_v21, 123 }
 0x1c6   :  { %v270_v51 = vmul.f32 %v259_v49, %v246_v46 }
 0x1c7   :  { %v269_v55 = vsel %vm268_vm13, %v1711_v38, %v265_v52  ;;  %vm3062_vm13 = vcmp.lt.s32.totalorder %v2074_v21, 125 }
 0x1c8   :  { %v272_v54 = vmul.f32 %v1904_v47, %v270_v51  ;;  %v271_v56 = vmul.f32 %v269_v55, %v247_v53 }
 0x1ca   :  { %v1913_v57 = vadd.f32 %v1909_v50, %v272_v54  ;;  %v273_v58 = vmul.f32 %v1904_v47, %v271_v56  ;;  %v1814_v54 = vmov 1  }
 0x1cb   :  { %1685 = vset.pattern.permute.xlu1 %v1814_v54  ;;  %1686 = vset.pattern.permute.xlu0 %v1814_v54 }
 0x1cc   :  { %401 = vrot.lane.b32.xlu0 %v1913_v57, %s1784_s20  ;;  %325 = vrot.lane.b32.xlu1 %v1913_v57, %s1785_s21  ;;  %v1921_v59 = vadd.f32 %v1909_v50, %v273_v58  ;;  %v2238_v58 = vld [vmem:[%s3036_s2] sm:$0xff] }
 0x1cd   :  { %484 = vrot.lane.b32.xlu2 %v1913_v57, %s1786_s22 }
 0x1ce   :  { %410 = vmatpush.msra.mxu2 %v1921_v59  ;;  %569 = vmatpush.msrb.mxu0 %v1921_v59 }
 0x1d0   :  { %411 = vmatpush.msra.mxu2 %v1913_v57  ;;  %570 = vmatpush.msrb.mxu0 %v1913_v57 }
 0x1d4   :  { %318 = vrot.lane.b32.xlu0 %v1913_v57, %s1787_s23  ;;  %477 = vrot.lane.b32.xlu1 %v1913_v57, %s1788_s24 }
 0x1d5   :  { %394 = vrot.lane.b32.xlu2 %v1913_v57, %s1789_s25 }
 0x1dc   :  { %311 = vrot.lane.b32.xlu0 %v1913_v57, %s1790_s26  ;;  %470 = vrot.lane.b32.xlu1 %v1913_v57, %s1791_s27 }
 0x1dd   :  { %387 = vrot.lane.b32.xlu2 %v1913_v57, %s1792_s28 }
 0x1e4   :  { %463 = vrot.lane.b32.xlu0 %v1913_v57, %s3051_s29  ;;  %304 = vrot.lane.b32.xlu1 %v1913_v57, %s1794_s30 }
 0x1e5   :  { %560 = vrot.lane.b32.xlu2 %v1913_v57, %s1795_s9 }
 0x1ec   :  { %380 = vrot.lane.b32.xlu0 %v1913_v57, %s1796_s10  ;;  %456 = vrot.lane.b32.xlu1 %v1913_v57, %s3053_s11 }
 0x1ed   :  { %297 = vrot.lane.b32.xlu2 %v1913_v57, %s1798_s12 }
 0x1f4   :  { %553 = vrot.lane.b32.xlu0 %v1913_v57, %s1799_s0  ;;  %373 = vrot.lane.b32.xlu1 %v1913_v57, %s3045_s13  ;;  %s3070_s13 = smov 127  }
 0x1f5   :  { %449 = vrot.lane.b32.xlu2 %v1913_v57, %s3049_s1 }
 0x1fc   :  { %290 = vrot.lane.b32.xlu0 %v1913_v57, %s1802_s6  ;;  %546 = vrot.lane.b32.xlu1 %v1913_v57, %s3043_s14  ;;  %s3076_s14 = smov 117  }
 0x1fd   :  { %366 = vrot.lane.b32.xlu2 %v1913_v57, %s1804_s15 }
 0x204   :  { %442 = vrot.lane.b32.xlu0 %v1913_v57, %s3047_s16  ;;  %283 = vrot.lane.b32.xlu1 %v1913_v57, %s3078_s17  ;;  %s3080_s16 = smov 15  }
 0x205   :  { %539 = vrot.lane.b32.xlu2 %v1913_v57, %s3055_s18 }
 0x20c   :  { %359 = vrot.lane.b32.xlu0 %v1913_v57, %s3057_s19  ;;  %532 = vrot.lane.b32.xlu1 %v1913_v57, %s3076_s14 }
 0x20d   :  { %435 = vrot.lane.b32.xlu2 %v1913_v57, %s3070_s13 }
 0x214   :  { %276 = vrot.lane.b32.xlu0 %v1913_v57, %s3080_s16  ;;  %327 = vrot.lane.b32.xlu1 %v1921_v59, %s1785_s21 }
 0x215   :  { %486 = vrot.lane.b32.xlu2 %v1921_v59, %s1786_s22 }
 0x21c   :  { %313 = vrot.lane.b32.xlu0 %v1921_v59, %s1790_s26  ;;  %320 = vrot.lane.b32.xlu1 %v1921_v59, %s1787_s23 }
 0x21d   :  { %403 = vrot.lane.b32.xlu2 %v1921_v59, %s1784_s20 }
 0x224   :  { %562 = vrot.lane.b32.xlu0 %v1921_v59, %s1795_s9  ;;  %472 = vrot.lane.b32.xlu1 %v1921_v59, %s1791_s27 }
 0x225   :  { %479 = vrot.lane.b32.xlu2 %v1921_v59, %s1788_s24 }
 0x227   :  { %v485_v60 = vpop.permute.xlu2 %484 }
 0x22c   :  { %299 = vrot.lane.b32.xlu0 %v1921_v59, %s1798_s12  ;;  %465 = vrot.lane.b32.xlu1 %v1921_v59, %s3051_s29  ;;  %s3099_s29 = smov 5  }
 0x22d   :  { %396 = vrot.lane.b32.xlu2 %v1921_v59, %s1789_s25 }
 0x22f   :  { %v2001_v61 = vpop.permute.xlu2 %394 }
 0x234   :  { %451 = vrot.lane.b32.xlu0 %v1921_v59, %s3049_s1  ;;  %382 = vrot.lane.b32.xlu1 %v1921_v59, %s1796_s10  ;;  %s3098_s1 = smov 126  }
 0x235   :  { %389 = vrot.lane.b32.xlu2 %v1921_v59, %s1792_s28 }
 0x237   :  { %v2009_v62 = vpop.permute.xlu2 %387 }
 0x23c   :  { %368 = vrot.lane.b32.xlu0 %v1921_v59, %s1804_s15  ;;  %555 = vrot.lane.b32.xlu1 %v1921_v59, %s1799_s0 }
 0x23d   :  { %306 = vrot.lane.b32.xlu2 %v1921_v59, %s1794_s30 }
 0x23e   :  { %v402_v63 = vpop.permute.xlu0 %401  ;;  %v326_v0 = vpop.permute.xlu1 %325 }
 0x23f   :  { %v2017_v1 = vpop.permute.xlu2 %560 }
 0x244   :  { %541 = vrot.lane.b32.xlu0 %v1921_v59, %s3055_s18  ;;  %292 = vrot.lane.b32.xlu1 %v1921_v59, %s1802_s6  ;;  %s3100_s18 = smov 115  }
 0x245   :  { %458 = vrot.lane.b32.xlu2 %v1921_v59, %s3053_s11  ;;  %s3068_s11 = smov 119  }
 0x246   :  { %v2025_v3 = vpop.permute.xlu0 %318  ;;  %v478_v4 = vpop.permute.xlu1 %477 }
 0x247   :  { %v2027_v6 = vpop.permute.xlu2 %297 }
 0x24c   :  { %278 = vrot.lane.b32.xlu0 %v1921_v59, %s3080_s16  ;;  %444 = vrot.lane.b32.xlu1 %v1921_v59, %s3098_s1  ;;  %s3108_s16 = smov 116  }
 0x24d   :  { %375 = vrot.lane.b32.xlu2 %v1921_v59, %s3099_s29 }
 0x24e   :  { %v2035_v7 = vpop.permute.xlu0 %311  ;;  %v2037_v8 = vpop.permute.xlu1 %470 }
 0x24f   :  { %v2039_v9 = vpop.permute.xlu2 %449 }
 0x254   :  { %520 = vrot.lane.b32.xlu0 %v1921_v59, %s3068_s11  ;;  %361 = vrot.lane.b32.xlu1 %v1921_v59, %s3057_s19  ;;  %s3074_s19 = smov 118  }
 0x255   :  { %548 = vrot.lane.b32.xlu2 %v1921_v59, %s3100_s18 }
 0x256   :  { %v2047_v10 = vpop.permute.xlu0 %463  ;;  %v2049_v11 = vpop.permute.xlu1 %304 }
 0x257   :  { %v2051_v12 = vpop.permute.xlu2 %366 }
 0x25c   :  { %534 = vrot.lane.b32.xlu1 %v1921_v59, %s3076_s14  ;;  %61 = vperm.xlu0 %1686, %v1873_v2   ;;  %s3106_s14 = smov 125  }
 0x25d   :  { %285 = vrot.lane.b32.xlu2 %v1921_v59, %s3078_s17  ;;  %s3109_s17 = smov 117  }
 0x25e   :  { %v2057_v13 = vpop.permute.xlu0 %380  ;;  %v2059_v14 = vpop.permute.xlu1 %456 }
 0x25f   :  { %v2061_v15 = vpop.permute.xlu2 %539 }
 0x264   :  { %525 = vrot.lane.b32.xlu1 %v1913_v57, %s3074_s19 }
 0x265   :  { %437 = vrot.lane.b32.xlu2 %v1921_v59, %s3070_s13  ;;  %s3111_s13 = smov 7  }
 0x266   :  { %v2067_v17 = vpop.permute.xlu0 %553  ;;  %v2069_v18 = vpop.permute.xlu1 %373 }
 0x267   :  { %v2071_v19 = vpop.permute.xlu2 %435 }
 0x26c   :  { %57 = vperm.xlu1 %1685, %v1882_v5  }
 0x26d   :  { %527 = vrot.lane.b32.xlu2 %v1921_v59, %s3074_s19  ;;  %s3107_s19 = smov 14  }
 0x26e   :  { %v2079_v22 = vpop.permute.xlu0 %290  ;;  %v2081_v23 = vpop.permute.xlu1 %546 }
 0x26f   :  { %v487_v24 = vpop.permute.xlu2 %486 }
 0x270   :  { %1529 = vmatpush.msk.msra.mxu3 %vm488_vm14, %v487_v24 }
 0x272   :  { %1530 = vmatpush.msk.msra.mxu3 %vm488_vm14, %v485_v60  ;;  %v2254_v60 = vld [vmem:[%s3036_s2 + $0x10] sm:$0xff] }
 0x275   :  { %518 = vrot.lane.b32.xlu2 %v1913_v57, %s3068_s11  ;;  %s3110_s11 = smov 124  }
 0x276   :  { %v2090_v25 = vpop.permute.xlu0 %442  ;;  %v2092_v26 = vpop.permute.xlu1 %283 }
 0x277   :  { %v404_v27 = vpop.permute.xlu2 %403 }
 0x278   :  { %1515 = vmatpush.msk.msra.mxu2 %vm405_vm15, %v404_v27 }
 0x27a   :  { %1516 = vmatpush.msk.msra.mxu2 %vm405_vm15, %v402_v63  ;;  %v2281_v63 = vld [vmem:[%s3036_s2 + $0x30] sm:$0xff] }
 0x27e   :  { %v2099_v28 = vpop.permute.xlu0 %359  ;;  %v2101_v29 = vpop.permute.xlu1 %532 }
 0x27f   :  { %v480_v30 = vpop.permute.xlu2 %479 }
 0x280   :  { %1531 = vmatpush.msk.msra.mxu3 %vm481_vm0, %v480_v30 }
 0x282   :  { %1532 = vmatpush.msk.msra.mxu3 %vm481_vm0, %v478_v4 }
 0x286   :  { %v2109_v31 = vpop.permute.xlu0 %276  ;;  %v328_v32 = vpop.permute.xlu1 %327 }
 0x287   :  { %v397_v33 = vpop.permute.xlu2 %396  ;;  %1499 = vmatpush.msk.msra.mxu1 %vm329_vm1, %v328_v32 }
 0x288   :  { %1517 = vmatpush.msk.msra.mxu2 %vm398_vm2, %v397_v33 }
 0x289   :  { %1500 = vmatpush.msk.msra.mxu1 %vm329_vm1, %v326_v0 }
 0x28a   :  { %1518 = vmatpush.msk.msra.mxu2 %vm398_vm2, %v2001_v61  ;;  %v2266_v61 = vld [vmem:[%s3036_s2 + $0x8] sm:$0xff] }
 0x28e   :  { %v314_v34 = vpop.permute.xlu0 %313  ;;  %v321_v35 = vpop.permute.xlu1 %320 }
 0x28f   :  { %v390_v36 = vpop.permute.xlu2 %389  ;;  %1501 = vmatpush.msk.msra.mxu1 %vm322_vm3, %v321_v35 }
 0x290   :  { %1519 = vmatpush.msk.msra.mxu2 %vm391_vm4, %v390_v36 }
 0x291   :  { %1502 = vmatpush.msk.msra.mxu1 %vm322_vm3, %v2025_v3 }
 0x292   :  { %1520 = vmatpush.msk.msra.mxu2 %vm391_vm4, %v2009_v62  ;;  %v2271_v62 = vld [vmem:[%s3036_s2 + $0x20] sm:$0xff] }
 0x293   :  { %1503 = vmatpush.msk.msra.mxu1 %vm315_vm5, %v314_v34 }
 0x295   :  { %1504 = vmatpush.msk.msra.mxu1 %vm315_vm5, %v2035_v7  ;;  %v2307_v7 = vld [vmem:[%s3036_s2 + $0x18] sm:$0xff] }
 0x296   :  { %v563_v37 = vpop.permute.xlu0 %562  ;;  %v473_v38 = vpop.permute.xlu1 %472 }
 0x297   :  { %v307_v39 = vpop.permute.xlu2 %306  ;;  %1533 = vmatpush.msk.msra.mxu3 %vm3061_vm6, %v473_v38  ;;  %1545 = vmatpush.msk.msrb.mxu0 %vm3090_vm7, %v563_v37 }
 0x298   :  { %1505 = vmatpush.msk.msra.mxu1 %vm308_vm8, %v307_v39 }
 0x299   :  { %1534 = vmatpush.msk.msra.mxu3 %vm3061_vm6, %v2037_v8  ;;  %1546 = vmatpush.msk.msrb.mxu0 %vm3090_vm7, %v2017_v1  ;;  %vm3065_vm6 = vcmp.lt.s32.totalorder %v2074_v21, 114  ;;  %v2290_v1 = vld [vmem:[%s3036_s2 + $0x28] sm:$0xff] }
 0x29a   :  { %1506 = vmatpush.msk.msra.mxu1 %vm308_vm8, %v2049_v11 }
 0x29e   :  { %v300_v40 = vpop.permute.xlu0 %299  ;;  %v466_v41 = vpop.permute.xlu1 %465 }
 0x29f   :  { %v459_v42 = vpop.permute.xlu2 %458  ;;  %1507 = vmatpush.msk.msra.mxu1 %vm301_vm9, %v300_v40  ;;  %1535 = vmatpush.msk.msra.mxu3 %vm3059_vm10, %v466_v41 }
 0x2a1   :  { %1508 = vmatpush.msk.msra.mxu1 %vm301_vm9, %v2027_v6  ;;  %1536 = vmatpush.msk.msra.mxu3 %vm3059_vm10, %v2047_v10  ;;  %vm3063_vm10 = vcmp.ge.s32.totalorder %v2074_v21, 5 }
 0x2a3   :  { %1537 = vmatpush.msk.msra.mxu3 %vm3060_vm11, %v459_v42 }
 0x2a5   :  { %1538 = vmatpush.msk.msra.mxu3 %vm3060_vm11, %v2059_v14  ;;  %vm3067_vm11 = vcmp.ge.s32.totalorder %v2074_v21, 6 }
 0x2a6   :  { %v452_v43 = vpop.permute.xlu0 %451  ;;  %v383_v44 = vpop.permute.xlu1 %382 }
 0x2a7   :  { %v376_v45 = vpop.permute.xlu2 %375  ;;  %1521 = vmatpush.msk.msra.mxu2 %vm3064_vm12, %v383_v44  ;;  %1539 = vmatpush.msk.msra.mxu3 %vm3062_vm13, %v452_v43 }
 0x2a9   :  { %1522 = vmatpush.msk.msra.mxu2 %vm3064_vm12, %v2057_v13  ;;  %1540 = vmatpush.msk.msra.mxu3 %vm3062_vm13, %v2039_v9  ;;  %vm3066_vm13 = vcmp.lt.s32.totalorder %v2074_v21, 115  ;;  %vm3072_vm12 = vcmp.lt.s32.totalorder %v2074_v21, 116  ;;  %v2315_v9 = vld [vmem:[%s3036_s2 + $0x38] sm:$0xff]  ;;  %s3105_s2 = smov 15  }
 0x2ab   :  { %1523 = vmatpush.msk.msra.mxu2 %vm3063_vm10, %v376_v45 }
 0x2ad   :  { %1524 = vmatpush.msk.msra.mxu2 %vm3063_vm10, %v2069_v18  ;;  %vm3089_vm10 = vcmp.ge.s32.totalorder %v2074_v21, 13 }
 0x2ae   :  { %v369_v46 = vpop.permute.xlu0 %368  ;;  %v556_v48 = vpop.permute.xlu1 %555 }
 0x2af   :  { %v549_v49 = vpop.permute.xlu2 %548  ;;  %1525 = vmatpush.msk.msra.mxu2 %vm3067_vm11, %v369_v46  ;;  %1547 = vmatpush.msk.msrb.mxu0 %vm3065_vm6, %v556_v48 }
 0x2b1   :  { %1526 = vmatpush.msk.msra.mxu2 %vm3067_vm11, %v2051_v12  ;;  %1548 = vmatpush.msk.msrb.mxu0 %vm3065_vm6, %v2067_v17  ;;  %vm3073_vm6 = vcmp.ge.s32.totalorder %v2074_v21, 14  ;;  %vm3083_vm11 = vcmp.lt.s32.totalorder %v2074_v21, 126 }
 0x2b3   :  { %1549 = vmatpush.msk.msrb.mxu0 %vm3066_vm13, %v549_v49 }
 0x2b5   :  { %1550 = vmatpush.msk.msrb.mxu0 %vm3066_vm13, %v2081_v23  ;;  %vm3088_vm13 = vcmp.ge.s32.totalorder %v2074_v21, 15 }
 0x2b6   :  { %v542_v51 = vpop.permute.xlu0 %541  ;;  %v293_v52 = vpop.permute.xlu1 %292 }
 0x2b7   :  { %1509 = vmatpush.msk.msra.mxu1 %vm3089_vm10, %v293_v52  ;;  %1551 = vmatpush.msk.msrb.mxu0 %vm3072_vm12, %v542_v51  ;;  %v286_v53 = vpop.permute.xlu2 %285 }
 0x2b9   :  { %1510 = vmatpush.msk.msra.mxu1 %vm3089_vm10, %v2079_v22  ;;  %1552 = vmatpush.msk.msrb.mxu0 %vm3072_vm12, %v2061_v15  ;;  %vm3082_vm12 = vcmp.lt.s32.totalorder %v2074_v21, 127 }
 0x2bb   :  { %1511 = vmatpush.msk.msra.mxu1 %vm3073_vm6, %v286_v53 }
 0x2bd   :  { %1512 = vmatpush.msk.msra.mxu1 %vm3073_vm6, %v2092_v26  ;;  %vm3084_vm6 = vcmp.ge.s32.totalorder %v2074_v21, 7 }
 0x2be   :  { %v279_v55 = vpop.permute.xlu0 %278  ;;  %v445_v56 = vpop.permute.xlu1 %444 }
 0x2bf   :  { %1513 = vmatpush.msk.msra.mxu1 %vm3088_vm13, %v279_v55  ;;  %1541 = vmatpush.msk.msra.mxu3 %vm3083_vm11, %v445_v56  ;;  %v438_v5 = vpop.permute.xlu2 %437 }
 0x2c1   :  { %1514 = vmatpush.msk.msra.mxu1 %vm3088_vm13, %v2109_v31  ;;  %1542 = vmatpush.msk.msra.mxu3 %vm3083_vm11, %v2090_v25  ;;  %vm3086_vm11 = vcmp.lt.s32.totalorder %v2074_v21, 118 }
 0x2c2   :  { %350 = vmatmul.f32.vlgmr.msra.gmra.mxu1 %v2238_v58 }
 0x2c3   :  { %1543 = vmatpush.msk.msra.mxu3 %vm3082_vm12, %v438_v5 }
 0x2c5   :  { %1544 = vmatpush.msk.msra.mxu3 %vm3082_vm12, %v2071_v19  ;;  %vm3087_vm12 = vcmp.lt.s32.totalorder %v2074_v21, 117 }
 0x2c6   :  { %v362_v2 = vpop.permute.xlu1 %361  ;;  %509 = vmatmul.f32.vlgmr.msra.gmra.mxu3 %v2254_v60  ;;  %v521_v6 = vpop.permute.xlu0 %520 }
 0x2c7   :  { %1527 = vmatpush.msk.msra.mxu2 %vm3084_vm6, %v362_v2  ;;  %v528_v3 = vpop.permute.xlu2 %527 }
 0x2c9   :  { %1528 = vmatpush.msk.msra.mxu2 %vm3084_vm6, %v2099_v28  ;;  %vm3085_vm6 = vcmp.lt.s32.totalorder %v2074_v21, 119 }
 0x2ca   :  { %426 = vmatmul.f32.vlgmr.msra.gmra.mxu2 %v2266_v61  ;;  %353 = vmatmul.f32.gmra.mxu1 %v2271_v62 }
 0x2ce   :  { %v535_v0 = vpop.permute.xlu1 %534  ;;  %512 = vmatmul.f32.gmra.mxu3 %v2281_v63  ;;  %v2321_v17 = vpop.permute.xlu0 %61 }
 0x2cf   :  { %1553 = vmatpush.msk.msrb.mxu0 %vm3087_vm12, %v535_v0  ;;  %v519_v8 = vpop.permute.xlu2 %518 }
 0x2d1   :  { %1554 = vmatpush.msk.msrb.mxu0 %vm3087_vm12, %v2101_v29 }
 0x2d2   :  { %429 = vmatmul.f32.gmra.mxu2 %v2290_v1 }
 0x2d3   :  { %1555 = vmatpush.msk.msrb.mxu0 %vm3086_vm11, %v528_v3 }
 0x2d6   :  { %v526_v4 = vpop.permute.xlu1 %525 }
 0x2d7   :  { %1556 = vmatpush.msk.msrb.mxu0 %vm3086_vm11, %v526_v4 }
 0x2d9   :  { %1557 = vmatpush.msk.msrb.mxu0 %vm3085_vm6, %v521_v6 }
 0x2db   :  { %1558 = vmatpush.msk.msrb.mxu0 %vm3085_vm6, %v519_v8 }
 0x2dc   :  { %585 = vmatmul.f32.vlgmr.msrb.gmra.mxu0 %v2307_v7 }
 0x2de   :  { %v2318_v11 = vpop.permute.xlu1 %57 }
 0x2e4   :  { %588 = vmatmul.f32.gmra.mxu0 %v2315_v9 }
 0x33f   :  { %v351_v10 = vpop.f32.mrf.mxu1 }
 0x340   :  { %v357_v13 = vadd.f32 %v351_v10, %v2318_v11 }
 0x347   :  { %v354_v18 = vpop.f32.mrf.mxu1 }
 0x348   :  { %v358_v22 = vadd.f32 %v354_v18, %v2321_v17 }
 0x349   :  { %v510_v14 = vpop.f32.mrf.mxu3 }
 0x34d   :  { %v427_v12 = vpop.f32.mrf.mxu2 }
 0x34e   :  { %v433_v15 = vadd.f32 %v427_v12, %v357_v13 }
 0x350   :  { %v516_v19 = vadd.f32 %v510_v14, %v433_v15 }
 0x351   :  { %v513_v27 = vpop.f32.mrf.mxu3 }
 0x355   :  { %v430_v23 = vpop.f32.mrf.mxu2 }
 0x356   :  { %v434_v26 = vadd.f32 %v430_v23, %v358_v22 }
 0x358   :  { %v517_v29 = vadd.f32 %v513_v27, %v434_v26 }
 0x359   :  { %v586_v24 = vpop.f32.mrf.mxu0 }
 0x35a   :  { %v592_v25 = vadd.f32 %v586_v24, %v516_v19 }
 0x35c   :  { %594 = vadd.xlane.f32.xlu2 %v592_v25  ;;  %v600_v28 = vmul.f32 %v592_v25, %v592_v25 }
 0x35e   :  { %602 = vadd.xlane.f32.xlu1 %v600_v28 }
 0x361   :  { %v589_v30 = vpop.f32.mrf.mxu0 }
 0x362   :  { %v593_v31 = vadd.f32 %v589_v30, %v517_v29 }
 0x364   :  { %596 = vadd.xlane.f32.xlu0 %v593_v31  ;;  %v601_v32 = vmul.f32 %v593_v31, %v593_v31 }
 0x366   :  { %604 = vadd.xlane.f32.xlu2 %v601_v32 }
 0x3cf   :  { %v595_v33 = vpop.xlane.xlu2 %594 }
 0x3d0   :  { %v598_v34 = vmul.f32 %v595_v33, %v1885_v20 }
 0x3d1   :  { %v603_v35 = vpop.xlane.xlu1 %602 }
 0x3d2   :  { %v608_v36 = vmul.f32 %v598_v34, %v598_v34  ;;  %v606_v37 = vmul.f32 %v603_v35, %v1885_v20  ;;  %v614_v2 = vsub.f32 %v592_v25, %v598_v34 }
 0x3d4   :  { %v610_v38 = vsub.f32 %v606_v37, %v608_v36 }
 0x3d6   :  { %v612_v39 = vmax.f32 %v610_v38, 0.0 }
 0x3d7   :  { %v597_v40 = vpop.xlane.xlu0 %596 }
 0x3d8   :  { %v616_v41 = vadd.f32 1e-05, %v612_v39  ;;  %v599_v42 = vmul.f32 %v597_v40, %v1885_v20 }
 0x3d9   :  { %v605_v43 = vpop.xlane.xlu2 %604 }
 0x3da   :  { %1712 = vrsqrt.f32 %v616_v41  ;;  %v609_v44 = vmul.f32 %v599_v42, %v599_v42  ;;  %v607_v45 = vmul.f32 %v605_v43, %v1885_v20  ;;  %vm624_vm11 = vweird.f32 %v616_v41 }
 0x3db   :  { %v615_v18 = vsub.f32 %v593_v31, %v599_v42 }
 0x3dc   :  { %v611_v46 = vsub.f32 %v607_v45, %v609_v44  ;;  %v2353_v44 = vld [vmem:[%s3037_s3 + $0x150] sm:$0xff]  ;;  %v2365_v45 = vld [vmem:[%s3037_s3 + $0x120] sm:$0xff] }
 0x3de   :  { %v613_v48 = vmax.f32 %v611_v46, 0.0  ;;  %v2371_v46 = vld [vmem:[%s3037_s3 + $0x108] sm:$0xff] }
 0x3e0   :  { %v1713_v49 = vpop.eup %1712  ;;  %v617_v52 = vadd.f32 1e-05, %v613_v48  ;;  %v2377_v48 = vld [vmem:[%s3037_s3 + $0xf0] sm:$0xff] }
 0x3e1   :  { %v619_v51 = vmul.f32 %v1713_v49, %v616_v41  ;;  %vm625_vm6 = vweird.f32 %v1713_v49 }
 0x3e2   :  { %1714 = vrsqrt.f32 %v617_v52  ;;  %vm626_vm12 = vmor %vm624_vm11, %vm625_vm6  ;;  %vm634_vm13 = vweird.f32 %v617_v52 }
 0x3e3   :  { %v620_v53 = vmul.f32 %v1713_v49, %v619_v51  ;;  %v2389_v51 = vld [vmem:[%s3037_s3 + $0xc0] sm:$0xff] }
 0x3e5   :  { %v621_v54 = vmul.f32 0.5, %v620_v53  ;;  %v2401_v53 = vld [vmem:[%s3037_s3 + $0x90] sm:$0xff] }
 0x3e7   :  { %v622_v55 = vsub.f32 1.5, %v621_v54  ;;  %v2407_v54 = vld [vmem:[%s3037_s3 + $0x78] sm:$0xff] }
 0x3e8   :  { %v1715_v56 = vpop.eup %1714 }
 0x3e9   :  { %v623_v5 = vmul.f32 %v1713_v49, %v622_v55  ;;  %v629_v0 = vmul.f32 %v1715_v56, %v617_v52  ;;  %vm635_vm10 = vweird.f32 %v1715_v56  ;;  %v2395_v52 = vld [vmem:[%s3037_s3 + $0xa8] sm:$0xff]  ;;  %v2413_v55 = vld [vmem:[%s3037_s3 + $0x60] sm:$0xff] }
 0x3ea   :  { %vm636_vm7 = vmor %vm634_vm13, %vm635_vm10 }
 0x3eb   :  { %v627_v3 = vsel %vm626_vm12, %v1713_v49, %v623_v5  ;;  %v630_v6 = vmul.f32 %v1715_v56, %v629_v0  ;;  %v2383_v49 = vld [vmem:[%s3037_s3 + $0xd8] sm:$0xff]  ;;  %v2425_v5 = vld [vmem:[%s3037_s3 + $0x30] sm:$0xff] }
 0x3ec   :  { %v638_v4 = vmul.f32 %v627_v3, %v614_v2  ;;  %v2431_v0 = vld [vmem:[%s3037_s3 + $0x18] sm:$0xff] }
 0x3ed   :  { %v631_v10 = vmul.f32 0.5, %v630_v6 }
 0x3ee   :  { %v640_v8 = vmul.f32 %v1904_v47, %v638_v4  ;;  %v2438_v4 = vld [vmem:[%s3037_s3] sm:$0xff] }
 0x3ef   :  { %v632_v12 = vsub.f32 1.5, %v631_v10 }
 0x3f0   :  { %v642_v13 = vadd.f32 %v1909_v50, %v640_v8 }
 0x3f1   :  { %v633_v14 = vmul.f32 %v1715_v56, %v632_v12 }
 0x3f2   :  { %v644_v15 = vmul.f32 %v642_v13, %v642_v13 }
 0x3f3   :  { %v637_v19 = vsel %vm636_vm7, %v1715_v56, %v633_v14  ;;  %v2419_v56 = vld [vmem:[%s3037_s3 + $0x48] sm:$0xff] }
 0x3f4   :  { %v646_v22 = vmul.f32 %v644_v15, %v642_v13  ;;  %v639_v23 = vmul.f32 %v637_v19, %v615_v18 }
 0x3f6   :  { %v648_v24 = vmul.f32 0.044715, %v646_v22  ;;  %v641_v25 = vmul.f32 %v1904_v47, %v639_v23 }
 0x3f8   :  { %v650_v26 = vadd.f32 %v648_v24, %v642_v13  ;;  %v643_v27 = vadd.f32 %v1909_v50, %v641_v25 }
 0x3fa   :  { %v652_v28 = vmul.f32 0.7978846, %v650_v26  ;;  %v645_v29 = vmul.f32 %v643_v27, %v643_v27 }
 0x3fc   :  { %1716 = vtanh.f32 %v652_v28  ;;  %v647_v30 = vmul.f32 %v645_v29, %v643_v27 }
 0x3fe   :  { %v649_v32 = vmul.f32 0.044715, %v647_v30 }
 0x400   :  { %v651_v33 = vadd.f32 %v649_v32, %v643_v27 }
 0x402   :  { %v1717_v34 = vpop.eup %1716  ;;  %v653_v36 = vmul.f32 0.7978846, %v651_v33 }
 0x403   :  { %v656_v35 = vadd.f32 1.0, %v1717_v34 }
 0x404   :  { %1718 = vtanh.f32 %v653_v36 }
 0x405   :  { %v658_v37 = vmul.f32 0.5, %v656_v35 }
 0x407   :  { %v660_v31 = vmul.f32 %v658_v37, %v642_v13  ;;  %v2448_v37 = vld [vmem:[%s3039_s5 + $0x4] ss:$0 sm:$0xff] }
 0x408   :  { %3101 = vst [vmem:[#allocation5_spill] sm:$0xff] %v2448_v37 }
 0x409   :  { %v2333_v38 = vadd.f32 %v660_v31, %v1913_v57  ;;  %v2347_v57 = vld [vmem:[%s3037_s3 + $0x168] sm:$0xff] }
 0x40a   :  { %v1719_v39 = vpop.eup %1718  ;;  %714 = vmatpush.msrb.mxu1 %v2347_v57 }
 0x40b   :  { %664 = vadd.xlane.f32.xlu1 %v2333_v38  ;;  %v670_v47 = vmul.f32 %v2333_v38, %v2333_v38  ;;  %v657_v50 = vadd.f32 1.0, %v1719_v39 }
 0x40c   :  { %715 = vmatpush.msrb.mxu1 %v2353_v44 }
 0x40d   :  { %672 = vadd.xlane.f32.xlu2 %v670_v47  ;;  %v659_v40 = vmul.f32 0.5, %v657_v50  ;;  %v2453_v47 = vld [vmem:[%s3039_s5 + $0x5] ss:$0 sm:$0xff] }
 0x40e   :  { %3102 = vst [vmem:[#allocation6_spill] sm:$0xff] %v2453_v47 }
 0x40f   :  { %v661_v41 = vmul.f32 %v659_v40, %v643_v27 }
 0x411   :  { %v2339_v42 = vadd.f32 %v661_v41, %v1921_v59  ;;  %v2359_v59 = vld [vmem:[%s3037_s3 + $0x138] sm:$0xff] }
 0x412   :  { %716 = vmatpush.msrb.mxu1 %v2359_v59 }
 0x413   :  { %666 = vadd.xlane.f32.xlu1 %v2339_v42  ;;  %v671_v43 = vmul.f32 %v2339_v42, %v2339_v42 }
 0x414   :  { %717 = vmatpush.msrb.mxu1 %v2365_v45 }
 0x415   :  { %674 = vadd.xlane.f32.xlu0 %v671_v43 }
 0x416   :  { %718 = vmatpush.msrb.mxu1 %v2371_v46 }
 0x418   :  { %719 = vmatpush.msrb.mxu1 %v2377_v48 }
 0x41a   :  { %720 = vmatpush.msrb.mxu1 %v2383_v49 }
 0x41c   :  { %721 = vmatpush.msrb.mxu1 %v2389_v51 }
 0x41e   :  { %722 = vmatpush.msrb.mxu1 %v2395_v52 }
 0x420   :  { %723 = vmatpush.msrb.mxu1 %v2401_v53 }
 0x422   :  { %724 = vmatpush.msrb.mxu1 %v2407_v54 }
 0x424   :  { %725 = vmatpush.msrb.mxu1 %v2413_v55 }
 0x426   :  { %726 = vmatpush.msrb.mxu1 %v2419_v56 }
 0x428   :  { %727 = vmatpush.msrb.mxu1 %v2425_v5 }
 0x42a   :  { %728 = vmatpush.msrb.mxu1 %v2431_v0 }
 0x42c   :  { %729 = vmatpush.msrb.mxu1 %v2438_v4 }
 0x47e   :  { %v665_v2 = vpop.xlane.xlu1 %664 }
 0x47f   :  { %v668_v3 = vmul.f32 %v665_v2, %v1885_v20 }
 0x480   :  { %v673_v6 = vpop.xlane.xlu2 %672 }
 0x481   :  { %v678_v8 = vmul.f32 %v668_v3, %v668_v3  ;;  %v676_v10 = vmul.f32 %v673_v6, %v1885_v20  ;;  %v684_v35 = vsub.f32 %v2333_v38, %v668_v3 }
 0x483   :  { %v680_v12 = vsub.f32 %v676_v10, %v678_v8 }
 0x485   :  { %v682_v13 = vmax.f32 %v680_v12, 0.0 }
 0x486   :  { %v667_v15 = vpop.xlane.xlu1 %666 }
 0x487   :  { %v686_v14 = vadd.f32 1e-05, %v682_v13  ;;  %v669_v18 = vmul.f32 %v667_v15, %v1885_v20  ;;  %v2463_v13 = vld [vmem:[%s3039_s5 + $0x6] ss:$0 sm:$0xff] }
 0x488   :  { %v675_v19 = vpop.xlane.xlu0 %674  ;;  %3103 = vst [vmem:[#allocation7_spill] sm:$0xff] %v2463_v13 }
 0x489   :  { %1720 = vrsqrt.f32 %v686_v14  ;;  %v679_v22 = vmul.f32 %v669_v18, %v669_v18  ;;  %v677_v23 = vmul.f32 %v675_v19, %v1885_v20  ;;  %vm694_vm7 = vweird.f32 %v686_v14 }
 0x48a   :  { %v685_v3 = vsub.f32 %v2339_v42, %v669_v18 }
 0x48b   :  { %v681_v24 = vsub.f32 %v677_v23, %v679_v22 }
 0x48d   :  { %v683_v25 = vmax.f32 %v681_v24, 0.0 }
 0x48f   :  { %v1721_v26 = vpop.eup %1720  ;;  %v687_v28 = vadd.f32 1e-05, %v683_v25 }
 0x490   :  { %v689_v27 = vmul.f32 %v1721_v26, %v686_v14  ;;  %vm695_vm6 = vweird.f32 %v1721_v26 }
 0x491   :  { %1722 = vrsqrt.f32 %v687_v28  ;;  %vm696_vm10 = vmor %vm694_vm7, %vm695_vm6  ;;  %vm704_vm12 = vweird.f32 %v687_v28 }
 0x492   :  { %v690_v29 = vmul.f32 %v1721_v26, %v689_v27 }
 0x494   :  { %v691_v30 = vmul.f32 0.5, %v690_v29 }
 0x496   :  { %v692_v32 = vsub.f32 1.5, %v691_v30 }
 0x497   :  { %v1723_v33 = vpop.eup %1722 }
 0x498   :  { %v693_v34 = vmul.f32 %v1721_v26, %v692_v32  ;;  %v699_v36 = vmul.f32 %v1723_v33, %v687_v28  ;;  %vm705_vm11 = vweird.f32 %v1723_v33 }
 0x499   :  { %vm706_vm13 = vmor %vm704_vm12, %vm705_vm11 }
 0x49a   :  { %v697_v31 = vsel %vm696_vm10, %v1721_v26, %v693_v34  ;;  %v700_v39 = vmul.f32 %v1723_v33, %v699_v36 }
 0x49b   :  { %v708_v50 = vmul.f32 %v697_v31, %v684_v35 }
 0x49c   :  { %v701_v40 = vmul.f32 0.5, %v700_v39 }
 0x49d   :  { %v710_v41 = vmul.f32 %v2448_v37, %v708_v50 }
 0x49e   :  { %v702_v43 = vsub.f32 1.5, %v701_v40 }
 0x49f   :  { %v712_v38 = vadd.f32 %v2453_v47, %v710_v41 }
 0x4a0   :  { %v703_v2 = vmul.f32 %v1723_v33, %v702_v43 }
 0x4a1   :  { %730 = vmatmul.f32.vlgmr.msrb.gmra.mxu1 %v712_v38 }
 0x4a2   :  { %v707_v6 = vsel %vm706_vm13, %v1723_v33, %v703_v2 }
 0x4a3   :  { %v709_v8 = vmul.f32 %v707_v6, %v685_v3 }
 0x4a5   :  { %v711_v10 = vmul.f32 %v2448_v37, %v709_v8 }
 0x4a7   :  { %v713_v12 = vadd.f32 %v2453_v47, %v711_v10 }
 0x4a9   :  { %733 = vmatmul.f32.gmra.mxu1 %v713_v12 }
 0x51e   :  { %v731_v14 = vpop.f32.mrf.mxu1 }
 0x51f   :  { %v732_v15 = vadd.f32 %v2463_v13, %v731_v14 }
 0x521   :  { %v737_v19 = vmul.f32 %v732_v15, %v732_v15 }
 0x523   :  { %v739_v22 = vmul.f32 %v737_v19, %v732_v15 }
 0x525   :  { %v741_v23 = vmul.f32 0.044715, %v739_v22 }
 0x526   :  { %v734_v18 = vpop.f32.mrf.mxu1 }
 0x527   :  { %v743_v42 = vadd.f32 %v741_v23, %v732_v15  ;;  %v735_v24 = vadd.f32 %v2463_v13, %v734_v18 }
 0x529   :  { %v745_v25 = vmul.f32 0.7978846, %v743_v42  ;;  %v738_v26 = vmul.f32 %v735_v24, %v735_v24 }
 0x52b   :  { %1724 = vtanh.f32 %v745_v25  ;;  %v740_v27 = vmul.f32 %v738_v26, %v735_v24 }
 0x52d   :  { %v742_v28 = vmul.f32 0.044715, %v740_v27 }
 0x52f   :  { %v744_v29 = vadd.f32 %v742_v28, %v735_v24 }
 0x531   :  { %v1725_v30 = vpop.eup %1724  ;;  %v746_v32 = vmul.f32 0.7978846, %v744_v29 }
 0x532   :  { %v749_v33 = vadd.f32 1.0, %v1725_v30 }
 0x533   :  { %1726 = vtanh.f32 %v746_v32 }
 0x534   :  { %v751_v34 = vmul.f32 0.5, %v749_v33 }
 0x536   :  { %v753_v35 = vmul.f32 %v751_v34, %v732_v15 }
 0x538   :  { %v755_v36 = vadd.f32 %v753_v35, %v712_v38 }
 0x539   :  { %v1727_v31 = vpop.eup %1726 }
 0x53a   :  { %757 = vadd.xlane.f32.xlu1 %v755_v36  ;;  %v763_v39 = vmul.f32 %v755_v36, %v755_v36  ;;  %v750_v50 = vadd.f32 1.0, %v1727_v31 }
 0x53c   :  { %765 = vadd.xlane.f32.xlu2 %v763_v39  ;;  %v752_v40 = vmul.f32 0.5, %v750_v50 }
 0x53e   :  { %v754_v41 = vmul.f32 %v752_v40, %v735_v24 }
 0x540   :  { %v756_v43 = vadd.f32 %v754_v41, %v713_v12  ;;  %v2474_v41 = vld [vmem:[%s3039_s5 + $0x2] ss:$0 sm:$0xff] }
 0x542   :  { %v764_v2 = vmul.f32 %v756_v43, %v756_v43 }
 0x544   :  { %759 = vadd.xlane.f32.xlu2 %v756_v43  ;;  %767 = vadd.xlane.f32.xlu0 %v764_v2 }
 0x5ad   :  { %v758_v3 = vpop.xlane.xlu1 %757 }
 0x5ae   :  { %v761_v6 = vmul.f32 %v758_v3, %v1885_v20 }
 0x5af   :  { %v766_v8 = vpop.xlane.xlu2 %765 }
 0x5b0   :  { %v771_v10 = vmul.f32 %v761_v6, %v761_v6  ;;  %v769_v14 = vmul.f32 %v766_v8, %v1885_v20  ;;  %v777_v35 = vsub.f32 %v755_v36, %v761_v6  ;;  %v2480_v8 = vld [vmem:[%s3039_s5 + $0x3] ss:$0 sm:$0xff]  ;;  %s3104_s5 = smov 123  }
 0x5b2   :  { %v773_v15 = vsub.f32 %v769_v14, %v771_v10 }
 0x5b4   :  { %v775_v38 = vmax.f32 %v773_v15, 0.0 }
 0x5b6   :  { %v779_v19 = vadd.f32 1e-05, %v775_v38 }
 0x5b7   :  { %v760_v22 = vpop.xlane.xlu2 %759  ;;  %v768_v23 = vpop.xlane.xlu0 %767 }
 0x5b8   :  { %1728 = vrsqrt.f32 %v779_v19  ;;  %v762_v42 = vmul.f32 %v760_v22, %v1885_v20  ;;  %v770_v12 = vmul.f32 %v768_v23, %v1885_v20  ;;  %vm787_vm7 = vweird.f32 %v779_v19 }
 0x5ba   :  { %v772_v18 = vmul.f32 %v762_v42, %v762_v42  ;;  %v778_v14 = vsub.f32 %v756_v43, %v762_v42 }
 0x5bc   :  { %v774_v24 = vsub.f32 %v770_v12, %v772_v18 }
 0x5be   :  { %v1729_v25 = vpop.eup %1728  ;;  %v776_v26 = vmax.f32 %v774_v24, 0.0 }
 0x5bf   :  { %v782_v27 = vmul.f32 %v1729_v25, %v779_v19  ;;  %vm788_vm6 = vweird.f32 %v1729_v25 }
 0x5c0   :  { %v780_v28 = vadd.f32 1e-05, %v776_v26  ;;  %vm789_vm10 = vmor %vm787_vm7, %vm788_vm6  ;;  %vm3125_vm6 = vcmp.ge.s32.totalorder %v2074_v21, 14 }
 0x5c1   :  { %v783_v29 = vmul.f32 %v1729_v25, %v782_v27  ;;  %vm3126_vm7 = vmmov %vm3125_vm6 }
 0x5c2   :  { %1730 = vrsqrt.f32 %v780_v28  ;;  %vm797_vm12 = vweird.f32 %v780_v28 }
 0x5c3   :  { %v784_v30 = vmul.f32 0.5, %v783_v29 }
 0x5c5   :  { %v785_v32 = vsub.f32 1.5, %v784_v30 }
 0x5c7   :  { %v786_v33 = vmul.f32 %v1729_v25, %v785_v32 }
 0x5c8   :  { %v1731_v34 = vpop.eup %1730 }
 0x5c9   :  { %v790_v31 = vsel %vm789_vm10, %v1729_v25, %v786_v33  ;;  %v792_v39 = vmul.f32 %v1731_v34, %v780_v28  ;;  %vm798_vm11 = vweird.f32 %v1731_v34  ;;  %vm3127_vm10 = vcmp.ge.s32.totalorder %v2074_v21, 6 }
 0x5ca   :  { %v801_v50 = vmul.f32 %v790_v31, %v777_v35  ;;  %vm799_vm13 = vmor %vm797_vm12, %vm798_vm11  ;;  %vm3128_vm11 = vcmp.lt.s32.totalorder %v2074_v21, 114 }
 0x5cb   :  { %v793_v40 = vmul.f32 %v1731_v34, %v792_v39  ;;  %vm3129_vm12 = vmmov %vm3127_vm10 }
 0x5cc   :  { %v803_v2 = vmul.f32 %v2474_v41, %v801_v50 }
 0x5cd   :  { %v794_v3 = vmul.f32 0.5, %v793_v40 }
 0x5ce   :  { %v2483_v36 = vadd.f32 %v2480_v8, %v803_v2 }
 0x5cf   :  { %v795_v6 = vsub.f32 1.5, %v794_v3 }
 0x5d0   :  { %910 = vrot.lane.b32.xlu2 %v2483_v36, %s1789_s25  ;;  %837 = vrot.lane.b32.xlu1 %v2483_v36, %s1790_s26 }
 0x5d1   :  { %v796_v10 = vmul.f32 %v1731_v34, %v795_v6  ;;  %849 = vrot.lane.b32.xlu0 %v2483_v36, %s1785_s21 }
 0x5d3   :  { %v800_v15 = vsel %vm799_vm13, %v1731_v34, %v796_v10  ;;  %vm3130_vm13 = vmmov %vm3128_vm11 }
 0x5d4   :  { %v802_v38 = vmul.f32 %v800_v15, %v778_v14 }
 0x5d6   :  { %v804_v19 = vmul.f32 %v2474_v41, %v802_v38 }
 0x5d8   :  { %v2493_v22 = vadd.f32 %v2480_v8, %v804_v19  ;;  %904 = vrot.lane.b32.xlu2 %v2483_v36, %s1792_s28  ;;  %831 = vrot.lane.b32.xlu1 %v2483_v36, %s1794_s30 }
 0x5d9   :  { %843 = vrot.lane.b32.xlu0 %v2483_v36, %s1787_s23 }
 0x5da   :  { %922 = vmatpush.msrb.mxu3 %v2493_v22  ;;  %1062 = vmatpush.msra.mxu1 %v2493_v22 }
 0x5dc   :  { %923 = vmatpush.msrb.mxu3 %v2483_v36  ;;  %1063 = vmatpush.msra.mxu1 %v2483_v36 }
 0x5e0   :  { %825 = vrot.lane.b32.xlu2 %v2483_v36, %s1798_s12  ;;  %898 = vrot.lane.b32.xlu1 %v2483_v36, %s1796_s10 }
 0x5e1   :  { %916 = vrot.lane.b32.xlu0 %v2483_v36, %s1784_s20 }
 0x5e8   :  { %1056 = vrot.lane.b32.xlu2 %v2483_v36, %s1795_s9  ;;  %819 = vrot.lane.b32.xlu1 %v2483_v36, %s1802_s6 }
 0x5e9   :  { %989 = vrot.lane.b32.xlu0 %v2483_v36, %s1786_s22 }
 0x5f0   :  { %977 = vrot.lane.b32.xlu2 %v2483_v36, %s1791_s27  ;;  %1050 = vrot.lane.b32.xlu1 %v2483_v36, %s1799_s0 }
 0x5f1   :  { %983 = vrot.lane.b32.xlu0 %v2483_v36, %s1788_s24 }
 0x5f8   :  { %886 = vrot.lane.b32.xlu2 %v2483_v36, %s1804_s15  ;;  %971 = vrot.lane.b32.xlu1 %v2483_v36, %s3104_s5 }
 0x5f9   :  { %892 = vrot.lane.b32.xlu0 %v2483_v36, %s3099_s29 }
 0x600   :  { %807 = vrot.lane.b32.xlu2 %v2483_v36, %s3105_s2  ;;  %959 = vrot.lane.b32.xlu1 %v2483_v36, %s3106_s14 }
 0x601   :  { %813 = vrot.lane.b32.xlu0 %v2483_v36, %s3107_s19 }
 0x608   :  { %1038 = vrot.lane.b32.xlu2 %v2483_v36, %s3108_s16  ;;  %1032 = vrot.lane.b32.xlu1 %v2483_v36, %s3109_s17 }
 0x609   :  { %1044 = vrot.lane.b32.xlu0 %v2483_v36, %s3100_s18 }
 0x610   :  { %953 = vrot.lane.b32.xlu2 %v2483_v36, %s3098_s1  ;;  %851 = vrot.lane.b32.xlu1 %v2493_v22, %s1785_s21  ;;  %s3113_s21 = smov 127  }
 0x611   :  { %965 = vrot.lane.b32.xlu0 %v2483_v36, %s3110_s11 }
 0x618   :  { %845 = vrot.lane.b32.xlu2 %v2493_v22, %s1787_s23  ;;  %918 = vrot.lane.b32.xlu1 %v2493_v22, %s1784_s20  ;;  %s3112_s20 = smov 118  }
 0x619   :  { %880 = vrot.lane.b32.xlu0 %v2483_v36, %s3111_s13 }
 0x620   :  { %839 = vrot.lane.b32.xlu2 %v2493_v22, %s1790_s26  ;;  %833 = vrot.lane.b32.xlu1 %v2493_v22, %s1794_s30 }
 0x621   :  { %991 = vrot.lane.b32.xlu0 %v2493_v22, %s1786_s22  ;;  %s3114_s22 = smov 119  }
 0x628   :  { %912 = vrot.lane.b32.xlu2 %v2493_v22, %s1789_s25  ;;  %827 = vrot.lane.b32.xlu1 %v2493_v22, %s1798_s12 }
 0x629   :  { %985 = vrot.lane.b32.xlu0 %v2493_v22, %s1788_s24 }
 0x62a   :  { %v2565_v43 = vpop.permute.xlu2 %910 }
 0x630   :  { %906 = vrot.lane.b32.xlu2 %v2493_v22, %s1792_s28  ;;  %1058 = vrot.lane.b32.xlu1 %v2493_v22, %s1795_s9 }
 0x631   :  { %900 = vrot.lane.b32.xlu0 %v2493_v22, %s1796_s10 }
 0x632   :  { %v2573_v23 = vpop.permute.xlu2 %904 }
 0x638   :  { %894 = vrot.lane.b32.xlu2 %v2493_v22, %s3099_s29  ;;  %979 = vrot.lane.b32.xlu1 %v2493_v22, %s1791_s27 }
 0x639   :  { %821 = vrot.lane.b32.xlu0 %v2493_v22, %s1802_s6 }
 0x63a   :  { %v2581_v42 = vpop.permute.xlu2 %825 }
 0x640   :  { %815 = vrot.lane.b32.xlu2 %v2493_v22, %s3107_s19  ;;  %888 = vrot.lane.b32.xlu1 %v2493_v22, %s1804_s15 }
 0x641   :  { %1052 = vrot.lane.b32.xlu0 %v2493_v22, %s1799_s0 }
 0x642   :  { %v838_v12 = vpop.permute.xlu1 %837  ;;  %v2589_v18 = vpop.permute.xlu2 %1056 }
 0x643   :  { %v850_v24 = vpop.permute.xlu0 %849 }
 0x648   :  { %1046 = vrot.lane.b32.xlu2 %v2493_v22, %s3100_s18  ;;  %809 = vrot.lane.b32.xlu1 %v2493_v22, %s3105_s2 }
 0x649   :  { %973 = vrot.lane.b32.xlu0 %v2493_v22, %s3104_s5 }
 0x64a   :  { %v832_v25 = vpop.permute.xlu1 %831  ;;  %v2597_v26 = vpop.permute.xlu2 %977 }
 0x64b   :  { %v844_v27 = vpop.permute.xlu0 %843 }
 0x650   :  { %967 = vrot.lane.b32.xlu2 %v2493_v22, %s3110_s11  ;;  %1040 = vrot.lane.b32.xlu1 %v2493_v22, %s3108_s16  ;;  %s1818_s11 = smov [#allocation2]  }
 0x651   :  { %882 = vrot.lane.b32.xlu0 %v2493_v22, %s3111_s13  ;;  %s1486_s13 = sshll.u32 %s1818_s11, 4  ;;  %s1487_s13 = int_to_ptr.vmem [resolvable:$true] %s1486_s13 }
 0x652   :  { %v2605_v28 = vpop.permute.xlu1 %898  ;;  %v2607_v29 = vpop.permute.xlu2 %886 }
 0x653   :  { %v917_v30 = vpop.permute.xlu0 %916 }
 0x658   :  { %1034 = vrot.lane.b32.xlu2 %v2493_v22, %s3109_s17  ;;  %961 = vrot.lane.b32.xlu1 %v2493_v22, %s3106_s14 }
 0x659   :  { %955 = vrot.lane.b32.xlu0 %v2493_v22, %s3098_s1 }
 0x65a   :  { %v2615_v32 = vpop.permute.xlu1 %819  ;;  %v2617_v33 = vpop.permute.xlu2 %807 }
 0x65b   :  { %v990_v34 = vpop.permute.xlu0 %989 }
 0x660   :  { %1026 = vrot.lane.b32.xlu2 %v2483_v36, %s3112_s20  ;;  %949 = vrot.lane.b32.xlu1 %v2493_v22, %s3113_s21 }
 0x661   :  { %1028 = vrot.lane.b32.xlu0 %v2493_v22, %s3112_s20 }
 0x662   :  { %v2625_v35 = vpop.permute.xlu1 %1050  ;;  %v2627_v31 = vpop.permute.xlu2 %1038 }
 0x663   :  { %v984_v39 = vpop.permute.xlu0 %983 }
 0x668   :  { %1020 = vrot.lane.b32.xlu2 %v2483_v36, %s3114_s22  ;;  %1022 = vrot.lane.b32.xlu1 %v2493_v22, %s3114_s22  ;;  %s1488_s22 = sshll.u32 %s3042_s8, 4  ;;  %s1489_s22 = int_to_ptr.hbm [resolvable:$true] %s1488_s22 }
 0x669   :  { %947 = vrot.lane.b32.xlu0 %v2483_v36, %s3113_s21 }
 0x66a   :  { %v2635_v50 = vpop.permute.xlu1 %971  ;;  %v2637_v40 = vpop.permute.xlu2 %953 }
 0x66b   :  { %v893_v2 = vpop.permute.xlu0 %892 }
 0x672   :  { %v2639_v3 = vpop.permute.xlu1 %959  ;;  %v846_v10 = vpop.permute.xlu2 %845 }
 0x673   :  { %v814_v6 = vpop.permute.xlu0 %813 }
 0x67a   :  { %v2641_v14 = vpop.permute.xlu1 %1032  ;;  %v840_v38 = vpop.permute.xlu2 %839 }
 0x67b   :  { %v1045_v15 = vpop.permute.xlu0 %1044 }
 0x682   :  { %v852_v19 = vpop.permute.xlu1 %851  ;;  %v913_v13 = vpop.permute.xlu2 %912 }
 0x683   :  { %v2643_v16 = vpop.permute.xlu0 %965  ;;  %1559 = vmatpush.msk.msrb.mxu2 %vm329_vm1, %v852_v19 }
 0x685   :  { %1560 = vmatpush.msk.msrb.mxu2 %vm329_vm1, %v850_v24 }
 0x687   :  { %1561 = vmatpush.msk.msrb.mxu2 %vm322_vm3, %v846_v10 }
 0x689   :  { %1562 = vmatpush.msk.msrb.mxu2 %vm322_vm3, %v844_v27  ;;  %vm3119_vm3 = vcmp.ge.s32.totalorder %v2074_v21, 5 }
 0x68a   :  { %v919_v47 = vpop.permute.xlu1 %918  ;;  %v907_v24 = vpop.permute.xlu2 %906 }
 0x68b   :  { %v2653_v37 = vpop.permute.xlu0 %880  ;;  %1563 = vmatpush.msk.msrb.mxu2 %vm315_vm5, %v840_v38  ;;  %1575 = vmatpush.msk.msrb.mxu3 %vm405_vm15, %v919_v47 }
 0x68d   :  { %1564 = vmatpush.msk.msrb.mxu2 %vm315_vm5, %v838_v12  ;;  %1576 = vmatpush.msk.msrb.mxu3 %vm405_vm15, %v917_v30  ;;  %vm3116_vm15 = vcmp.ge.s32.totalorder %v2074_v21, 4  ;;  %vm3122_vm5 = vcmp.ge.s32.totalorder %v2074_v21, 13 }
 0x68f   :  { %1577 = vmatpush.msk.msrb.mxu3 %vm398_vm2, %v913_v13 }
 0x691   :  { %1578 = vmatpush.msk.msrb.mxu3 %vm398_vm2, %v2565_v43  ;;  %vm3118_vm2 = vmmov %vm3116_vm15 }
 0x692   :  { %v834_v27 = vpop.permute.xlu1 %833  ;;  %v895_v43 = vpop.permute.xlu2 %894 }
 0x693   :  { %v992_v10 = vpop.permute.xlu0 %991  ;;  %1565 = vmatpush.msk.msrb.mxu2 %vm308_vm8, %v834_v27  ;;  %1579 = vmatpush.msk.msrb.mxu3 %vm391_vm4, %v907_v24 }
 0x694   :  { %1589 = vmatpush.msk.msra.mxu0 %vm488_vm14, %v992_v10 }
 0x695   :  { %1566 = vmatpush.msk.msrb.mxu2 %vm308_vm8, %v832_v25  ;;  %1580 = vmatpush.msk.msrb.mxu3 %vm391_vm4, %v2573_v23  ;;  %vm3121_vm4 = vcmp.lt.s32.totalorder %v2074_v21, 122 }
 0x696   :  { %1590 = vmatpush.msk.msra.mxu0 %vm488_vm14, %v990_v34  ;;  %vm3115_vm14 = vcmp.lt.s32.totalorder %v2074_v21, 113  ;;  %vm3123_vm8 = vmmov %vm3121_vm4 }
 0x697   :  { %vm3117_vm1 = vmmov %vm3115_vm14 }
 0x69a   :  { %v828_v47 = vpop.permute.xlu1 %827 }
 0x69b   :  { %v986_v13 = vpop.permute.xlu0 %985  ;;  %1567 = vmatpush.msk.msrb.mxu2 %vm301_vm9, %v828_v47 }
 0x69c   :  { %1591 = vmatpush.msk.msra.mxu0 %vm481_vm0, %v986_v13 }
 0x69d   :  { %1568 = vmatpush.msk.msrb.mxu2 %vm301_vm9, %v2581_v42  ;;  %v816_v42 = vpop.permute.xlu2 %815  ;;  %vm3124_vm9 = vmmov %vm3122_vm5 }
 0x69e   :  { %1592 = vmatpush.msk.msra.mxu0 %vm481_vm0, %v984_v39  ;;  %vm3120_vm0 = vmmov %vm3119_vm3 }
 0x6a2   :  { %v1059_v23 = vpop.permute.xlu1 %1058 }
 0x6a3   :  { %v901_v12 = vpop.permute.xlu0 %900  ;;  %1605 = vmatpush.msk.msra.mxu1 %vm3115_vm14, %v1059_v23  ;;  %vm3131_vm14 = vcmp.lt.s32.totalorder %v2074_v21, 115 }
 0x6a4   :  { %1581 = vmatpush.msk.msrb.mxu3 %vm3116_vm15, %v901_v12  ;;  %vm3132_vm15 = vmmov %vm3131_vm14 }
 0x6a5   :  { %1606 = vmatpush.msk.msra.mxu1 %vm3117_vm1, %v2589_v18  ;;  %v1047_v18 = vpop.permute.xlu2 %1046  ;;  %vm3133_vm1 = vcmp.ge.s32.totalorder %v2074_v21, 15 }
 0x6a6   :  { %1582 = vmatpush.msk.msrb.mxu3 %vm3118_vm2, %v2605_v28  ;;  %vm3134_vm2 = vcmp.lt.s32.totalorder %v2074_v21, 123 }
 0x6a8   :  { %1583 = vmatpush.msk.msrb.mxu3 %vm3119_vm3, %v895_v43  ;;  %vm3135_vm3 = vmmov %vm3133_vm1 }
 0x6aa   :  { %1584 = vmatpush.msk.msrb.mxu3 %vm3120_vm0, %v893_v2  ;;  %v980_v25 = vpop.permute.xlu1 %979  ;;  %vm3136_vm0 = vmmov %vm3134_vm2 }
 0x6ab   :  { %v822_v30 = vpop.permute.xlu0 %821  ;;  %1593 = vmatpush.msk.msra.mxu0 %vm3121_vm4, %v980_v25  ;;  %vm3137_vm4 = vcmp.lt.s32.totalorder %v2074_v21, 124 }
 0x6ac   :  { %1569 = vmatpush.msk.msrb.mxu2 %vm3122_vm5, %v822_v30  ;;  %vm3138_vm5 = vmmov %vm3137_vm4 }
 0x6ad   :  { %1594 = vmatpush.msk.msra.mxu0 %vm3123_vm8, %v2597_v26  ;;  %v968_v39 = vpop.permute.xlu2 %967  ;;  %vm3139_vm8 = vcmp.lt.s32.totalorder %v2074_v21, 116 }
 0x6ae   :  { %1570 = vmatpush.msk.msrb.mxu2 %vm3124_vm9, %v2615_v32  ;;  %vm3140_vm9 = vcmp.ge.s32.totalorder %v2074_v21, 7 }
 0x6b0   :  { %1571 = vmatpush.msk.msrb.mxu2 %vm3125_vm6, %v816_v42  ;;  %vm3141_vm6 = vmmov %vm3139_vm8 }
 0x6b2   :  { %1572 = vmatpush.msk.msrb.mxu2 %vm3126_vm7, %v814_v6  ;;  %v889_v28 = vpop.permute.xlu1 %888  ;;  %vm3142_vm7 = vmmov %vm3140_vm9 }
 0x6b3   :  { %v1053_v34 = vpop.permute.xlu0 %1052  ;;  %1585 = vmatpush.msk.msrb.mxu3 %vm3127_vm10, %v889_v28  ;;  %vm3143_vm10 = vcmp.lt.s32.totalorder %v2074_v21, 117 }
 0x6b4   :  { %1607 = vmatpush.msk.msra.mxu1 %vm3128_vm11, %v1053_v34  ;;  %vm3144_vm11 = vmmov %vm3143_vm10 }
 0x6b5   :  { %1586 = vmatpush.msk.msrb.mxu3 %vm3129_vm12, %v2607_v29  ;;  %vm3145_vm12 = vcmp.lt.s32.totalorder %v2074_v21, 125 }
 0x6b6   :  { %1608 = vmatpush.msk.msra.mxu1 %vm3130_vm13, %v2625_v35  ;;  %vm3146_vm13 = vmmov %vm3145_vm12 }
 0x6b8   :  { %1609 = vmatpush.msk.msra.mxu1 %vm3131_vm14, %v1047_v18  ;;  %vm3147_vm14 = vcmp.lt.s32.totalorder %v2074_v21, 126 }
 0x6ba   :  { %1610 = vmatpush.msk.msra.mxu1 %vm3132_vm15, %v1045_v15  ;;  %v810_v26 = vpop.permute.xlu1 %809  ;;  %vm3148_vm15 = vmmov %vm3147_vm14 }
 0x6bb   :  { %v974_v32 = vpop.permute.xlu0 %973  ;;  %1573 = vmatpush.msk.msrb.mxu2 %vm3133_vm1, %v810_v26  ;;  %vm3149_vm1 = vcmp.lt.s32.totalorder %v2074_v21, 127 }
 0x6bc   :  { %1595 = vmatpush.msk.msra.mxu0 %vm3134_vm2, %v974_v32  ;;  %vm3150_vm2 = vcmp.lt.s32.totalorder %v2074_v21, 118 }
 0x6bd   :  { %1574 = vmatpush.msk.msrb.mxu2 %vm3135_vm3, %v2617_v33  ;;  %vm3151_vm3 = vmmov %vm3150_vm2 }
 0x6be   :  { %1596 = vmatpush.msk.msra.mxu0 %vm3136_vm0, %v2635_v50  ;;  %871 = vmatmul.f32.vlgmr.msrb.gmra.mxu2 %v2238_v58  ;;  %v1035_v58 = vpop.permute.xlu2 %1034  ;;  %vm3152_vm0 = vcmp.lt.s32.totalorder %v2074_v21, 119 }
 0x6bf   :  { %1207 = vmatpush.msra.mxu2 %v2347_v57 }
 0x6c0   :  { %1597 = vmatpush.msk.msra.mxu0 %vm3137_vm4, %v968_v39  ;;  %vm3153_vm4 = vmmov %vm3149_vm1 }
 0x6c1   :  { %1208 = vmatpush.msra.mxu2 %v2353_v44 }
 0x6c2   :  { %1598 = vmatpush.msk.msra.mxu0 %vm3138_vm5, %v2643_v16  ;;  %v1041_v29 = vpop.permute.xlu1 %1040  ;;  %vm3154_vm5 = vmmov %vm3152_vm0 }
 0x6c3   :  { %v883_v35 = vpop.permute.xlu0 %882  ;;  %1611 = vmatpush.msk.msra.mxu1 %vm3139_vm8, %v1041_v29  ;;  %1209 = vmatpush.msra.mxu2 %v2359_v59 }
 0x6c4   :  { %1587 = vmatpush.msk.msrb.mxu3 %vm3140_vm9, %v883_v35 }
 0x6c5   :  { %1612 = vmatpush.msk.msra.mxu1 %vm3141_vm6, %v2627_v31  ;;  %1210 = vmatpush.msra.mxu2 %v2365_v45 }
 0x6c6   :  { %1588 = vmatpush.msk.msrb.mxu3 %vm3142_vm7, %v2653_v37  ;;  %874 = vmatmul.f32.gmra.mxu2 %v2271_v62 }
 0x6c7   :  { %938 = vmatmul.f32.vlgmr.msrb.gmra.mxu3 %v2266_v61  ;;  %1613 = vmatpush.msk.msra.mxu1 %vm3143_vm10, %v1035_v58  ;;  %v1027_v61 = vpop.permute.xlu2 %1026 }
 0x6c8   :  { %1211 = vmatpush.msra.mxu2 %v2371_v46 }
 0x6c9   :  { %1614 = vmatpush.msk.msra.mxu1 %vm3144_vm11, %v2641_v14 }
 0x6ca   :  { %v962_v16 = vpop.permute.xlu1 %961  ;;  %1212 = vmatpush.msra.mxu2 %v2377_v48 }
 0x6cb   :  { %v956_v57 = vpop.permute.xlu0 %955  ;;  %1599 = vmatpush.msk.msra.mxu0 %vm3145_vm12, %v962_v16 }
 0x6cc   :  { %1213 = vmatpush.msra.mxu2 %v2383_v49 }
 0x6cd   :  { %1600 = vmatpush.msk.msra.mxu0 %vm3146_vm13, %v2639_v3 }
 0x6ce   :  { %1214 = vmatpush.msra.mxu2 %v2389_v51 }
 0x6cf   :  { %941 = vmatmul.f32.gmra.mxu3 %v2290_v1  ;;  %1601 = vmatpush.msk.msra.mxu0 %vm3147_vm14, %v956_v57  ;;  %v1021_v45 = vpop.permute.xlu2 %1020 }
 0x6d0   :  { %1215 = vmatpush.msra.mxu2 %v2395_v52 }
 0x6d1   :  { %1602 = vmatpush.msk.msra.mxu0 %vm3148_vm15, %v2637_v40 }
 0x6d2   :  { %v950_v62 = vpop.permute.xlu1 %949  ;;  %1216 = vmatpush.msra.mxu2 %v2401_v53 }
 0x6d3   :  { %v1029_v44 = vpop.permute.xlu0 %1028  ;;  %1603 = vmatpush.msk.msra.mxu0 %vm3149_vm1, %v950_v62 }
 0x6d4   :  { %1615 = vmatpush.msk.msra.mxu1 %vm3150_vm2, %v1029_v44  ;;  %1217 = vmatpush.msra.mxu2 %v2407_v54 }
 0x6d6   :  { %1616 = vmatpush.msk.msra.mxu1 %vm3151_vm3, %v1027_v61  ;;  %1218 = vmatpush.msra.mxu2 %v2413_v55 }
 0x6d8   :  { %1219 = vmatpush.msra.mxu2 %v2419_v56 }
 0x6da   :  { %v1023_v1 = vpop.permute.xlu1 %1022  ;;  %1220 = vmatpush.msra.mxu2 %v2425_v5 }
 0x6db   :  { %v948_v59 = vpop.permute.xlu0 %947  ;;  %1617 = vmatpush.msk.msra.mxu1 %vm3152_vm0, %v1023_v1 }
 0x6dc   :  { %1604 = vmatpush.msk.msra.mxu0 %vm3153_vm4, %v948_v59  ;;  %1221 = vmatpush.msra.mxu2 %v2431_v0 }
 0x6dd   :  { %1011 = vmatmul.f32.vlgmr.msra.gmra.mxu0 %v2254_v60  ;;  %1618 = vmatpush.msk.msra.mxu1 %vm3154_vm5, %v1021_v45 }
 0x6de   :  { %1078 = vmatmul.f32.vlgmr.msra.gmra.mxu1 %v2307_v7  ;;  %1222 = vmatpush.msra.mxu2 %v2438_v4 }
 0x6e5   :  { %1014 = vmatmul.f32.gmra.mxu0 %v2281_v63 }
 0x6e6   :  { %1081 = vmatmul.f32.gmra.mxu1 %v2315_v9 }
 0x741   :  { %v872_v46 = vpop.f32.mrf.mxu2 }
 0x742   :  { %v878_v49 = vadd.f32 %v872_v46, %v2318_v11 }
 0x749   :  { %v875_v60 = vpop.f32.mrf.mxu2 }
 0x74a   :  { %v939_v48 = vpop.f32.mrf.mxu3  ;;  %v879_v5 = vadd.f32 %v875_v60, %v2321_v17 }
 0x74b   :  { %v945_v51 = vadd.f32 %v939_v48, %v878_v49 }
 0x752   :  { %v942_v56 = vpop.f32.mrf.mxu3 }
 0x753   :  { %v946_v0 = vadd.f32 %v942_v56, %v879_v5 }
 0x75a   :  { %v1012_v52 = vpop.f32.mrf.mxu0 }
 0x75b   :  { %v1018_v53 = vadd.f32 %v1012_v52, %v945_v51  ;;  %v1079_v54 = vpop.f32.mrf.mxu1 }
 0x75d   :  { %v1085_v55 = vadd.f32 %v1079_v54, %v1018_v53 }
 0x75f   :  { %1087 = vadd.xlane.f32.xlu0 %v1085_v55  ;;  %v1093_v7 = vmul.f32 %v1085_v55, %v1085_v55 }
 0x761   :  { %1095 = vadd.xlane.f32.xlu1 %v1093_v7 }
 0x762   :  { %v1015_v63 = vpop.f32.mrf.mxu0 }
 0x763   :  { %v1019_v4 = vadd.f32 %v1015_v63, %v946_v0  ;;  %v1082_v9 = vpop.f32.mrf.mxu1 }
 0x765   :  { %v1086_v37 = vadd.f32 %v1082_v9, %v1019_v4 }
 0x767   :  { %1089 = vadd.xlane.f32.xlu2 %v1086_v37  ;;  %v1094_v33 = vmul.f32 %v1086_v37, %v1086_v37 }
 0x769   :  { %1097 = vadd.xlane.f32.xlu0 %v1094_v33 }
 0x7d2   :  { %v1088_v11 = vpop.xlane.xlu0 %1087 }
 0x7d3   :  { %v1091_v31 = vmul.f32 %v1088_v11, %v1885_v20 }
 0x7d4   :  { %v1096_v50 = vpop.xlane.xlu1 %1095 }
 0x7d5   :  { %v1101_v40 = vmul.f32 %v1091_v31, %v1091_v31  ;;  %v1099_v2 = vmul.f32 %v1096_v50, %v1885_v20  ;;  %v1107_v18 = vsub.f32 %v1085_v55, %v1091_v31 }
 0x7d7   :  { %v1103_v3 = vsub.f32 %v1099_v2, %v1101_v40 }
 0x7d9   :  { %v1105_v17 = vmax.f32 %v1103_v3, 0.0 }
 0x7da   :  { %v1090_v6 = vpop.xlane.xlu2 %1089 }
 0x7db   :  { %v1109_v14 = vadd.f32 1e-05, %v1105_v17  ;;  %v1092_v15 = vmul.f32 %v1090_v6, %v1885_v20 }
 0x7dc   :  { %v1098_v38 = vpop.xlane.xlu0 %1097 }
 0x7dd   :  { %1732 = vrsqrt.f32 %v1109_v14  ;;  %v1102_v19 = vmul.f32 %v1092_v15, %v1092_v15  ;;  %v1100_v24 = vmul.f32 %v1098_v38, %v1885_v20  ;;  %vm1117_vm9 = vweird.f32 %v1109_v14 }
 0x7de   :  { %v1108_v61 = vsub.f32 %v1086_v37, %v1092_v15 }
 0x7df   :  { %v1104_v27 = vsub.f32 %v1100_v24, %v1102_v19  ;;  %v114_v19 = vld [vmem:[%s3037_s3 + $0x170] sm:$0xff]  ;;  %v115_v24 = vld [vmem:[%s3037_s3 + $0x178] sm:$0xff] }
 0x7e0   :  { %1277 = vmatpush.msra.mxu3 %v114_v19  ;;  %1300 = vmatpush.msrb.mxu0 %v115_v24  ;;  %v3158_v24 = vlaneseq }
 0x7e1   :  { %v1106_v10 = vmax.f32 %v1104_v27, 0.0  ;;  %v112_v27 = vld [vmem:[%s3037_s3 + $0x158] sm:$0xff] }
 0x7e2   :  { %1278 = vmatpush.msra.mxu3 %v112_v27  ;;  %v2932_v27 = vshrl.u32 %v3158_v24, 7 }
 0x7e3   :  { %v1733_v47 = vpop.eup %1732  ;;  %v1110_v43 = vadd.f32 1e-05, %v1106_v10  ;;  %v113_v10 = vld [vmem:[%s3037_s3 + $0x160] sm:$0xff] }
 0x7e4   :  { %v1112_v13 = vmul.f32 %v1733_v47, %v1109_v14  ;;  %vm1118_vm8 = vweird.f32 %v1733_v47  ;;  %1301 = vmatpush.msrb.mxu0 %v113_v10  ;;  %vm2936_vm3 = vcmp.eq.s32.totalorder %v2932_v27, %v2074_v21 }
 0x7e5   :  { %1734 = vrsqrt.f32 %v1110_v43  ;;  %vm1119_vm6 = vmor %vm1117_vm9, %vm1118_vm8  ;;  %vm1127_vm10 = vweird.f32 %v1110_v43 }
 0x7e6   :  { %v1113_v23 = vmul.f32 %v1733_v47, %v1112_v13 }
 0x7e8   :  { %v1114_v12 = vmul.f32 0.5, %v1113_v23 }
 0x7ea   :  { %v1115_v42 = vsub.f32 1.5, %v1114_v12 }
 0x7eb   :  { %v1735_v25 = vpop.eup %1734 }
 0x7ec   :  { %v1116_v30 = vmul.f32 %v1733_v47, %v1115_v42  ;;  %v1122_v28 = vmul.f32 %v1735_v25, %v1110_v43  ;;  %vm1128_vm7 = vweird.f32 %v1735_v25 }
 0x7ed   :  { %vm1129_vm11 = vmor %vm1127_vm10, %vm1128_vm7  ;;  %vm1327_vm10 = vcmask 523264  }
 0x7ee   :  { %v1120_v34 = vsel %vm1119_vm6, %v1733_v47, %v1116_v30  ;;  %v1123_v32 = vmul.f32 %v1735_v25, %v1122_v28 }
 0x7ef   :  { %v1131_v26 = vmul.f32 %v1120_v34, %v1107_v18 }
 0x7f0   :  { %v1124_v29 = vmul.f32 0.5, %v1123_v32 }
 0x7f1   :  { %v1133_v39 = vmul.f32 %v2474_v41, %v1131_v26 }
 0x7f2   :  { %v1125_v35 = vsub.f32 1.5, %v1124_v29 }
 0x7f3   :  { %v1135_v58 = vadd.f32 %v2480_v8, %v1133_v39 }
 0x7f4   :  { %v1126_v16 = vmul.f32 %v1735_v25, %v1125_v35  ;;  %v3155_v35 = vld [vmem:[#allocation5_spill] sm:$0xff] }
 0x7f5   :  { %v1137_v57 = vmul.f32 %v1135_v58, %v1135_v58 }
 0x7f6   :  { %v1130_v62 = vsel %vm1129_vm11, %v1735_v25, %v1126_v16 }
 0x7f7   :  { %v1139_v44 = vmul.f32 %v1137_v57, %v1135_v58  ;;  %v1132_v1 = vmul.f32 %v1130_v62, %v1108_v61  ;;  %v3156_v57 = vld [vmem:[#allocation6_spill] sm:$0xff] }
 0x7f9   :  { %v1141_v59 = vmul.f32 0.044715, %v1139_v44  ;;  %v1134_v45 = vmul.f32 %v2474_v41, %v1132_v1 }
 0x7fb   :  { %v1143_v46 = vadd.f32 %v1141_v59, %v1135_v58  ;;  %v1136_v48 = vadd.f32 %v2480_v8, %v1134_v45 }
 0x7fd   :  { %v1145_v49 = vmul.f32 0.7978846, %v1143_v46  ;;  %v1138_v51 = vmul.f32 %v1136_v48, %v1136_v48 }
 0x7ff   :  { %1736 = vtanh.f32 %v1145_v49  ;;  %v1140_v52 = vmul.f32 %v1138_v51, %v1136_v48  ;;  %v111_v49 = vld [vmem:[%s3037_s3 + $0x148] sm:$0xff] }
 0x800   :  { %1302 = vmatpush.msrb.mxu0 %v111_v49  ;;  %v108_v51 = vld [vmem:[%s3037_s3 + $0x128] sm:$0xff] }
 0x801   :  { %v1142_v53 = vmul.f32 0.044715, %v1140_v52  ;;  %v109_v52 = vld [vmem:[%s3037_s3 + $0x130] sm:$0xff] }
 0x802   :  { %1303 = vmatpush.msrb.mxu0 %v109_v52 }
 0x803   :  { %v1144_v54 = vadd.f32 %v1142_v53, %v1136_v48  ;;  %v106_v53 = vld [vmem:[%s3037_s3 + $0x110] sm:$0xff] }
 0x805   :  { %v1737_v60 = vpop.eup %1736  ;;  %v1146_v56 = vmul.f32 0.7978846, %v1144_v54  ;;  %v107_v54 = vld [vmem:[%s3037_s3 + $0x118] sm:$0xff] }
 0x806   :  { %v1149_v55 = vadd.f32 1.0, %v1737_v60  ;;  %1304 = vmatpush.msrb.mxu0 %v107_v54  ;;  %v104_v60 = vld [vmem:[%s3037_s3 + $0xf8] sm:$0xff] }
 0x807   :  { %1738 = vtanh.f32 %v1146_v56  ;;  %v102_v56 = vld [vmem:[%s3037_s3 + $0xe0] sm:$0xff] }
 0x808   :  { %v1151_v5 = vmul.f32 0.5, %v1149_v55  ;;  %v105_v55 = vld [vmem:[%s3037_s3 + $0x100] sm:$0xff] }
 0x809   :  { %1305 = vmatpush.msrb.mxu0 %v105_v55 }
 0x80a   :  { %v1153_v7 = vmul.f32 %v1151_v5, %v1135_v58  ;;  %v103_v5 = vld [vmem:[%s3037_s3 + $0xe8] sm:$0xff] }
 0x80b   :  { %1306 = vmatpush.msrb.mxu0 %v103_v5 }
 0x80c   :  { %v1155_v0 = vadd.f32 %v1153_v7, %v2483_v36  ;;  %v100_v7 = vld [vmem:[%s3037_s3 + $0xc8] sm:$0xff] }
 0x80d   :  { %v1739_v63 = vpop.eup %1738 }
 0x80e   :  { %1157 = vadd.xlane.f32.xlu1 %v1155_v0  ;;  %v1163_v41 = vmul.f32 %v1155_v0, %v1155_v0  ;;  %v1150_v4 = vadd.f32 1.0, %v1739_v63  ;;  %v98_v63 = vld [vmem:[%s3037_s3 + $0xb0] sm:$0xff] }
 0x810   :  { %1165 = vadd.xlane.f32.xlu2 %v1163_v41  ;;  %v1152_v8 = vmul.f32 0.5, %v1150_v4  ;;  %v99_v41 = vld [vmem:[%s3037_s3 + $0xb8] sm:$0xff] }
 0x811   :  { %v96_v4 = vld [vmem:[%s3037_s3 + $0x98] sm:$0xff] }
 0x812   :  { %v1154_v9 = vmul.f32 %v1152_v8, %v1136_v48  ;;  %v110_v48 = vld [vmem:[%s3037_s3 + $0x140] sm:$0xff] }
 0x813   :  { %1279 = vmatpush.msra.mxu3 %v110_v48  ;;  %v97_v8 = vld [vmem:[%s3037_s3 + $0xa0] sm:$0xff]  ;;  %v1250_v48 = vadd.s32 128, %v2074_v21 }
 0x814   :  { %v1156_v37 = vadd.f32 %v1154_v9, %v2493_v22  ;;  %v94_v9 = vld [vmem:[%s3037_s3 + $0x80] sm:$0xff] }
 0x815   :  { %1280 = vmatpush.msra.mxu3 %v108_v51 }
 0x816   :  { %1159 = vadd.xlane.f32.xlu0 %v1156_v37  ;;  %v1164_v33 = vmul.f32 %v1156_v37, %v1156_v37 }
 0x817   :  { %1281 = vmatpush.msra.mxu3 %v106_v53 }
 0x818   :  { %1167 = vadd.xlane.f32.xlu1 %v1164_v33  ;;  %v92_v33 = vld [vmem:[%s3037_s3 + $0x68] sm:$0xff] }
 0x819   :  { %1282 = vmatpush.msra.mxu3 %v104_v60 }
 0x81b   :  { %1283 = vmatpush.msra.mxu3 %v102_v56 }
 0x81d   :  { %1284 = vmatpush.msra.mxu3 %v100_v7 }
 0x81f   :  { %1285 = vmatpush.msra.mxu3 %v98_v63  ;;  %v1271_v63 = vmul.u32 8, %v2932_v27 }
 0x821   :  { %1286 = vmatpush.msra.mxu3 %v96_v4 }
 0x823   :  { %1287 = vmatpush.msra.mxu3 %v94_v9 }
 0x825   :  { %1288 = vmatpush.msra.mxu3 %v92_v33 }
 0x881   :  { %v1158_v11 = vpop.xlane.xlu1 %1157 }
 0x882   :  { %v1161_v31 = vmul.f32 %v1158_v11, %v1885_v20  ;;  %v93_v11 = vld [vmem:[%s3037_s3 + $0x70] sm:$0xff] }
 0x883   :  { %v1166_v50 = vpop.xlane.xlu2 %1165 }
 0x884   :  { %v1171_v40 = vmul.f32 %v1161_v31, %v1161_v31  ;;  %v1169_v2 = vmul.f32 %v1166_v50, %v1885_v20  ;;  %v1177_v28 = vsub.f32 %v1155_v0, %v1161_v31  ;;  %v101_v0 = vld [vmem:[%s3037_s3 + $0xd0] sm:$0xff]  ;;  %v91_v50 = vld [vmem:[%s3037_s3 + $0x58] sm:$0xff] }
 0x885   :  { %1307 = vmatpush.msrb.mxu0 %v101_v0  ;;  %v90_v31 = vld [vmem:[%s3037_s3 + $0x50] sm:$0xff] }
 0x886   :  { %v1173_v36 = vsub.f32 %v1169_v2, %v1171_v40  ;;  %1289 = vmatpush.msra.mxu3 %v90_v31  ;;  %v88_v40 = vld [vmem:[%s3037_s3 + $0x38] sm:$0xff]  ;;  %v89_v2 = vld [vmem:[%s3037_s3 + $0x40] sm:$0xff] }
 0x887   :  { %1308 = vmatpush.msrb.mxu0 %v99_v41 }
 0x888   :  { %v1175_v3 = vmax.f32 %v1173_v36, 0.0  ;;  %1290 = vmatpush.msra.mxu3 %v88_v40  ;;  %v86_v36 = vld [vmem:[%s3037_s3 + $0x20] sm:$0xff] }
 0x889   :  { %v1160_v6 = vpop.xlane.xlu0 %1159  ;;  %1309 = vmatpush.msrb.mxu0 %v97_v8  ;;  %v1273_v8 = vadd.s32 8, %v1271_v63 }
 0x88a   :  { %v1179_v17 = vadd.f32 1e-05, %v1175_v3  ;;  %v1162_v14 = vmul.f32 %v1160_v6, %v1885_v20  ;;  %v87_v3 = vld [vmem:[%s3037_s3 + $0x28] sm:$0xff]  ;;  %v85_v6 = vld [vmem:[%s3037_s3 + $0x10] sm:$0xff]  ;;  %1291 = vmatpush.msra.mxu3 %v86_v36 }
 0x88b   :  { %v1168_v15 = vpop.xlane.xlu1 %1167 }
 0x88c   :  { %1740 = vrsqrt.f32 %v1179_v17  ;;  %v1172_v38 = vmul.f32 %v1162_v14, %v1162_v14  ;;  %v1170_v22 = vmul.f32 %v1168_v15, %v1885_v20  ;;  %vm1187_vm13 = vweird.f32 %v1179_v17  ;;  %v3157_v15 = vld [vmem:[#allocation7_spill] sm:$0xff] }
 0x88d   :  { %v1178_v44 = vsub.f32 %v1156_v37, %v1162_v14  ;;  %v95_v37 = vld [vmem:[%s3037_s3 + $0x88] sm:$0xff] }
 0x88e   :  { %v1174_v47 = vsub.f32 %v1170_v22, %v1172_v38  ;;  %1310 = vmatpush.msrb.mxu0 %v95_v37 }
 0x890   :  { %v1176_v20 = vmax.f32 %v1174_v47, 0.0  ;;  %1311 = vmatpush.msrb.mxu0 %v93_v11  ;;  %v1452_v47 = vld [vmem:[%s3038_s4 + $0x8] sm:$0xff] }
 0x892   :  { %v1741_v13 = vpop.eup %1740  ;;  %v1180_v23 = vadd.f32 1e-05, %v1176_v20  ;;  %1312 = vmatpush.msrb.mxu0 %v91_v50  ;;  %v1264_v20 = vadd.s32 16, %v2932_v27  ;;  %v1694_v50 = vld [vmem:[%s3041_s7 + $0x2] ss:$0 sm:$0xff] }
 0x893   :  { %v1182_v43 = vmul.f32 %v1741_v13, %v1179_v17  ;;  %vm1188_vm12 = vweird.f32 %v1741_v13  ;;  %v84_v17 = vld [vmem:[%s3037_s3 + $0x8] sm:$0xff] }
 0x894   :  { %1742 = vrsqrt.f32 %v1180_v23  ;;  %vm1189_vm14 = vmor %vm1187_vm13, %vm1188_vm12  ;;  %vm1197_vm1 = vweird.f32 %v1180_v23  ;;  %1313 = vmatpush.msrb.mxu0 %v89_v2  ;;  %1292 = vmatpush.msra.mxu3 %v84_v17  ;;  %vm2945_vm0 = vcmp.eq.s32.totalorder %v1264_v20, %v2074_v21  ;;  %vm1272_vm12 = vcmp.ge.s32.totalorder %v2074_v21, %v1271_v63 }
 0x895   :  { %v1183_v12 = vmul.f32 %v1741_v13, %v1182_v43  ;;  %v1815_v43 = vmov 1.0   ;;  %vm1274_vm13 = vcmp.lt.s32.totalorder %v2074_v21, %v1273_v8  ;;  %v1817_v17 = vmov 24.0  }
 0x896   :  { %1314 = vmatpush.msrb.mxu0 %v87_v3  ;;  %1619 = vmatpush.msk.msrb.mxu1 %vm2936_vm3, %v1815_v43 }
 0x897   :  { %v1184_v42 = vmul.f32 0.5, %v1183_v12  ;;  %1635 = vmatpush.msk.msrb.mxu2 %vm2945_vm0, %v1815_v43 }
 0x898   :  { %1315 = vmatpush.msrb.mxu0 %v85_v6  ;;  %1620 = vmatpush.msk.msrb.mxu1 %vm2945_vm0, %v1815_v43 }
 0x899   :  { %v1185_v25 = vsub.f32 1.5, %v1184_v42 }
 0x89a   :  { %v1743_v30 = vpop.eup %1742 }
 0x89b   :  { %v1186_v18 = vmul.f32 %v1741_v13, %v1185_v25  ;;  %v1192_v34 = vmul.f32 %v1743_v30, %v1180_v23  ;;  %vm1198_vm15 = vweird.f32 %v1743_v30 }
 0x89c   :  { %vm1199_vm2 = vmor %vm1197_vm1, %vm1198_vm15  ;;  %vm1381_vm15 = vcmask 130048   ;;  %vm1405_vm1 = vcmask 189440  }
 0x89d   :  { %v1190_v26 = vsel %vm1189_vm14, %v1741_v13, %v1186_v18  ;;  %v1193_v32 = vmul.f32 %v1743_v30, %v1192_v34  ;;  %v1263_v13 = vadd.s32 8, %v2932_v27  ;;  %vm1275_vm14 = vmand %vm1272_vm12, %vm1274_vm13 }
 0x89e   :  { %v1201_v39 = vmul.f32 %v1190_v26, %v1177_v28 }
 0x89f   :  { %v1194_v29 = vmul.f32 0.5, %v1193_v32  ;;  %vm2950_vm4 = vcmp.eq.s32.totalorder %v1263_v13, %v2074_v21 }
 0x8a0   :  { %v1203_v58 = vmul.f32 %v3155_v35, %v1201_v39  ;;  %1621 = vmatpush.msk.msrb.mxu1 %vm2950_vm4, %v1815_v43  ;;  %1636 = vmatpush.msk.msrb.mxu2 %vm2950_vm4, %v1815_v43 }
 0x8a1   :  { %v1195_v16 = vsub.f32 1.5, %v1194_v29 }
 0x8a2   :  { %v2838_v61 = vadd.f32 %v3156_v57, %v1203_v58  ;;  %1622 = vmatpush.msk.msrb.mxu1 %vm2936_vm3, %v1815_v43  ;;  %1637 = vmatpush.msk.msrb.mxu2 %vm2936_vm3, %v1815_v43 }
 0x8a3   :  { %v1196_v62 = vmul.f32 %v1743_v30, %v1195_v16 }
 0x8a4   :  { %1223 = vmatmul.f32.vlgmr.msra.gmra.mxu2 %v2838_v61  ;;  %1623 = vmatpush.msk.msrb.mxu1 %vm2945_vm0, %v1815_v43 }
 0x8a5   :  { %v1200_v1 = vsel %vm1199_vm2, %v1743_v30, %v1196_v62  ;;  %1638 = vmatpush.msk.msrb.mxu2 %vm2945_vm0, %v1815_v43 }
 0x8a6   :  { %v1202_v59 = vmul.f32 %v1200_v1, %v1178_v44  ;;  %1624 = vmatpush.msk.msrb.mxu1 %vm2950_vm4, %v1815_v43 }
 0x8a7   :  { %1639 = vmatpush.msk.msrb.mxu2 %vm2950_vm4, %v1815_v43 }
 0x8a8   :  { %v1204_v45 = vmul.f32 %v3155_v35, %v1202_v59  ;;  %1625 = vmatpush.msk.msrb.mxu1 %vm2936_vm3, %v1815_v43 }
 0x8a9   :  { %1640 = vmatpush.msk.msrb.mxu2 %vm2936_vm3, %v1815_v43 }
 0x8aa   :  { %v2843_v46 = vadd.f32 %v3156_v57, %v1204_v45  ;;  %1626 = vmatpush.msk.msrb.mxu1 %vm2945_vm0, %v1815_v43  ;;  %v1253_v45 = vmul.u32 24, %v2932_v27 }
 0x8ab   :  { %1641 = vmatpush.msk.msrb.mxu2 %vm2945_vm0, %v1815_v43 }
 0x8ac   :  { %1226 = vmatmul.f32.gmra.mxu2 %v2843_v46  ;;  %1627 = vmatpush.msk.msrb.mxu1 %vm2950_vm4, %v1815_v43  ;;  %v1256_v49 = vadd.s32 24, %v1253_v45  ;;  %vm1255_vm5 = vcmp.ge.s32.totalorder %v1250_v48, %v1253_v45  ;;  %vm1254_vm6 = vcmp.ge.s32.totalorder %v2074_v21, %v1253_v45 }
 0x8ad   :  { %1642 = vmatpush.msk.msrb.mxu2 %vm2950_vm4, %v1815_v43 }
 0x8ae   :  { %1628 = vmatpush.msk.msrb.mxu1 %vm2936_vm3, %v1815_v43  ;;  %vm1258_vm8 = vcmp.lt.s32.totalorder %v1250_v48, %v1256_v49  ;;  %vm1257_vm7 = vcmp.lt.s32.totalorder %v2074_v21, %v1256_v49 }
 0x8af   :  { %vm1260_vm9 = vmand %vm1255_vm5, %vm1258_vm8  ;;  %vm1455_vm5 = vcmask 195584   ;;  %vm1479_vm8 = vcmask 25600  }
 0x8b0   :  { %1629 = vmatpush.msk.msrb.mxu1 %vm2945_vm0, %v1815_v43  ;;  %vm1259_vm11 = vmand %vm1254_vm6, %vm1257_vm7 }
 0x8b2   :  { %1630 = vmatpush.msk.msrb.mxu1 %vm2950_vm4, %v1815_v43 }
 0x8b4   :  { %1631 = vmatpush.msk.msrb.mxu1 %vm2936_vm3, %v1815_v43 }
 0x8b6   :  { %1632 = vmatpush.msk.msrb.mxu1 %vm2945_vm0, %v1815_v43 }
 0x8b8   :  { %1633 = vmatpush.msk.msrb.mxu1 %vm2950_vm4, %v1815_v43 }
 0x8ba   :  { %1634 = vmatpush.msk.msrb.mxu1 %vm2936_vm3, %v1815_v43 }
 0x927   :  { %v1224_v14 = vpop.f32.mrf.mxu2 }
 0x928   :  { %v1225_v38 = vadd.f32 %v3157_v15, %v1224_v14 }
 0x92a   :  { %v1230_v22 = vmul.f32 %v1225_v38, %v1225_v38 }
 0x92c   :  { %v1232_v19 = vmul.f32 %v1230_v22, %v1225_v38 }
 0x92e   :  { %v1234_v10 = vmul.f32 0.044715, %v1232_v19 }
 0x92f   :  { %v1227_v12 = vpop.f32.mrf.mxu2 }
 0x930   :  { %v1236_v23 = vadd.f32 %v1234_v10, %v1225_v38  ;;  %v1228_v30 = vadd.f32 %v3157_v15, %v1227_v12  ;;  %v1453_v10 = vld [vmem:[%s3038_s4 + $0x10] sm:$0xff] }
 0x931   :  { %1472 = vmatpush.msra.mxu0 %v1453_v10 }
 0x932   :  { %v1238_v18 = vmul.f32 0.7978846, %v1236_v23  ;;  %v1231_v28 = vmul.f32 %v1228_v30, %v1228_v30  ;;  %v1451_v23 = vld [vmem:[%s3038_s4] sm:$0xff] }
 0x933   :  { %1473 = vmatpush.msra.mxu0 %v1452_v47 }
 0x934   :  { %1744 = vtanh.f32 %v1238_v18  ;;  %v1233_v34 = vmul.f32 %v1231_v28, %v1228_v30 }
 0x935   :  { %1474 = vmatpush.msra.mxu0 %v1451_v23 }
 0x936   :  { %v1235_v26 = vmul.f32 0.044715, %v1233_v34 }
 0x938   :  { %v1237_v32 = vadd.f32 %v1235_v26, %v1228_v30 }
 0x93a   :  { %v1745_v39 = vpop.eup %1744  ;;  %v1239_v35 = vmul.f32 0.7978846, %v1237_v32 }
 0x93b   :  { %v1242_v29 = vadd.f32 1.0, %v1745_v39 }
 0x93c   :  { %1746 = vtanh.f32 %v1239_v35 }
 0x93d   :  { %v1244_v58 = vmul.f32 0.5, %v1242_v29  ;;  %1748 = vrcp.f32 %v1817_v17  ;;  %v1695_v29 = vld [vmem:[%s3041_s7] ss:$0 sm:$0xff] }
 0x93f   :  { %v1246_v16 = vmul.f32 %v1244_v58, %v1225_v38  ;;  %v1696_v58 = vld [vmem:[%s3041_s7 + $0x1] ss:$0 sm:$0xff] }
 0x941   :  { %v1248_v57 = vadd.f32 %v1246_v16, %v2838_v61 }
 0x942   :  { %v1747_v62 = vpop.eup %1746 }
 0x943   :  { %1293 = vmatmul.f32.vlgmr.msra.gmra.mxu3 %v1248_v57  ;;  %1316 = vmatmul.f32.vlgmr.msrb.gmra.mxu0 %v1248_v57  ;;  %v1243_v44 = vadd.f32 1.0, %v1747_v62  ;;  %v1749_v6 = vpop.eup %1748 }
 0x944   :  { %v1410_v14 = vmul.f32 24.0, %v1749_v6  ;;  %vm1414_vm2 = vweird.f32 %v1749_v6 }
 0x945   :  { %v1245_v1 = vmul.f32 0.5, %v1243_v44 }
 0x946   :  { %v1411_v15 = vsub.f32 1.0, %v1410_v14 }
 0x947   :  { %v1247_v59 = vmul.f32 %v1245_v1, %v1228_v30 }
 0x948   :  { %v1412_v38 = vmul.f32 %v1749_v6, %v1411_v15 }
 0x949   :  { %v1249_v61 = vadd.f32 %v1247_v59, %v2843_v46  ;;  %v1816_v46 = vmov 0.0  }
 0x94a   :  { %v1262_v51 = vsel %vm1260_vm9, 1.0, %v1816_v46  ;;  %v1261_v54 = vsel %vm1259_vm11, 1.0, %v1816_v46  ;;  %v1276_v31 = vsel %vm1275_vm14, 1.0, %v1816_v46  ;;  %v1413_v22 = vadd.f32 %v1749_v6, %v1412_v38 }
 0x94b   :  { %1296 = vmatmul.f32.gmra.mxu3 %v1249_v61  ;;  %1319 = vmatmul.f32.gmra.mxu0 %v1249_v61 }
 0x94c   :  { %v1415_v19 = vsel %vm1414_vm2, %v1749_v6, %v1413_v22 }
 0x9c0   :  { %v1317_v52 = vpop.f32.mrf.mxu0 }
 0x9c1   :  { %v1324_v53 = vmul.f32 %v1317_v52, %v1262_v51  ;;  %v1697_v52 = vld [vmem:[%s3041_s7 + $0x3] ss:$0 sm:$0xff] }
 0x9c3   :  { %1643 = vmatmul.msk.f32.vlgmr.msrb.gmra.mxu2 %vm1327_vm10, %v1324_v53 }
 0x9c6   :  { %v1294_v60 = vpop.f32.mrf.mxu3 }
 0x9c7   :  { %v1323_v55 = vmul.f32 %v1294_v60, %v1261_v54 }
 0x9c8   :  { %v1320_v56 = vpop.f32.mrf.mxu0 }
 0x9c9   :  { %1350 = vmatmul.f32.vlgmr.msrb.gmra.mxu1 %v1323_v55  ;;  %v1326_v5 = vmul.f32 %v1320_v56, %v1262_v51 }
 0x9cb   :  { %1644 = vmatmul.msk.f32.gmra.mxu2 %vm1327_vm10, %v1326_v5 }
 0x9ce   :  { %v1297_v7 = vpop.f32.mrf.mxu3 }
 0x9cf   :  { %v1325_v0 = vmul.f32 %v1297_v7, %v1261_v54 }
 0x9d1   :  { %1353 = vmatmul.f32.gmra.mxu1 %v1325_v0 }
 0xa46   :  { %v1351_v41 = vpop.f32.mrf.mxu1  ;;  %v1374_v4 = vpop.f32.mrf.mxu2 }
 0xa47   :  { %v1375_v11 = vadd.f32 %v1374_v4, %v1351_v41 }
 0xa4e   :  { %v1354_v9 = vpop.f32.mrf.mxu1  ;;  %v1377_v37 = vpop.f32.mrf.mxu2 }
 0xa4f   :  { %v1378_v33 = vadd.f32 %v1377_v37, %v1354_v9 }
 0xa51   :  { %1399 = vmatpush.msrb.mxu3 %v1378_v33 }
 0xa53   :  { %1400 = vmatpush.msrb.mxu3 %v1375_v11 }
 0xa54   :  { %1645 = vmatmul.msk.f32.vlgmr.msrb.gmra.mxu3 %vm1381_vm15, %v1276_v31 }
 0xad7   :  { %v1402_v40 = vpop.f32.mrf.mxu3 }
 0xad8   :  { %v1403_v2 = vadd.f32 %v1694_v50, %v1402_v40 }
 0xada   :  { %v1406_v36 = vsel %vm1405_vm1, %v1403_v2, 0.0  ;;  %v1417_v3 = vmul.f32 %v1403_v2, %v1403_v2 }
 0xadb   :  { %1407 = vadd.xlane.f32.xlu2 %v1406_v36 }
 0xadc   :  { %v1418_v21 = vsel %vm1405_vm1, %v1417_v3, 0.0 }
 0xadd   :  { %1419 = vadd.xlane.f32.xlu0 %v1418_v21 }
 0xb4e   :  { %v1408_v24 = vpop.xlane.xlu2 %1407 }
 0xb4f   :  { %v1416_v27 = vmul.f32 %v1415_v19, %v1408_v24 }
 0xb50   :  { %v1420_v20 = vpop.xlane.xlu0 %1419 }
 0xb51   :  { %v1422_v13 = vmul.f32 %v1416_v27, %v1416_v27  ;;  %v1421_v43 = vmul.f32 %v1420_v20, %v1415_v19  ;;  %v1425_v39 = vsub.f32 %v1403_v2, %v1416_v27 }
 0xb53   :  { %v1423_v12 = vsub.f32 %v1421_v43, %v1422_v13 }
 0xb55   :  { %v1424_v42 = vmax.f32 %v1423_v12, 0.0 }
 0xb57   :  { %v1426_v25 = vadd.f32 1e-05, %v1424_v42 }
 0xb59   :  { %1750 = vrsqrt.f32 %v1426_v25  ;;  %vm1433_vm0 = vweird.f32 %v1426_v25 }
 0xb5f   :  { %v1751_v30 = vpop.eup %1750 }
 0xb60   :  { %v1428_v18 = vmul.f32 %v1751_v30, %v1426_v25  ;;  %vm1434_vm3 = vweird.f32 %v1751_v30 }
 0xb61   :  { %vm1435_vm4 = vmor %vm1433_vm0, %vm1434_vm3 }
 0xb62   :  { %v1429_v28 = vmul.f32 %v1751_v30, %v1428_v18 }
 0xb64   :  { %v1430_v34 = vmul.f32 0.5, %v1429_v28 }
 0xb66   :  { %v1431_v26 = vsub.f32 1.5, %v1430_v34 }
 0xb68   :  { %v1432_v32 = vmul.f32 %v1751_v30, %v1431_v26 }
 0xb6a   :  { %v1436_v35 = vsel %vm1435_vm4, %v1751_v30, %v1432_v32 }
 0xb6b   :  { %v1437_v16 = vmul.f32 %v1436_v35, %v1425_v39 }
 0xb6d   :  { %v1439_v57 = vmul.f32 %v1695_v29, %v1437_v16 }
 0xb6f   :  { %v1441_v62 = vadd.f32 %v1696_v58, %v1439_v57 }
 0xb71   :  { %v1442_v44 = vmul.f32 %v1441_v62, %v1441_v62 }
 0xb73   :  { %v1443_v1 = vmul.f32 %v1442_v44, %v1441_v62 }
 0xb75   :  { %v1444_v59 = vmul.f32 0.044715, %v1443_v1 }
 0xb77   :  { %v1445_v61 = vadd.f32 %v1444_v59, %v1441_v62 }
 0xb79   :  { %v1446_v45 = vmul.f32 0.7978846, %v1445_v61 }
 0xb7b   :  { %1752 = vtanh.f32 %v1446_v45 }
 0xb81   :  { %v1753_v48 = vpop.eup %1752 }
 0xb82   :  { %v1448_v49 = vadd.f32 1.0, %v1753_v48 }
 0xb84   :  { %v1449_v46 = vmul.f32 0.5, %v1448_v49 }
 0xb86   :  { %v1450_v51 = vmul.f32 %v1449_v46, %v1441_v62 }
 0xb88   :  { %1646 = vmatmul.msk.f32.vlgmr.msra.gmra.mxu0 %vm1455_vm5, %v1450_v51 }
 0xc05   :  { %v1476_v53 = vpop.f32.mrf.mxu0 }
 0xc06   :  { %v1477_v54 = vadd.f32 %v1697_v52, %v1476_v53 }
 0xc08   :  { %1480 = vst.msk [vmem:[#allocation2] sm:$0x3] %vm1479_vm8, %v1477_v54 }
 0xc09   :  { %1491 = dma.vmem_to_hbm [thread:$0]  %s1487_s13, 32, %s1489_s22, [#allocation3]  }
 0xc0a   :  { %1780 = dma.done.wait [#allocation3], 32  }
 0xc0b   :  { %1781 = vsyncadd [#allocation3], 4294967264 }
 0xc0c   :  { %1496 = vsyncpa [#allocation3], 1 }

</bundles_post_ra>
